<compile_context>
chip_gen: v7x
topology: tpu7x:2x2x1
jax: 0.10.0
libtpu: 0.0.40
codegen_flags: <defaults>
</compile_context>

<pallas_src>
import functools

import jax
import jax.numpy as jnp
from jax import lax
from jax.experimental import pallas as pl
from jax.experimental.pallas import tpu as pltpu

IN_FEATURES = 256 * 256   # 65536
HIDDEN = 128
OUT_FEATURES = 10
OUT_PADDED = 128          # lane-dense kernel output; sliced to 10 in the wrapper


def _simple_nn_kernel(x_ref, w1_ref, b1_ref, w2_ref, b2_ref, o_ref, acc_ref):
    """grid = (nk,): K-reduction of x @ W1 with the full epilogue fused into the
    last step.  acc_ref is an f32 (B, HIDDEN) VMEM accumulator that persists
    across grid steps; b1/w2/b2 are tiny constant-resident VMEM operands."""
    k = pl.program_id(0)

    @pl.when(k == 0)
    def _():
        acc_ref[...] = jnp.zeros_like(acc_ref)

    # x arrives f32 from HBM; cast the tile to bf16 on-core (W1 is already bf16),
    # accumulate on the MXU in f32.
    acc_ref[...] += jnp.dot(
        x_ref[...].astype(jnp.bfloat16),
        w1_ref[...],
        preferred_element_type=jnp.float32,
    )

    # Fused epilogue on the final K step: bias + ReLU + Linear2 + bias.
    @pl.when(k == pl.num_programs(0) - 1)
    def _():
        h = jnp.maximum(acc_ref[...] + b1_ref[...], 0.0)                     # (B, 128)
        y = jnp.dot(h, w2_ref[...], preferred_element_type=jnp.float32)      # (B, 128)
        o_ref[...] = (y + b2_ref[...]).astype(o_ref.dtype)


def prepare_params(w1, b1, w2, b2):
    """One-time (checkpoint-load time) parameter prep, kept OUTSIDE the jitted
    forward so no per-call convert / pad / reshape HLO ops are added."""
    w1_bf = jnp.asarray(w1, jnp.bfloat16)                                     # (65536, 128)
    b1_2d = jnp.asarray(b1, jnp.float32).reshape(1, HIDDEN)                   # (1, 128)
    w2_p = jnp.pad(jnp.asarray(w2, jnp.float32),
                   ((0, 0), (0, OUT_PADDED - OUT_FEATURES)))                  # (128, 128)
    b2_p = jnp.pad(jnp.asarray(b2, jnp.float32),
                   (0, OUT_PADDED - OUT_FEATURES)).reshape(1, OUT_PADDED)     # (1, 128)
    return w1_bf, b1_2d, w2_p, b2_p


@functools.partial(jax.jit, static_argnames=("tk",))
def simple_nn_forward(x, w1_bf, b1_2d, w2_p, b2_p, *, tk=16384):
    """x: (B, ...) with prod(...) == 65536 -> (B, 10) float32.

    Pass params already run through prepare_params() (W1 in bf16, padded W2/b2).
    Tolerance contract: x and W1 are rounded to bf16 before the MXU, so outputs
    match a pure-f32 PyTorch SimpleNN only to ~1e-2.
    """
    assert w1_bf.dtype == jnp.bfloat16, "pass W1 pre-cast to bf16 (use prepare_params)"
    B = x.shape[0]
    x2d = x.reshape(B, IN_FEATURES)            # nn.Flatten; stays f32, cast in-kernel

    assert IN_FEATURES % tk == 0
    nk = IN_FEATURES // tk                     # 4 K steps at tk=16384

    cost = pl.CostEstimate(
        flops=2 * B * IN_FEATURES * HIDDEN + 2 * B * HIDDEN * OUT_PADDED,
        transcendentals=0,
        bytes_accessed=(w1_bf.size * 2            # 16 MiB bf16 W1 stream (dominant)
                        + x2d.size * 4            # x in f32
                        + (HIDDEN + HIDDEN * OUT_PADDED + OUT_PADDED) * 4
                        + B * OUT_PADDED * 4),
    )

    y_padded = pl.pallas_call(
        _simple_nn_kernel,
        out_shape=jax.ShapeDtypeStruct((B, OUT_PADDED), jnp.float32),
        grid_spec=pltpu.PrefetchScalarGridSpec(
            num_scalar_prefetch=0,
            grid=(nk,),
            in_specs=[
                pl.BlockSpec((B, tk), lambda k: (0, k)),                 # x tile (f32)
                pl.BlockSpec((tk, HIDDEN), lambda k: (k, 0)),            # W1 tile (bf16)
                pl.BlockSpec((1, HIDDEN), lambda k: (0, 0)),             # b1 (resident)
                pl.BlockSpec((HIDDEN, OUT_PADDED), lambda k: (0, 0)),    # W2 (resident)
                pl.BlockSpec((1, OUT_PADDED), lambda k: (0, 0)),         # b2 (resident)
            ],
            out_specs=pl.BlockSpec((B, OUT_PADDED), lambda k: (0, 0)),   # resident output
            scratch_shapes=[pltpu.VMEM((B, HIDDEN), jnp.float32)],       # f32 accumulator
        ),
        compiler_params=pltpu.CompilerParams(
            dimension_semantics=("arbitrary",),   # K reduction axis
            vmem_limit_bytes=32 * 1024 * 1024,
        ),
        cost_estimate=cost,
    )(x2d, w1_bf, b1_2d, w2_p, b2_p)

    return y_padded[:, :OUT_FEATURES]


def init_params(key):
    """Deterministic init mirroring nn.Linear default (U[-1/sqrt(fan_in), 1/sqrt(fan_in)])."""
    k1, k2, k3, k4 = jax.random.split(key, 4)
    bound1 = 1.0 / jnp.sqrt(jnp.float32(IN_FEATURES))
    bound2 = 1.0 / jnp.sqrt(jnp.float32(HIDDEN))
    w1 = jax.random.uniform(k1, (IN_FEATURES, HIDDEN), jnp.float32, -bound1, bound1)
    b1 = jax.random.uniform(k2, (HIDDEN,), jnp.float32, -bound1, bound1)
    w2 = jax.random.uniform(k3, (HIDDEN, OUT_FEATURES), jnp.float32, -bound2, bound2)
    b2 = jax.random.uniform(k4, (OUT_FEATURES,), jnp.float32, -bound2, bound2)
    return w1, b1, w2, b2


if __name__ == "__main__":
    key = jax.random.PRNGKey(0)
    k_x, k_p = jax.random.split(key)

    B = 2
    # Flatten dim is fixed by the module (Linear(256*256, 128)); batch kept small.
    x = jax.random.normal(k_x, (B, 256, 256), jnp.float32)
    w1, b1, w2, b2 = init_params(k_p)

    # One-time parameter prep (checkpoint-load time): bf16 W1, padded/reshaped smalls.
    w1_bf, b1_2d, w2_p, b2_p = prepare_params(w1, b1, w2, b2)

    out = simple_nn_forward(x, w1_bf, b1_2d, w2_p, b2_p)
    out = jax.block_until_ready(out)

    # Reference with the same bf16-rounded x / W1 in f32 math (kernel differs only in
    # split-K accumulation order and MXU accumulation path).
    x_ref = x.reshape(B, -1).astype(jnp.bfloat16).astype(jnp.float32)
    w1_ref = w1_bf.astype(jnp.float32)
    h_ref = jnp.maximum(
        jnp.dot(x_ref, w1_ref, precision=lax.Precision.HIGHEST) + b1, 0.0)
    ref = jnp.dot(h_ref, w2, precision=lax.Precision.HIGHEST) + b2

    assert out.shape == (B, OUT_FEATURES)
    assert jnp.allclose(out, ref, atol=1e-2, rtol=1e-2)

    print("KERNEL_OK")
</pallas_src>

<mosaic_0001>
module attributes {stable_mosaic.version = 11 : i64} {
  func.func @_simple_nn_kernel(%arg0: i32, %arg1: memref<2x16384xf32, #tpu.memory_space<vmem>>, %arg2: memref<16384x128xbf16, #tpu.memory_space<vmem>>, %arg3: memref<1x128xf32, #tpu.memory_space<vmem>>, %arg4: memref<128x128xf32, #tpu.memory_space<vmem>>, %arg5: memref<1x128xf32, #tpu.memory_space<vmem>>, %arg6: memref<2x128xf32, #tpu.memory_space<vmem>>, %arg7: memref<2x128xf32, #tpu.memory_space<vmem>>) attributes {dimension_semantics = [#tpu.dimension_semantics<arbitrary>], iteration_bounds = array<i64: 4>, scalar_prefetch = 0 : i64, scratch_operands = 1 : i64, tpu.core_type = #tpu.core_type<tc>, window_params = [{transform_indices = @transform_0, window_bounds = array<i64: 2, 16384>}, {transform_indices = @transform_1, window_bounds = array<i64: 16384, 128>}, {pipeline_mode = #tpu.pipeline_mode<synchronous>, transform_indices = @transform_2, window_bounds = array<i64: 1, 128>}, {pipeline_mode = #tpu.pipeline_mode<synchronous>, transform_indices = @transform_3, window_bounds = array<i64: 128, 128>}, {pipeline_mode = #tpu.pipeline_mode<synchronous>, transform_indices = @transform_4, window_bounds = array<i64: 1, 128>}, {pipeline_mode = #tpu.pipeline_mode<synchronous>, transform_indices = @transform_5, window_bounds = array<i64: 2, 128>}]} {
    %c0_i32 = arith.constant 0 : i32
    %0 = arith.cmpi eq, %arg0, %c0_i32 : i32
    %1 = arith.extui %0 : i1 to i32
    %c0_i32_0 = arith.constant 0 : i32
    %2 = arith.cmpi ne, %1, %c0_i32_0 : i32
    scf.if %2 {
      %cst_9 = arith.constant 0.000000e+00 : f32
      %13 = vector.broadcast %cst_9 : f32 to vector<2x128xf32>
      %c0_10 = arith.constant 0 : index
      %c0_11 = arith.constant 0 : index
      %14 = vector.load %arg7[%c0_10, %c0_11] : memref<2x128xf32, #tpu.memory_space<vmem>>, vector<2x128xf32>
      tpu.vector_store %arg7[%c0_10, %c0_11], %13 {strides = array<i32>} : memref<2x128xf32, #tpu.memory_space<vmem>>, vector<2x128xf32>,
    } else {
    }
    %c0 = arith.constant 0 : index
    %c0_1 = arith.constant 0 : index
    %3 = vector.load %arg7[%c0, %c0_1] : memref<2x128xf32, #tpu.memory_space<vmem>>, vector<2x128xf32>
    %c0_2 = arith.constant 0 : index
    %c0_3 = arith.constant 0 : index
    %4 = vector.load %arg1[%c0_2, %c0_3] : memref<2x16384xf32, #tpu.memory_space<vmem>>, vector<2x16384xf32>
    %5 = arith.truncf %4 : vector<2x16384xf32> to vector<2x16384xbf16>
    %c0_4 = arith.constant 0 : index
    %c0_5 = arith.constant 0 : index
    %6 = vector.load %arg2[%c0_4, %c0_5] : memref<16384x128xbf16, #tpu.memory_space<vmem>>, vector<16384x128xbf16>
    %cst = arith.constant dense<0.000000e+00> : vector<2x128xf32>
    %7 = tpu.matmul %5, %6, %cst {dimension_numbers = #tpu.dot_dimension_numbers<[1], [0], [0], [1], [0, 0, 1, 1], [], []>} : vector<2x16384xbf16>, vector<16384x128xbf16>, vector<2x128xf32> -> vector<2x128xf32>
    %8 = arith.addf %3, %7 : vector<2x128xf32>
    %c0_6 = arith.constant 0 : index
    %c0_7 = arith.constant 0 : index
    %9 = vector.load %arg7[%c0_6, %c0_7] : memref<2x128xf32, #tpu.memory_space<vmem>>, vector<2x128xf32>
    tpu.vector_store %arg7[%c0_6, %c0_7], %8 {strides = array<i32>} : memref<2x128xf32, #tpu.memory_space<vmem>>, vector<2x128xf32>,
    %c3_i32 = arith.constant 3 : i32
    %10 = arith.cmpi eq, %arg0, %c3_i32 : i32
    %11 = arith.extui %10 : i1 to i32
    %c0_i32_8 = arith.constant 0 : i32
    %12 = arith.cmpi ne, %11, %c0_i32_8 : i32
    scf.if %12 {
      %c0_9 = arith.constant 0 : index
      %c0_10 = arith.constant 0 : index
      %13 = vector.load %arg7[%c0_9, %c0_10] : memref<2x128xf32, #tpu.memory_space<vmem>>, vector<2x128xf32>
      %c0_11 = arith.constant 0 : index
      %c0_12 = arith.constant 0 : index
      %14 = vector.load %arg3[%c0_11, %c0_12] : memref<1x128xf32, #tpu.memory_space<vmem>>, vector<1x128xf32>
      %15 = vector.broadcast %14 : vector<1x128xf32> to vector<2x128xf32>
      %16 = arith.addf %13, %15 : vector<2x128xf32>
      %cst_13 = arith.constant 0.000000e+00 : f32
      %17 = vector.broadcast %cst_13 : f32 to vector<2x128xf32>
      %18 = arith.maximumf %16, %17 : vector<2x128xf32>
      %c0_14 = arith.constant 0 : index
      %c0_15 = arith.constant 0 : index
      %19 = vector.load %arg4[%c0_14, %c0_15] : memref<128x128xf32, #tpu.memory_space<vmem>>, vector<128x128xf32>
      %cst_16 = arith.constant dense<0.000000e+00> : vector<2x128xf32>
      %20 = tpu.matmul %18, %19, %cst_16 {dimension_numbers = #tpu.dot_dimension_numbers<[1], [0], [0], [1], [0, 0, 1, 1], [], []>} : vector<2x128xf32>, vector<128x128xf32>, vector<2x128xf32> -> vector<2x128xf32>
      %c0_17 = arith.constant 0 : index
      %c0_18 = arith.constant 0 : index
      %21 = vector.load %arg5[%c0_17, %c0_18] : memref<1x128xf32, #tpu.memory_space<vmem>>, vector<1x128xf32>
      %22 = vector.broadcast %21 : vector<1x128xf32> to vector<2x128xf32>
      %23 = arith.addf %20, %22 : vector<2x128xf32>
      %c0_19 = arith.constant 0 : index
      %c0_20 = arith.constant 0 : index
      %24 = vector.load %arg6[%c0_19, %c0_20] : memref<2x128xf32, #tpu.memory_space<vmem>>, vector<2x128xf32>
      tpu.vector_store %arg6[%c0_19, %c0_20], %23 {strides = array<i32>} : memref<2x128xf32, #tpu.memory_space<vmem>>, vector<2x128xf32>,
    } else {
    }
    return
  }
  func.func @transform_0(%arg0: i32) -> (i32, i32) {
    %c0_i32 = arith.constant 0 : i32
    %c0_i32_0 = arith.constant 0 : i32
    return %c0_i32, %arg0 : i32, i32
  }
  func.func @transform_1(%arg0: i32) -> (i32, i32) {
    %c0_i32 = arith.constant 0 : i32
    %c0_i32_0 = arith.constant 0 : i32
    return %arg0, %c0_i32 : i32, i32
  }
  func.func @transform_2(%arg0: i32) -> (i32, i32) {
    %c0_i32 = arith.constant 0 : i32
    %c0_i32_0 = arith.constant 0 : i32
    %c0_i32_1 = arith.constant 0 : i32
    return %c0_i32, %c0_i32_0 : i32, i32
  }
  func.func @transform_3(%arg0: i32) -> (i32, i32) {
    %c0_i32 = arith.constant 0 : i32
    %c0_i32_0 = arith.constant 0 : i32
    %c0_i32_1 = arith.constant 0 : i32
    return %c0_i32, %c0_i32_0 : i32, i32
  }
  func.func @transform_4(%arg0: i32) -> (i32, i32) {
    %c0_i32 = arith.constant 0 : i32
    %c0_i32_0 = arith.constant 0 : i32
    %c0_i32_1 = arith.constant 0 : i32
    return %c0_i32, %c0_i32_0 : i32, i32
  }
  func.func @transform_5(%arg0: i32) -> (i32, i32) {
    %c0_i32 = arith.constant 0 : i32
    %c0_i32_0 = arith.constant 0 : i32
    %c0_i32_1 = arith.constant 0 : i32
    return %c0_i32, %c0_i32_0 : i32, i32
  }
}

</mosaic_0001>

<bundles_post_ra>
// kernel: simple_nn_forward.1
= control target key start
LH: loop header
LB: loop body
LE: loop exit
PB: predicated region body
PF: predicated region fallthrough
CT: control target
= control target key end

     0   :  { %10 = vsyncpa [#allocation4], 0  ;;  %s17456_s0 = inlined_call_operand.vmem [shape: f32[2,65536], index: 0, kind: input, shape index: {}]   ;;  %s17457_s1 = inlined_call_operand.hbm [shape: bf16[65536,128], index: 1, kind: input, shape index: {}]   ;;  %s17458_s2 = inlined_call_operand.hbm [shape: f32[1,128], index: 2, kind: input, shape index: {}]   ;;  %s17459_s3 = inlined_call_operand.hbm [shape: f32[128,128], index: 3, kind: input, shape index: {}]   ;;  %s17460_s4 = inlined_call_operand.hbm [shape: f32[1,128], index: 4, kind: input, shape index: {}]   ;;  %s17461_s5 = inlined_call_operand.hbm [shape: f32[2,128], index: 5, kind: output, shape index: {}]  }
   0x1   :  { %12 = vsyncpa [#allocation4 + $0x1], 0 }
   0x2   :  { %13 = vsyncpa [#allocation7], 0 }
   0x3   :  { %14 = vsyncpa [#allocation10], 0 }
   0x4   :  { %15 = vsyncpa [#allocation5], 0  ;;  %s16032_s18 = smov 0   ;;  %s16034_s19 = smov 0  }
   0x5   :  { %s16036_s20 = smov 0   ;;  %s16038_s21 = smov 0  }
   0x6 LB: > { %s16051_s22 = sadd.s32 4294967295, %s15986_s21   ;;  %p67_p0 = scmp.ne.s32.totalorder %s15978_s19, %s15974_s18  ;;  %s15986_s21 = sphi %s16038_s21, %s17480_s21   ;;  %s15982_s20 = sphi %s16036_s20, %s17479_s20   ;;  %s15978_s19 = sphi %s16034_s19, %s17478_s19   ;;  %s15974_s18 = sphi %s16032_s18, %s17477_s18  }
   0x7   : > { %p17462_p1 = scmp.eq.s32.totalorder %s16051_s22, 0  ;;  %p12126_p2 = scmp.ge.s32.totalorder %s15986_s21, 1 }
   0x8   : > { %p162_p3 = scmp.lt.s32.totalorder %s15986_s21, 5  ;;  %s15988_s25 = smov [#allocation6]  }
   0x9   : > { %p16060_p5 = por %p17462_p1, %p67_p0  ;;  %s175_s26 = sshll.u32 %s15988_s25, 4  ;;  %s176_s26 = int_to_ptr.vmem [resolvable:$true] %s175_s26 }
   0xa   : > { %p16064_p6 = pnand %p12126_p2, %p162_p3  ;;  %s15989_s27 = smov [#allocation8]  }
   0xb   : > { %s17465_s23 = scalar_select %p16060_p5, 1, 0 }
   0xc   : > { %s17466_s24 = scalar_select %p16064_p6, 1, 0 }
   0xd   : > { %p14676_p7 = pneg %p16064_p6  ;;  %s185_s28 = sshll.u32 %s15989_s27, 4  ;;  %s16076_s28 = int_to_ptr.vmem [resolvable:$true] %s185_s28 }
   0xe   : > { %s15990_s30 = smov [#allocation9]   ;;  %s15800_s9 = scalar_lea.hbm %s17458_s2, 16 }
   0xf   : > { %p16072_p8 = pnand %p14676_p7, %p17462_p1  ;;  %s16078_s6 = sshll.u32 %s15990_s30, 4  ;;  %s200_s6 = int_to_ptr.vmem [resolvable:$true] %s16078_s6 }
  0x10   : > { %p15801_p9 = scmp.ne.s32.totalorder %s17458_s2, %s15800_s9  ;;  %p15807_p13 = scmp.lt.u32.totalorder %s15800_s9, %s17458_s2 }
  0x11   : > { %p16088_p10 = pneg %p16072_p8 }
  0x13   : > { %p15803_p11 = pnand %p16088_p10, %p15801_p9 }
  0x15   : > { %p15804_p12 = pneg %p15803_p11 }
  0x17   : > { %p15809_p0 = pnand %p15807_p13, %p15804_p12 }
  0x19   : > { %15812 = shalt.err (!%p15809_p0)
}
  0x1a   : > { %s15813_s15 = scalar_lea.vmem %s176_s26, 16  ;;  %s15820_s16 = scalar_lea.vmem %s176_s26, 32 }
  0x1b   : > { %p15814_p2 = scmp.ne.s32.totalorder %s176_s26, %s15813_s15  ;;  %p15821_p4 = scmp.lt.s32.totalorder %s176_s26, %s176_s26 }
  0x1c   : > { %p15822_p1 = scmp.lt.s32.totalorder %s15820_s16, %s15813_s15 }
  0x1d   : > { %p15816_p3 = pnand %p15814_p2, %p16088_p10 }
  0x1e   : > { %p15823_p5 = por %p15822_p1, %p15821_p4 }
  0x1f   : > { %p15817_p7 = pneg %p15816_p3 }
  0x21   : > { %p15824_p6 = pnand %p15823_p5, %p15817_p7 }
  0x23   : > { %15827 = shalt.err (!%p15824_p6)
}
  0x24   : > { %14679 = dma.hbm_to_vmem [thread:$0]  (!%p16072_p8), %s17458_s2, 16, %s176_s26, [#allocation7]  }
  0x25   : > { %s15828_s30 = scalar_lea.hbm %s17459_s3, 2048 }
  0x26   : > { %p15829_p9 = scmp.ne.s32.totalorder %s17459_s3, %s15828_s30  ;;  %p15835_p4 = scmp.lt.u32.totalorder %s15828_s30, %s17459_s3 }
  0x28   : > { %p15831_p11 = pnand %p15829_p9, %p16088_p10 }
  0x2a   : > { %p15832_p1 = pneg %p15831_p11 }
  0x2c   : > { %p15837_p5 = pnand %p15835_p4, %p15832_p1 }
  0x2e   : > { %15840 = shalt.err (!%p15837_p5)
}
  0x2f   : > { %s15841_s26 = scalar_lea.vmem %s16076_s28, 2048  ;;  %p15849_p0 = scmp.lt.s32.totalorder %s16076_s28, %s16076_s28 }
  0x30   : > { %p15842_p6 = scmp.ne.s32.totalorder %s16076_s28, %s15841_s26  ;;  %p15850_p2 = scmp.lt.s32.totalorder %s15841_s26, %s15841_s26 }
  0x32   : > { %p15844_p12 = pnand %p15842_p6, %p16088_p10  ;;  %p15851_p3 = por %p15850_p2, %p15849_p0 }
  0x34   : > { %p15845_p13 = pneg %p15844_p12 }
  0x36   : > { %p15852_p7 = pnand %p15851_p3, %p15845_p13 }
  0x38   : > { %15855 = shalt.err (!%p15852_p7)
}
  0x39   : > { %s15991_s11 = smov 128   ;;  %s15992_s13 = smov 8  }
  0x3a   : > { %14682 = dma.hbm_to_vmem [thread:$0]  (!%p16072_p8), %s17459_s3, 2048, %s16076_s28, [#allocation7], %s15991_s11, %s15991_s11, %s15992_s13  }
  0x3b   : > { %s15856_s18 = scalar_lea.hbm %s17460_s4, 16 }
  0x3c   : > { %p15857_p9 = scmp.ne.s32.totalorder %s17460_s4, %s15856_s18  ;;  %p15863_p4 = scmp.lt.u32.totalorder %s15856_s18, %s17460_s4 }
  0x3e   : > { %p15859_p11 = pnand %p15857_p9, %p16088_p10 }
  0x40   : > { %p15860_p1 = pneg %p15859_p11 }
  0x42   : > { %p15865_p5 = pnand %p15863_p4, %p15860_p1 }
  0x44   : > { %15868 = shalt.err (!%p15865_p5)
}
  0x45   : > { %s15869_s8 = scalar_lea.vmem %s200_s6, 16  ;;  %s15876_s28 = scalar_lea.vmem %s200_s6, 32 }
  0x46   : > { %p15870_p6 = scmp.ne.s32.totalorder %s200_s6, %s15869_s8  ;;  %p15877_p0 = scmp.lt.s32.totalorder %s200_s6, %s200_s6 }
  0x47   : > { %p15878_p2 = scmp.lt.s32.totalorder %s15876_s28, %s15869_s8 }
  0x48   : > { %p15872_p12 = pnand %p15870_p6, %p16088_p10 }
  0x49   : > { %p15879_p3 = por %p15878_p2, %p15877_p0 }
  0x4a   : > { %p15873_p13 = pneg %p15872_p12 }
  0x4c   : > { %p15880_p7 = pnand %p15879_p3, %p15873_p13 }
  0x4e   : > { %15883 = shalt.err (!%p15880_p7)
}
  0x4f   : > { %14685 = dma.hbm_to_vmem [thread:$0]  (!%p16072_p8), %s17460_s4, 16, %s200_s6, [#allocation10]  }
  0x50   : > { %s16147_s12 = sadd.s32 1, %s15986_s21   ;;  %s54_s11 = sadd.s32 1, %s15982_s20 }
  0x51   : > { %s51_s26 = ssub.s32 %s15986_s21, %s16147_s12  ;;  %p61_p9 = scmp.ne.s32.totalorder %s15982_s20, %s15978_s19 }
  0x52   : > { %p52_p10 = scmp.eq.s32.totalorder %s51_s26, 0  ;;  %p62_p11 = scmp.eq.s32.totalorder %s15986_s21, 0 }
  0x53   : > { %p14693_p1 = scmp.lt.s32.totalorder %s15986_s21, 4  ;;  %s219_s13 = sand.u32 1, %s15982_s20  }
  0x54   : > { %s16157_s29 = scalar_select %p52_p10, %s15982_s20, %s54_s11  }
  0x55   : > { %p63_p4 = por %p62_p11, %p61_p9  ;;  %s12131_s14 = sshll.u32 %s219_s13, 13 }
  0x56   : > { %s13173_s15 = sshll.u32 %s15986_s21, 17  ;;  %s223_s6 = scalar_lea.vmem [#allocation3], %s12131_s14 }
  0x57   : > { %s16164_s18 = scalar_lea.hbm %s17457_s1, %s13173_s15  ;;  %s230_s25 = sshll.u32 %s223_s6, 4  ;;  %s16166_s25 = int_to_ptr.vmem [resolvable:$true] %s230_s25 }
  0x58   : > { %p16168_p8 = pnand %p14693_p1, %p63_p4  ;;  %s16172_s21 = scalar_lea.sflag [#allocation4], %s219_s13 }
  0x59   : > { %s15884_s30 = scalar_lea.hbm %s16164_s18, 131072  ;;  %s15889_s28 = scalar_lea.hbm %s17457_s1, 524288 }
  0x5a   : > { %p15885_p5 = scmp.ne.s32.totalorder %s16164_s18, %s15884_s30  ;;  %p15886_p6 = pneg %p16168_p8 }
  0x5b   : > { %p15890_p0 = scmp.lt.u32.totalorder %s16164_s18, %s17457_s1  ;;  %p15891_p2 = scmp.lt.u32.totalorder %s15889_s28, %s15884_s30 }
  0x5c   : > { %p15887_p12 = pnand %p15886_p6, %p15885_p5  ;;  %p15893_p7 = scmp.lt.u32.totalorder %s15884_s30, %s16164_s18 }
  0x5d   : > { %p15892_p3 = por %p15891_p2, %p15890_p0 }
  0x5e   : > { %p15888_p13 = pneg %p15887_p12 }
  0x5f   : > { %p15894_p10 = por %p15893_p7, %p15892_p3 }
  0x61   : > { %p15895_p9 = pnand %p15894_p10, %p15888_p13 }
  0x63   : > { %15898 = shalt.err (!%p15895_p9)
}
  0x64   : > { %s15899_s26 = scalar_lea.vmem %s16166_s25, 131072  ;;  %s15993_s11 = smov [#allocation3]  }
  0x65   : > { %p15900_p11 = scmp.ne.s32.totalorder %s16166_s25, %s15899_s26  ;;  %s15904_s13 = sshll.u32 %s15993_s11, 4  ;;  %s15905_s13 = int_to_ptr.vmem [resolvable:$false] %s15904_s13 }
  0x66   : > { %s15906_s14 = scalar_lea.vmem %s15905_s13, 262144  ;;  %p15907_p5 = scmp.lt.s32.totalorder %s16166_s25, %s15905_s13 }
  0x67   : > { %p15902_p1 = pnand %p15900_p11, %p15886_p6  ;;  %p15908_p12 = scmp.lt.s32.totalorder %s15906_s14, %s15899_s26 }
  0x69   : > { %p15903_p4 = pneg %p15902_p1  ;;  %p15909_p0 = por %p15908_p12, %p15907_p5 }
  0x6b   : > { %p15910_p2 = pnand %p15909_p0, %p15903_p4 }
  0x6d   : > { %15913 = shalt.err (!%p15910_p2)
}
  0x6e   : > { %s15994_s15 = smov 64   ;;  %s15995_s16 = smov 4  }
  0x6f   : > { %14689 = dma.hbm_to_vmem [thread:$0]  (!%p16168_p8), %s16164_s18, 131072, %s16166_s25, %s16172_s21, %s15994_s15, %s15994_s15, %s15995_s16  }
  0x70   : > { %p17470_p6 = scmp.ne.s32.totalorder %s17466_s24, 0 }
  0x71   : > { %s244_s17 = sand.u32 (!%p17470_p6), 1, %s15978_s19   ;;  %p17471_p13 = scmp.ne.s32.totalorder (!%p17470_p6), %s17465_s23, 0 }
  0x72   : > { %242 = sbr.rel (%p17470_p6) target bundleno = 1636 (0x664), region = 40  ;;  %s12135_s6 = sshll.u32 (!%p17470_p6), %s244_s17, 13 }
  0x73   : > { %s245_s30 = scalar_lea.sflag (!%p17470_p6), [#allocation4], %s244_s17  ;;  %s16203_s7 = scalar_lea.vmem (!%p17470_p6), [#allocation3], %s12135_s6 }
  0x79   : > { %15957 = dma.done.wait (%p17471_p13), %s245_s30, 131072  }
  0x7a   : > { %15959 = vsyncadd (%p17471_p13), %s245_s30, 4294836224  ;;  %p17472_p3 = scmp.eq.s32.totalorder %s16051_s22, 0 }
  0x7c   : > { %15961 = dma.done.wait (%p17472_p3), [#allocation7], 2064   ;;  %p17473_p8 = pmov %p17472_p3 }
  0x7d   : > { %p17474_p7 = pmov %p17472_p3 }
  0x7e   : > { %15963 = vsyncadd (%p17473_p8), [#allocation7], 4294965232 }
  0x7f   : > { %15965 = dma.done.wait (%p17474_p7), [#allocation10], 16   ;;  %p17475_p10 = pmov %p17472_p3 }
  0x80   : > { %s12139_s24 = sshll.u32 %s16051_s22, 7  ;;  %p17476_p11 = scmp.ne.s32.totalorder %s16051_s22, 0 }
  0x81   : > { %15967 = vsyncadd (%p17475_p10), [#allocation10], 4294967280  ;;  %p288_p9 = scmp.lt.s32.totalorder %s12139_s24, 511  ;;  %v15996_v0 = vmov (!%p17476_p11), 0.0  }
  0x82   : > { %298 = sbr.rel (%p17476_p11) target bundleno = 137 (0x89), region = 60  ;;  %299 = vst [vmem:[#allocation2] sm:$0x3] (!%p17476_p11), %v15996_v0 }
  0x83   : > { %s17482_s24 = smov (!%p288_p9, %s12139_s24), 511 }
  0x84   : > { %s12140_s18 = sshll.u32 %s17482_s24, 1 }
  0x85   : > { %s16221_s27 = scalar_lea.vmem %s17456_s0, %s12140_s18 }
  0x89 PF: > { %v14744_v1 = vld [vmem:[%s16203_s7 + $0x40] sm:$0xff]   ;;  %v14748_v5 = vld [vmem:[%s16203_s7 + $0x48] sm:$0xff]   ;;  %v14752_v9 = vld [vmem:[%s16203_s7 + $0x50] sm:$0xff]   ;;  %v369_v29 = vlaneseq  ;;  %v15997_v37 = vmov 1983009808   ;;  %p13166_p1 = scmp.ne.s32.totalorder %s16051_s22, 3 }
  0x8a   : > { %v14745_v2 = vld [vmem:[%s16203_s7 + $0xc0] sm:$0xff]   ;;  %13174 = vmatprep.subr.bf16.mxu0 %v14744_v1  ;;  %v14749_v6 = vld [vmem:[%s16203_s7 + $0xc8] sm:$0xff]   ;;  %v14753_v10 = vld [vmem:[%s16203_s7 + $0xd0] sm:$0xff]   ;;  %v367_v38 = vunpack.c.l.s4 %v15997_v37  ;;  %vm15999_vm0 = vmmov (!%p13166_p1), 0  }
  0x8b   : > { %v14746_v3 = vld [vmem:[%s16203_s7] sm:$0xff]   ;;  %13196 = vmatprep.subr.bf16.mxu1 %v14745_v2  ;;  %v14750_v7 = vld [vmem:[%s16203_s7 + $0x8] sm:$0xff]   ;;  %v14754_v11 = vld [vmem:[%s16203_s7 + $0x10] sm:$0xff]   ;;  %v370_v34 = vshrl.u32 %v369_v29, 7 }
  0x8c   : > { %v14747_v4 = vld [vmem:[%s16203_s7 + $0x80] sm:$0xff]   ;;  %13175 = vmatpush3.bf16.msra.mxu0 %v14746_v3  ;;  %v14751_v8 = vld [vmem:[%s16203_s7 + $0x88] sm:$0xff]   ;;  %v14755_v12 = vld [vmem:[%s16203_s7 + $0x90] sm:$0xff]   ;;  %v368_v40 = vunpack.c.0.s8 %v367_v38 }
  0x8d   : > { %13197 = vmatpush3.bf16.msra.mxu1 %v14747_v4  ;;  %13176 = vmatprep.subr.bf16.mxu0 %v14748_v5  ;;  %v14756_v13 = vld [vmem:[%s16203_s7 + $0x58] sm:$0xff]   ;;  %v14760_v17 = vld [vmem:[%s16203_s7 + $0x60] sm:$0xff]   ;;  %v14764_v21 = vld [vmem:[%s16203_s7 + $0x68] sm:$0xff]  }
  0x8e   : > { %13198 = vmatprep.subr.bf16.mxu1 %v14749_v6  ;;  %v14757_v14 = vld [vmem:[%s16203_s7 + $0xd8] sm:$0xff]   ;;  %v14761_v18 = vld [vmem:[%s16203_s7 + $0xe0] sm:$0xff]   ;;  %v14765_v22 = vld [vmem:[%s16203_s7 + $0xe8] sm:$0xff]   ;;  %v16260_v42 = vsub.s32 %v368_v40, %v370_v34 }
  0x8f   : > { %v14758_v15 = vld [vmem:[%s16203_s7 + $0x18] sm:$0xff]   ;;  %v14762_v19 = vld [vmem:[%s16203_s7 + $0x20] sm:$0xff]   ;;  %v14766_v23 = vld [vmem:[%s16203_s7 + $0x28] sm:$0xff]  }
  0x90   : > { %13177 = vmatpush3.bf16.msra.mxu0 %v14750_v7  ;;  %v14759_v16 = vld [vmem:[%s16203_s7 + $0x98] sm:$0xff]   ;;  %v14763_v20 = vld [vmem:[%s16203_s7 + $0xa0] sm:$0xff]   ;;  %v14767_v24 = vld [vmem:[%s16203_s7 + $0xa8] sm:$0xff]  }
  0x91   : > { %13199 = vmatpush3.bf16.msra.mxu1 %v14751_v8  ;;  %13178 = vmatprep.subr.bf16.mxu0 %v14752_v9  ;;  %v14768_v25 = vld [vmem:[%s16203_s7 + $0x70] sm:$0xff]   ;;  %v14772_v30 = vld [vmem:[%s16203_s7 + $0x78] sm:$0xff]   ;;  %v14777_v36 = vld [vmem:[%s16203_s7 + $0x140] sm:$0xff]  }
  0x92   : > { %13200 = vmatprep.subr.bf16.mxu1 %v14753_v10  ;;  %v14769_v26 = vld [vmem:[%s16203_s7 + $0xf0] sm:$0xff]   ;;  %v14773_v31 = vld [vmem:[%s16203_s7 + $0xf8] sm:$0xff]   ;;  %v14778_v39 = vld [vmem:[%s16203_s7 + $0x1c0] sm:$0xff]  }
  0x93   : > { %v14770_v27 = vld [vmem:[%s16203_s7 + $0x30] sm:$0xff]   ;;  %v14774_v32 = vld [vmem:[%s16203_s7 + $0x38] sm:$0xff]   ;;  %v14779_v47 = vld [vmem:[%s16203_s7 + $0x100] sm:$0xff]  }
  0x94   : > { %13179 = vmatpush3.bf16.msra.mxu0 %v14754_v11  ;;  %v14771_v28 = vld [vmem:[%s16203_s7 + $0xb0] sm:$0xff]   ;;  %v14775_v33 = vld [vmem:[%s16203_s7 + $0xb8] sm:$0xff]   ;;  %v14780_v50 = vld [vmem:[%s16203_s7 + $0x180] sm:$0xff]  }
  0x95   : > { %13201 = vmatpush3.bf16.msra.mxu1 %v14755_v12  ;;  %13180 = vmatprep.subr.bf16.mxu0 %v14756_v13  ;;  %v301_v35 = vld [vmem:[%s16221_s27] sm:$0xff]  ;;  %v14781_v53 = vld [vmem:[%s16203_s7 + $0x148] sm:$0xff]   ;;  %v14785_v57 = vld [vmem:[%s16203_s7 + $0x150] sm:$0xff]  }
  0x96   : > { %13202 = vmatprep.subr.bf16.mxu1 %v14757_v14  ;;  %v365_v41 = vcombine.high %v301_v35, %v301_v35  ;;  %v372_v43 = vrot.slane %v301_v35, %v16260_v42  ;;  %v14782_v54 = vld [vmem:[%s16203_s7 + $0x1c8] sm:$0xff]   ;;  %v14786_v58 = vld [vmem:[%s16203_s7 + $0x1d0] sm:$0xff]   ;;  %v14789_v61 = vld [vmem:[%s16203_s7 + $0x158] sm:$0xff]  }
  0x97   : > { %v14783_v55 = vld [vmem:[%s16203_s7 + $0x108] sm:$0xff]   ;;  %v14787_v59 = vld [vmem:[%s16203_s7 + $0x110] sm:$0xff]   ;;  %v14790_v62 = vld [vmem:[%s16203_s7 + $0x1d8] sm:$0xff]  }
  0x98   : > { %13181 = vmatpush3.bf16.msra.mxu0 %v14758_v15  ;;  %v379_v44 = vrot.slane %v365_v41, %v16260_v42  ;;  %v380_v45 = vcombine.high %v372_v43, %v372_v43  ;;  %v1037_v48 = vpack.c.bf16 %v372_v43, %v372_v43  ;;  %v14784_v56 = vld [vmem:[%s16203_s7 + $0x188] sm:$0xff]   ;;  %v14788_v60 = vld [vmem:[%s16203_s7 + $0x190] sm:$0xff]   ;;  %v14791_v63 = vld [vmem:[%s16203_s7 + $0x118] sm:$0xff]  }
  0x99   : > { %13203 = vmatpush3.bf16.msra.mxu1 %v14759_v16  ;;  %13182 = vmatprep.subr.bf16.mxu0 %v14760_v17  ;;  %v14792_v0 = vld [vmem:[%s16203_s7 + $0x198] sm:$0xff]   ;;  %v14793_v1 = vld [vmem:[%s16203_s7 + $0x160] sm:$0xff]   ;;  %v14797_v5 = vld [vmem:[%s16203_s7 + $0x168] sm:$0xff]  }
  0x9a   : > { %13204 = vmatprep.subr.bf16.mxu1 %v14761_v18  ;;  %v381_v46 = vcombine.high %v379_v44, %v379_v44  ;;  %v1039_v49 = vpack.c.bf16 %v379_v44, %v379_v44  ;;  %v1038_v51 = vpack.c.bf16 %v380_v45, %v380_v45  ;;  %v14794_v2 = vld [vmem:[%s16203_s7 + $0x1e0] sm:$0xff]   ;;  %v14798_v6 = vld [vmem:[%s16203_s7 + $0x1e8] sm:$0xff]   ;;  %v14801_v9 = vld [vmem:[%s16203_s7 + $0x170] sm:$0xff]  }
  0x9b   : > { %v14795_v3 = vld [vmem:[%s16203_s7 + $0x120] sm:$0xff]   ;;  %v14799_v7 = vld [vmem:[%s16203_s7 + $0x128] sm:$0xff]   ;;  %v14802_v10 = vld [vmem:[%s16203_s7 + $0x1f0] sm:$0xff]  }
  0x9c   : > { %13183 = vmatpush3.bf16.msra.mxu0 %v14762_v19  ;;  %v1040_v52 = vpack.c.bf16 %v381_v46, %v381_v46  ;;  %9389 = vmatprep.mubr.bf16.mxu0 %v1038_v51  ;;  %v14796_v4 = vld [vmem:[%s16203_s7 + $0x1a0] sm:$0xff]   ;;  %v14800_v8 = vld [vmem:[%s16203_s7 + $0x1a8] sm:$0xff]   ;;  %v14803_v12 = vld [vmem:[%s16203_s7 + $0x130] sm:$0xff]  }
  0x9d   : > { %13205 = vmatpush3.bf16.msra.mxu1 %v14763_v20  ;;  %13184 = vmatprep.subr.bf16.mxu0 %v14764_v21  ;;  %v302_v11 = vld [vmem:[%s16221_s27 + $0x8] sm:$0xff]  ;;  %v14804_v15 = vld [vmem:[%s16203_s7 + $0x1b0] sm:$0xff]   ;;  %v14805_v16 = vld [vmem:[%s16203_s7 + $0x178] sm:$0xff]  }
  0x9e   : > { %13206 = vmatprep.subr.bf16.mxu1 %v14765_v22  ;;  %9429 = vmatprep.mubr.bf16.mxu1 %v1040_v52  ;;  %v389_v13 = vrot.slane %v302_v11, %v16260_v42  ;;  %v382_v14 = vcombine.high %v302_v11, %v302_v11  ;;  %v14806_v19 = vld [vmem:[%s16203_s7 + $0x1f8] sm:$0xff]   ;;  %v14817_v34 = vld [vmem:[%s16203_s7 + $0x288] sm:$0xff]   ;;  %v14818_v35 = vld [vmem:[%s16203_s7 + $0x250] sm:$0xff]  }
  0x9f   : > { %v14807_v20 = vld [vmem:[%s16203_s7 + $0x138] sm:$0xff]   ;;  %v14820_v37 = vld [vmem:[%s16203_s7 + $0x210] sm:$0xff]   ;;  %v14826_v44 = vld [vmem:[%s16203_s7 + $0x260] sm:$0xff]  }
  0xa0   : > { %13185 = vmatpush3.bf16.msra.mxu0 %v14766_v23  ;;  %v397_v17 = vcombine.high %v389_v13, %v389_v13  ;;  %v396_v18 = vrot.slane %v382_v14, %v16260_v42  ;;  %v14808_v23 = vld [vmem:[%s16203_s7 + $0x1b8] sm:$0xff]   ;;  %v14821_v38 = vld [vmem:[%s16203_s7 + $0x290] sm:$0xff]   ;;  %v14827_v45 = vld [vmem:[%s16203_s7 + $0x2e0] sm:$0xff]  }
  0xa1   : > { %13207 = vmatpush3.bf16.msra.mxu1 %v14767_v24  ;;  %13186 = vmatprep.subr.bf16.mxu0 %v14768_v25  ;;  %v14810_v25 = vld [vmem:[%s16203_s7 + $0x240] sm:$0xff]   ;;  %v14823_v40 = vld [vmem:[%s16203_s7 + $0x2d8] sm:$0xff]   ;;  %v14833_v51 = vld [vmem:[%s16203_s7 + $0x2a8] sm:$0xff]  }
  0xa2   : > { %13208 = vmatprep.subr.bf16.mxu1 %v14769_v26  ;;  %v1042_v21 = vpack.c.bf16 %v397_v17, %v397_v17  ;;  %v398_v22 = vcombine.high %v396_v18, %v396_v18  ;;  %v14811_v26 = vld [vmem:[%s16203_s7 + $0x2c0] sm:$0xff]   ;;  %v1043_v29 = vpack.c.bf16 %v396_v18, %v396_v18  ;;  %v14824_v41 = vld [vmem:[%s16203_s7 + $0x218] sm:$0xff]   ;;  %v14834_v52 = vld [vmem:[%s16203_s7 + $0x270] sm:$0xff]  }
  0xa3   : > { %v14825_v43 = vld [vmem:[%s16203_s7 + $0x298] sm:$0xff]   ;;  %v14828_v46 = vld [vmem:[%s16203_s7 + $0x220] sm:$0xff]   ;;  %v14848_v11 = vld [vmem:[%s16203_s7 + $0x3c8] sm:$0xff]  }
  0xa4   : > { %13187 = vmatpush3.bf16.msra.mxu0 %v14770_v27  ;;  %v1044_v24 = vpack.c.bf16 %v398_v22, %v398_v22  ;;  %v14812_v27 = vld [vmem:[%s16203_s7 + $0x200] sm:$0xff]   ;;  %v14851_v14 = vld [vmem:[%s16203_s7 + $0x350] sm:$0xff]   ;;  %v14855_v18 = vld [vmem:[%s16203_s7 + $0x358] sm:$0xff]  }
  0xa5   : > { %13209 = vmatpush3.bf16.msra.mxu1 %v14771_v28  ;;  %13188 = vmatprep.subr.bf16.mxu0 %v14772_v30  ;;  %v1041_v28 = vpack.c.bf16 %v389_v13, %v389_v13  ;;  %v14813_v30 = vld [vmem:[%s16203_s7 + $0x280] sm:$0xff]   ;;  %v14850_v13 = vld [vmem:[%s16203_s7 + $0x388] sm:$0xff]   ;;  %v14854_v17 = vld [vmem:[%s16203_s7 + $0x390] sm:$0xff]  }
  0xa6   : > { %13210 = vmatprep.subr.bf16.mxu1 %v14773_v31  ;;  %v14814_v31 = vld [vmem:[%s16203_s7 + $0x248] sm:$0xff]   ;;  %v14859_v22 = vld [vmem:[%s16203_s7 + $0x360] sm:$0xff]  }
  0xa8   : > { %13189 = vmatpush3.bf16.msra.mxu0 %v14774_v32  ;;  %v14815_v32 = vld [vmem:[%s16203_s7 + $0x2c8] sm:$0xff]  }
  0xa9   : > { %13211 = vmatpush3.bf16.msra.mxu1 %v14775_v33  ;;  %13218 = vmatprep.subr.bf16.mxu0 %v14777_v36  ;;  %v14816_v33 = vld [vmem:[%s16203_s7 + $0x208] sm:$0xff]   ;;  %v14819_v36 = vld [vmem:[%s16203_s7 + $0x2d0] sm:$0xff]  }
  0xaa   : > { %13240 = vmatprep.subr.bf16.mxu1 %v14778_v39  ;;  %v14822_v39 = vld [vmem:[%s16203_s7 + $0x258] sm:$0xff]  }
  0xab   : > { %9390 = vmatmul.mubr.bf16.vlgmr.msra.gmra.mrb[0].mxu0 %v1037_v48  ;;  %v14830_v48 = vld [vmem:[%s16203_s7 + $0x268] sm:$0xff]  }
  0xac   : > { %9430 = vmatmul.mubr.bf16.vlgmr.msra.gmra.mrb[0].mxu1 %v1039_v49  ;;  %13219 = vmatpush3.bf16.msra.mxu0 %v14779_v47  ;;  %v14829_v47 = vld [vmem:[%s16203_s7 + $0x2a0] sm:$0xff]   ;;  %v14831_v49 = vld [vmem:[%s16203_s7 + $0x2e8] sm:$0xff]  }
  0xad   : > { %13241 = vmatpush3.bf16.msra.mxu1 %v14780_v50  ;;  %13220 = vmatprep.subr.bf16.mxu0 %v14781_v53  ;;  %v14832_v50 = vld [vmem:[%s16203_s7 + $0x228] sm:$0xff]   ;;  %v14835_v53 = vld [vmem:[%s16203_s7 + $0x2f0] sm:$0xff]  }
  0xae   : > { %13242 = vmatprep.subr.bf16.mxu1 %v14782_v54  ;;  %9469 = vmatprep.mubr.bf16.mxu0 %v1042_v21  ;;  %v303_v54 = vld [vmem:[%s16221_s27 + $0x10] sm:$0xff]  ;;  %v14858_v21 = vld [vmem:[%s16203_s7 + $0x398] sm:$0xff]  }
  0xaf   : > { %9509 = vmatprep.mubr.bf16.mxu1 %v1044_v24  ;;  %v14861_v24 = vld [vmem:[%s16203_s7 + $0x320] sm:$0xff]  }
  0xb0   : > { %13221 = vmatpush3.bf16.msra.mxu0 %v14783_v55  ;;  %v14836_v55 = vld [vmem:[%s16203_s7 + $0x230] sm:$0xff]  }
  0xb1   : > { %13243 = vmatpush3.bf16.msra.mxu1 %v14784_v56  ;;  %13222 = vmatprep.subr.bf16.mxu0 %v14785_v57  ;;  %v406_v56 = vrot.slane %v303_v54, %v16260_v42  ;;  %v399_v57 = vcombine.high %v303_v54, %v303_v54  ;;  %v14881_v54 = vld [vmem:[%s16203_s7 + $0x4c8] sm:$0xff]  }
  0xb2   : > { %13244 = vmatprep.subr.bf16.mxu1 %v14786_v58  ;;  %v14837_v58 = vld [vmem:[%s16203_s7 + $0x2b0] sm:$0xff]  }
  0xb4   : > { %13223 = vmatpush3.bf16.msra.mxu0 %v14787_v59  ;;  %v14838_v59 = vld [vmem:[%s16203_s7 + $0x278] sm:$0xff]  }
  0xb5   : > { %13245 = vmatpush3.bf16.msra.mxu1 %v14788_v60  ;;  %13224 = vmatprep.subr.bf16.mxu0 %v14789_v61  ;;  %v414_v60 = vcombine.high %v406_v56, %v406_v56  ;;  %v413_v61 = vrot.slane %v399_v57, %v16260_v42  ;;  %v14884_v57 = vld [vmem:[%s16203_s7 + $0x450] sm:$0xff]  }
  0xb6   : > { %13246 = vmatprep.subr.bf16.mxu1 %v14790_v62  ;;  %v14839_v62 = vld [vmem:[%s16203_s7 + $0x2f8] sm:$0xff]  }
  0xb8   : > { %13225 = vmatpush3.bf16.msra.mxu0 %v14791_v63  ;;  %v14840_v63 = vld [vmem:[%s16203_s7 + $0x238] sm:$0xff]  }
  0xb9   : > { %13247 = vmatpush3.bf16.msra.mxu1 %v14792_v0  ;;  %13226 = vmatprep.subr.bf16.mxu0 %v14793_v1  ;;  %v1046_v0 = vpack.c.bf16 %v414_v60, %v414_v60  ;;  %v415_v1 = vcombine.high %v413_v61, %v413_v61  ;;  %v14887_v60 = vld [vmem:[%s16203_s7 + $0x490] sm:$0xff]  }
  0xba   : > { %13248 = vmatprep.subr.bf16.mxu1 %v14794_v2  ;;  %v14841_v2 = vld [vmem:[%s16203_s7 + $0x2b8] sm:$0xff]  }
  0xbc   : > { %13227 = vmatpush3.bf16.msra.mxu0 %v14795_v3  ;;  %v1048_v3 = vpack.c.bf16 %v415_v1, %v415_v1  ;;  %v14892_v1 = vld [vmem:[%s16203_s7 + $0x460] sm:$0xff]  }
  0xbd   : > { %13249 = vmatpush3.bf16.msra.mxu1 %v14796_v4  ;;  %13228 = vmatprep.subr.bf16.mxu0 %v14797_v5  ;;  %v14843_v4 = vld [vmem:[%s16203_s7 + $0x340] sm:$0xff]  }
  0xbe   : > { %13250 = vmatprep.subr.bf16.mxu1 %v14798_v6  ;;  %v14844_v5 = vld [vmem:[%s16203_s7 + $0x3c0] sm:$0xff]  }
  0xbf   : > { %v14845_v6 = vld [vmem:[%s16203_s7 + $0x300] sm:$0xff]  }
  0xc0   : > { %13229 = vmatpush3.bf16.msra.mxu0 %v14799_v7  ;;  %v1045_v7 = vpack.c.bf16 %v406_v56, %v406_v56  ;;  %v14883_v56 = vld [vmem:[%s16203_s7 + $0x488] sm:$0xff]  }
  0xc1   : > { %13251 = vmatpush3.bf16.msra.mxu1 %v14800_v8  ;;  %13230 = vmatprep.subr.bf16.mxu0 %v14801_v9  ;;  %v1047_v8 = vpack.c.bf16 %v413_v61, %v413_v61  ;;  %v14846_v9 = vld [vmem:[%s16203_s7 + $0x380] sm:$0xff]   ;;  %v14888_v61 = vld [vmem:[%s16203_s7 + $0x458] sm:$0xff]  }
  0xc2   : > { %13252 = vmatprep.subr.bf16.mxu1 %v14802_v10  ;;  %v14847_v10 = vld [vmem:[%s16203_s7 + $0x348] sm:$0xff]  }
  0xc4   : > { %13231 = vmatpush3.bf16.msra.mxu0 %v14803_v12  ;;  %v14849_v12 = vld [vmem:[%s16203_s7 + $0x308] sm:$0xff]  }
  0xc5   : > { %13253 = vmatpush3.bf16.msra.mxu1 %v14804_v15  ;;  %13232 = vmatprep.subr.bf16.mxu0 %v14805_v16  ;;  %v14852_v15 = vld [vmem:[%s16203_s7 + $0x3d0] sm:$0xff]  }
  0xc6   : > { %13254 = vmatprep.subr.bf16.mxu1 %v14806_v19  ;;  %v14853_v16 = vld [vmem:[%s16203_s7 + $0x310] sm:$0xff]   ;;  %v14856_v19 = vld [vmem:[%s16203_s7 + $0x3d8] sm:$0xff]  }
  0xc8   : > { %13233 = vmatpush3.bf16.msra.mxu0 %v14807_v20  ;;  %v14857_v20 = vld [vmem:[%s16203_s7 + $0x318] sm:$0xff]  }
  0xc9   : > { %13255 = vmatpush3.bf16.msra.mxu1 %v14808_v23  ;;  %13262 = vmatprep.subr.bf16.mxu0 %v14810_v25  ;;  %v14860_v23 = vld [vmem:[%s16203_s7 + $0x3e0] sm:$0xff]  }
  0xca   : > { %13284 = vmatprep.subr.bf16.mxu1 %v14811_v26  ;;  %v14862_v25 = vld [vmem:[%s16203_s7 + $0x3a0] sm:$0xff]   ;;  %v14863_v26 = vld [vmem:[%s16203_s7 + $0x368] sm:$0xff]  }
  0xcb   : > { %9470 = vmatmul.mubr.bf16.vlgmr.msra.gmra.mrb[4].mxu0 %v1041_v28  ;;  %v14865_v28 = vld [vmem:[%s16203_s7 + $0x328] sm:$0xff]  }
  0xcc   : > { %9510 = vmatmul.mubr.bf16.vlgmr.msra.gmra.mrb[4].mxu1 %v1043_v29  ;;  %13263 = vmatpush3.bf16.msra.mxu0 %v14812_v27  ;;  %v14864_v27 = vld [vmem:[%s16203_s7 + $0x3e8] sm:$0xff]  }
  0xcd   : > { %13285 = vmatpush3.bf16.msra.mxu1 %v14813_v30  ;;  %13264 = vmatprep.subr.bf16.mxu0 %v14814_v31  ;;  %v14866_v29 = vld [vmem:[%s16203_s7 + $0x3a8] sm:$0xff]   ;;  %v14867_v30 = vld [vmem:[%s16203_s7 + $0x370] sm:$0xff]  }
  0xce   : > { %13286 = vmatprep.subr.bf16.mxu1 %v14815_v32  ;;  %9549 = vmatprep.mubr.bf16.mxu0 %v1046_v0  ;;  %v14868_v31 = vld [vmem:[%s16203_s7 + $0x3f0] sm:$0xff]   ;;  %v14891_v0 = vld [vmem:[%s16203_s7 + $0x498] sm:$0xff]  }
  0xcf   : > { %9589 = vmatprep.mubr.bf16.mxu1 %v1048_v3  ;;  %v14869_v32 = vld [vmem:[%s16203_s7 + $0x330] sm:$0xff]   ;;  %v14894_v3 = vld [vmem:[%s16203_s7 + $0x420] sm:$0xff]  }
  0xd0   : > { %13265 = vmatpush3.bf16.msra.mxu0 %v14816_v33  ;;  %v304_v33 = vld [vmem:[%s16221_s27 + $0x18] sm:$0xff] }
  0xd1   : > { %13287 = vmatpush3.bf16.msra.mxu1 %v14817_v34  ;;  %13266 = vmatprep.subr.bf16.mxu0 %v14818_v35  ;;  %v14870_v34 = vld [vmem:[%s16203_s7 + $0x3b0] sm:$0xff]   ;;  %v423_v35 = vrot.slane %v304_v33, %v16260_v42 }
  0xd2   : > { %13288 = vmatprep.subr.bf16.mxu1 %v14819_v36  ;;  %v416_v36 = vcombine.high %v304_v33, %v304_v33  ;;  %v14915_v33 = vld [vmem:[%s16203_s7 + $0x508] sm:$0xff]  }
  0xd4   : > { %13267 = vmatpush3.bf16.msra.mxu0 %v14820_v37  ;;  %v14871_v37 = vld [vmem:[%s16203_s7 + $0x378] sm:$0xff]  }
  0xd5   : > { %13289 = vmatpush3.bf16.msra.mxu1 %v14821_v38  ;;  %13268 = vmatprep.subr.bf16.mxu0 %v14822_v39  ;;  %v14872_v38 = vld [vmem:[%s16203_s7 + $0x3f8] sm:$0xff]   ;;  %v431_v39 = vcombine.high %v423_v35, %v423_v35 }
  0xd6   : > { %13290 = vmatprep.subr.bf16.mxu1 %v14823_v40  ;;  %v430_v40 = vrot.slane %v416_v36, %v16260_v42  ;;  %v14918_v36 = vld [vmem:[%s16203_s7 + $0x5d0] sm:$0xff]  }
  0xd8   : > { %13269 = vmatpush3.bf16.msra.mxu0 %v14824_v41  ;;  %v14873_v41 = vld [vmem:[%s16203_s7 + $0x338] sm:$0xff]  }
  0xd9   : > { %13291 = vmatpush3.bf16.msra.mxu1 %v14825_v43  ;;  %13270 = vmatprep.subr.bf16.mxu0 %v14826_v44  ;;  %v14874_v43 = vld [vmem:[%s16203_s7 + $0x3b8] sm:$0xff]   ;;  %v1050_v44 = vpack.c.bf16 %v431_v39, %v431_v39 }
  0xda   : > { %13292 = vmatprep.subr.bf16.mxu1 %v14827_v45  ;;  %v432_v45 = vcombine.high %v430_v40, %v430_v40  ;;  %v14921_v39 = vld [vmem:[%s16203_s7 + $0x558] sm:$0xff]  }
  0xdc   : > { %13271 = vmatpush3.bf16.msra.mxu0 %v14828_v46  ;;  %v14876_v46 = vld [vmem:[%s16203_s7 + $0x440] sm:$0xff]  }
  0xdd   : > { %13293 = vmatpush3.bf16.msra.mxu1 %v14829_v47  ;;  %13272 = vmatprep.subr.bf16.mxu0 %v14830_v48  ;;  %v1052_v47 = vpack.c.bf16 %v432_v45, %v432_v45  ;;  %v14877_v48 = vld [vmem:[%s16203_s7 + $0x4c0] sm:$0xff]  }
  0xde   : > { %13294 = vmatprep.subr.bf16.mxu1 %v14831_v49  ;;  %v14878_v49 = vld [vmem:[%s16203_s7 + $0x400] sm:$0xff]  }
  0xdf   : > { %v14926_v45 = vld [vmem:[%s16203_s7 + $0x5e0] sm:$0xff]  }
  0xe0   : > { %13273 = vmatpush3.bf16.msra.mxu0 %v14832_v50  ;;  %v1049_v50 = vpack.c.bf16 %v423_v35, %v423_v35  ;;  %v14917_v35 = vld [vmem:[%s16203_s7 + $0x550] sm:$0xff]  }
  0xe1   : > { %13295 = vmatpush3.bf16.msra.mxu1 %v14833_v51  ;;  %13274 = vmatprep.subr.bf16.mxu0 %v14834_v52  ;;  %v1051_v51 = vpack.c.bf16 %v430_v40, %v430_v40  ;;  %v14879_v52 = vld [vmem:[%s16203_s7 + $0x480] sm:$0xff]   ;;  %v14922_v40 = vld [vmem:[%s16203_s7 + $0x5d8] sm:$0xff]  }
  0xe2   : > { %13296 = vmatprep.subr.bf16.mxu1 %v14835_v53  ;;  %v14880_v53 = vld [vmem:[%s16203_s7 + $0x448] sm:$0xff]  }
  0xe4   : > { %13275 = vmatpush3.bf16.msra.mxu0 %v14836_v55  ;;  %v14882_v55 = vld [vmem:[%s16203_s7 + $0x408] sm:$0xff]  }
  0xe5   : > { %13297 = vmatpush3.bf16.msra.mxu1 %v14837_v58  ;;  %13276 = vmatprep.subr.bf16.mxu0 %v14838_v59  ;;  %v14885_v58 = vld [vmem:[%s16203_s7 + $0x4d0] sm:$0xff]  }
  0xe6   : > { %13298 = vmatprep.subr.bf16.mxu1 %v14839_v62  ;;  %v14886_v59 = vld [vmem:[%s16203_s7 + $0x410] sm:$0xff]   ;;  %v14889_v62 = vld [vmem:[%s16203_s7 + $0x4d8] sm:$0xff]  }
  0xe8   : > { %13277 = vmatpush3.bf16.msra.mxu0 %v14840_v63  ;;  %v14890_v63 = vld [vmem:[%s16203_s7 + $0x418] sm:$0xff]  }
  0xe9   : > { %13299 = vmatpush3.bf16.msra.mxu1 %v14841_v2  ;;  %13306 = vmatprep.subr.bf16.mxu0 %v14843_v4  ;;  %v14893_v2 = vld [vmem:[%s16203_s7 + $0x4e0] sm:$0xff]  }
  0xea   : > { %13328 = vmatprep.subr.bf16.mxu1 %v14844_v5  ;;  %v14895_v4 = vld [vmem:[%s16203_s7 + $0x4a0] sm:$0xff]   ;;  %v14896_v5 = vld [vmem:[%s16203_s7 + $0x468] sm:$0xff]  }
  0xeb   : > { %9550 = vmatmul.mubr.bf16.vlgmr.msra.gmra.mrb[8].mxu0 %v1045_v7  ;;  %v14898_v7 = vld [vmem:[%s16203_s7 + $0x428] sm:$0xff]  }
  0xec   : > { %9590 = vmatmul.mubr.bf16.vlgmr.msra.gmra.mrb[8].mxu1 %v1047_v8  ;;  %13307 = vmatpush3.bf16.msra.mxu0 %v14845_v6  ;;  %v14897_v6 = vld [vmem:[%s16203_s7 + $0x4e8] sm:$0xff]  }
  0xed   : > { %13329 = vmatpush3.bf16.msra.mxu1 %v14846_v9  ;;  %13308 = vmatprep.subr.bf16.mxu0 %v14847_v10  ;;  %v14899_v8 = vld [vmem:[%s16203_s7 + $0x4a8] sm:$0xff]   ;;  %v14900_v9 = vld [vmem:[%s16203_s7 + $0x470] sm:$0xff]  }
  0xee   : > { %13330 = vmatprep.subr.bf16.mxu1 %v14848_v11  ;;  %9629 = vmatprep.mubr.bf16.mxu0 %v1050_v44  ;;  %v14901_v10 = vld [vmem:[%s16203_s7 + $0x4f0] sm:$0xff]   ;;  %v14925_v44 = vld [vmem:[%s16203_s7 + $0x560] sm:$0xff]  }
  0xef   : > { %9669 = vmatprep.mubr.bf16.mxu1 %v1052_v47  ;;  %v14902_v11 = vld [vmem:[%s16203_s7 + $0x430] sm:$0xff]   ;;  %v14928_v47 = vld [vmem:[%s16203_s7 + $0x5a0] sm:$0xff]  }
  0xf0   : > { %13309 = vmatpush3.bf16.msra.mxu0 %v14849_v12  ;;  %v305_v12 = vld [vmem:[%s16221_s27 + $0x20] sm:$0xff] }
  0xf1   : > { %13331 = vmatpush3.bf16.msra.mxu1 %v14850_v13  ;;  %13310 = vmatprep.subr.bf16.mxu0 %v14851_v14  ;;  %v14903_v13 = vld [vmem:[%s16203_s7 + $0x4b0] sm:$0xff]   ;;  %v440_v14 = vrot.slane %v305_v12, %v16260_v42 }
  0xf2   : > { %13332 = vmatprep.subr.bf16.mxu1 %v14852_v15  ;;  %v433_v15 = vcombine.high %v305_v12, %v305_v12  ;;  %v14948_v12 = vld [vmem:[%s16203_s7 + $0x608] sm:$0xff]  }
  0xf4   : > { %13311 = vmatpush3.bf16.msra.mxu0 %v14853_v16  ;;  %v14904_v16 = vld [vmem:[%s16203_s7 + $0x478] sm:$0xff]  }
  0xf5   : > { %13333 = vmatpush3.bf16.msra.mxu1 %v14854_v17  ;;  %13312 = vmatprep.subr.bf16.mxu0 %v14855_v18  ;;  %v14905_v17 = vld [vmem:[%s16203_s7 + $0x4f8] sm:$0xff]   ;;  %v448_v18 = vcombine.high %v440_v14, %v440_v14 }
  0xf6   : > { %13334 = vmatprep.subr.bf16.mxu1 %v14856_v19  ;;  %v447_v19 = vrot.slane %v433_v15, %v16260_v42  ;;  %v14951_v15 = vld [vmem:[%s16203_s7 + $0x6d0] sm:$0xff]  }
  0xf8   : > { %13313 = vmatpush3.bf16.msra.mxu0 %v14857_v20  ;;  %v14906_v20 = vld [vmem:[%s16203_s7 + $0x438] sm:$0xff]  }
  0xf9   : > { %13335 = vmatpush3.bf16.msra.mxu1 %v14858_v21  ;;  %13314 = vmatprep.subr.bf16.mxu0 %v14859_v22  ;;  %v14907_v21 = vld [vmem:[%s16203_s7 + $0x4b8] sm:$0xff]   ;;  %v1054_v22 = vpack.c.bf16 %v448_v18, %v448_v18 }
  0xfa   : > { %13336 = vmatprep.subr.bf16.mxu1 %v14860_v23  ;;  %v449_v23 = vcombine.high %v447_v19, %v447_v19  ;;  %v14954_v18 = vld [vmem:[%s16203_s7 + $0x658] sm:$0xff]  }
  0xfc   : > { %13315 = vmatpush3.bf16.msra.mxu0 %v14861_v24  ;;  %v14909_v24 = vld [vmem:[%s16203_s7 + $0x540] sm:$0xff]  }
  0xfd   : > { %13337 = vmatpush3.bf16.msra.mxu1 %v14862_v25  ;;  %13316 = vmatprep.subr.bf16.mxu0 %v14863_v26  ;;  %v1056_v25 = vpack.c.bf16 %v449_v23, %v449_v23  ;;  %v14910_v26 = vld [vmem:[%s16203_s7 + $0x5c0] sm:$0xff]  }
  0xfe   : > { %13338 = vmatprep.subr.bf16.mxu1 %v14864_v27  ;;  %v14911_v27 = vld [vmem:[%s16203_s7 + $0x500] sm:$0xff]  }
  0xff   : > { %v14959_v23 = vld [vmem:[%s16203_s7 + $0x6e0] sm:$0xff]  }
 0x100   : > { %13317 = vmatpush3.bf16.msra.mxu0 %v14865_v28  ;;  %v1053_v28 = vpack.c.bf16 %v440_v14, %v440_v14  ;;  %v14950_v14 = vld [vmem:[%s16203_s7 + $0x650] sm:$0xff]  }
 0x101   : > { %13339 = vmatpush3.bf16.msra.mxu1 %v14866_v29  ;;  %13318 = vmatprep.subr.bf16.mxu0 %v14867_v30  ;;  %v1055_v29 = vpack.c.bf16 %v447_v19, %v447_v19  ;;  %v14912_v30 = vld [vmem:[%s16203_s7 + $0x580] sm:$0xff]   ;;  %v14955_v19 = vld [vmem:[%s16203_s7 + $0x6d8] sm:$0xff]  }
 0x102   : > { %13340 = vmatprep.subr.bf16.mxu1 %v14868_v31  ;;  %v14913_v31 = vld [vmem:[%s16203_s7 + $0x548] sm:$0xff]  }
 0x104   : > { %13319 = vmatpush3.bf16.msra.mxu0 %v14869_v32  ;;  %v14914_v32 = vld [vmem:[%s16203_s7 + $0x5c8] sm:$0xff]  }
 0x105   : > { %13341 = vmatpush3.bf16.msra.mxu1 %v14870_v34  ;;  %13320 = vmatprep.subr.bf16.mxu0 %v14871_v37  ;;  %v14916_v34 = vld [vmem:[%s16203_s7 + $0x588] sm:$0xff]   ;;  %v14919_v37 = vld [vmem:[%s16203_s7 + $0x510] sm:$0xff]  }
 0x106   : > { %13342 = vmatprep.subr.bf16.mxu1 %v14872_v38  ;;  %v14920_v38 = vld [vmem:[%s16203_s7 + $0x590] sm:$0xff]  }
 0x108   : > { %13321 = vmatpush3.bf16.msra.mxu0 %v14873_v41  ;;  %v14923_v41 = vld [vmem:[%s16203_s7 + $0x518] sm:$0xff]  }
 0x109   : > { %13343 = vmatpush3.bf16.msra.mxu1 %v14874_v43  ;;  %13350 = vmatprep.subr.bf16.mxu0 %v14876_v46  ;;  %v14924_v43 = vld [vmem:[%s16203_s7 + $0x598] sm:$0xff]   ;;  %v14927_v46 = vld [vmem:[%s16203_s7 + $0x520] sm:$0xff]  }
 0x10a   : > { %13372 = vmatprep.subr.bf16.mxu1 %v14877_v48  ;;  %v14929_v48 = vld [vmem:[%s16203_s7 + $0x568] sm:$0xff]  }
 0x10b   : > { %9630 = vmatmul.mubr.bf16.vlgmr.msra.gmra.mrb[12].mxu0 %v1049_v50  ;;  %v14931_v50 = vld [vmem:[%s16203_s7 + $0x528] sm:$0xff]  }
 0x10c   : > { %9670 = vmatmul.mubr.bf16.vlgmr.msra.gmra.mrb[12].mxu1 %v1051_v51  ;;  %13351 = vmatpush3.bf16.msra.mxu0 %v14878_v49  ;;  %v14930_v49 = vld [vmem:[%s16203_s7 + $0x5e8] sm:$0xff]  }
 0x10d   : > { %13373 = vmatpush3.bf16.msra.mxu1 %v14879_v52  ;;  %13352 = vmatprep.subr.bf16.mxu0 %v14880_v53  ;;  %v14932_v51 = vld [vmem:[%s16203_s7 + $0x5a8] sm:$0xff]   ;;  %v14933_v52 = vld [vmem:[%s16203_s7 + $0x570] sm:$0xff]  }
 0x10e   : > { %13374 = vmatprep.subr.bf16.mxu1 %v14881_v54  ;;  %9709 = vmatprep.mubr.bf16.mxu0 %v1054_v22  ;;  %v14934_v53 = vld [vmem:[%s16203_s7 + $0x5f0] sm:$0xff]   ;;  %v14958_v22 = vld [vmem:[%s16203_s7 + $0x660] sm:$0xff]  }
 0x10f   : > { %9749 = vmatprep.mubr.bf16.mxu1 %v1056_v25  ;;  %v14935_v54 = vld [vmem:[%s16203_s7 + $0x530] sm:$0xff]   ;;  %v14961_v25 = vld [vmem:[%s16203_s7 + $0x6a0] sm:$0xff]  }
 0x110   : > { %13353 = vmatpush3.bf16.msra.mxu0 %v14882_v55  ;;  %v306_v55 = vld [vmem:[%s16221_s27 + $0x28] sm:$0xff] }
 0x111   : > { %13375 = vmatpush3.bf16.msra.mxu1 %v14883_v56  ;;  %13354 = vmatprep.subr.bf16.mxu0 %v14884_v57  ;;  %v14936_v56 = vld [vmem:[%s16203_s7 + $0x5b0] sm:$0xff]   ;;  %v457_v57 = vrot.slane %v306_v55, %v16260_v42 }
 0x112   : > { %13376 = vmatprep.subr.bf16.mxu1 %v14885_v58  ;;  %v450_v58 = vcombine.high %v306_v55, %v306_v55  ;;  %v14981_v55 = vld [vmem:[%s16203_s7 + $0x708] sm:$0xff]  }
 0x114   : > { %13355 = vmatpush3.bf16.msra.mxu0 %v14886_v59  ;;  %v14937_v59 = vld [vmem:[%s16203_s7 + $0x578] sm:$0xff]  }
 0x115   : > { %13377 = vmatpush3.bf16.msra.mxu1 %v14887_v60  ;;  %13356 = vmatprep.subr.bf16.mxu0 %v14888_v61  ;;  %v14938_v60 = vld [vmem:[%s16203_s7 + $0x5f8] sm:$0xff]   ;;  %v465_v61 = vcombine.high %v457_v57, %v457_v57 }
 0x116   : > { %13378 = vmatprep.subr.bf16.mxu1 %v14889_v62  ;;  %v464_v62 = vrot.slane %v450_v58, %v16260_v42  ;;  %v14984_v58 = vld [vmem:[%s16203_s7 + $0x7d0] sm:$0xff]  }
 0x118   : > { %13357 = vmatpush3.bf16.msra.mxu0 %v14890_v63  ;;  %v14939_v63 = vld [vmem:[%s16203_s7 + $0x538] sm:$0xff]  }
 0x119   : > { %13379 = vmatpush3.bf16.msra.mxu1 %v14891_v0  ;;  %13358 = vmatprep.subr.bf16.mxu0 %v14892_v1  ;;  %v14940_v0 = vld [vmem:[%s16203_s7 + $0x5b8] sm:$0xff]   ;;  %v1058_v1 = vpack.c.bf16 %v465_v61, %v465_v61 }
 0x11a   : > { %13380 = vmatprep.subr.bf16.mxu1 %v14893_v2  ;;  %v466_v2 = vcombine.high %v464_v62, %v464_v62  ;;  %v14987_v61 = vld [vmem:[%s16203_s7 + $0x758] sm:$0xff]  }
 0x11c   : > { %13359 = vmatpush3.bf16.msra.mxu0 %v14894_v3  ;;  %v14942_v3 = vld [vmem:[%s16203_s7 + $0x640] sm:$0xff]  }
 0x11d   : > { %13381 = vmatpush3.bf16.msra.mxu1 %v14895_v4  ;;  %13360 = vmatprep.subr.bf16.mxu0 %v14896_v5  ;;  %v1060_v4 = vpack.c.bf16 %v466_v2, %v466_v2  ;;  %v14943_v5 = vld [vmem:[%s16203_s7 + $0x6c0] sm:$0xff]  }
 0x11e   : > { %13382 = vmatprep.subr.bf16.mxu1 %v14897_v6  ;;  %v14944_v6 = vld [vmem:[%s16203_s7 + $0x600] sm:$0xff]  }
 0x11f   : > { %v14992_v2 = vld [vmem:[%s16203_s7 + $0x7e0] sm:$0xff]  }
 0x120   : > { %13361 = vmatpush3.bf16.msra.mxu0 %v14898_v7  ;;  %v1057_v7 = vpack.c.bf16 %v457_v57, %v457_v57  ;;  %v14983_v57 = vld [vmem:[%s16203_s7 + $0x750] sm:$0xff]  }
 0x121   : > { %13383 = vmatpush3.bf16.msra.mxu1 %v14899_v8  ;;  %13362 = vmatprep.subr.bf16.mxu0 %v14900_v9  ;;  %v1059_v8 = vpack.c.bf16 %v464_v62, %v464_v62  ;;  %v14945_v9 = vld [vmem:[%s16203_s7 + $0x680] sm:$0xff]   ;;  %v14988_v62 = vld [vmem:[%s16203_s7 + $0x7d8] sm:$0xff]  }
 0x122   : > { %13384 = vmatprep.subr.bf16.mxu1 %v14901_v10  ;;  %v14946_v10 = vld [vmem:[%s16203_s7 + $0x648] sm:$0xff]  }
 0x124   : > { %13363 = vmatpush3.bf16.msra.mxu0 %v14902_v11  ;;  %v14947_v11 = vld [vmem:[%s16203_s7 + $0x6c8] sm:$0xff]  }
 0x125   : > { %13385 = vmatpush3.bf16.msra.mxu1 %v14903_v13  ;;  %13364 = vmatprep.subr.bf16.mxu0 %v14904_v16  ;;  %v14949_v13 = vld [vmem:[%s16203_s7 + $0x688] sm:$0xff]   ;;  %v14952_v16 = vld [vmem:[%s16203_s7 + $0x610] sm:$0xff]  }
 0x126   : > { %13386 = vmatprep.subr.bf16.mxu1 %v14905_v17  ;;  %v14953_v17 = vld [vmem:[%s16203_s7 + $0x690] sm:$0xff]  }
 0x128   : > { %13365 = vmatpush3.bf16.msra.mxu0 %v14906_v20  ;;  %v14956_v20 = vld [vmem:[%s16203_s7 + $0x618] sm:$0xff]  }
 0x129   : > { %13387 = vmatpush3.bf16.msra.mxu1 %v14907_v21  ;;  %13394 = vmatprep.subr.bf16.mxu0 %v14909_v24  ;;  %v14957_v21 = vld [vmem:[%s16203_s7 + $0x698] sm:$0xff]   ;;  %v14960_v24 = vld [vmem:[%s16203_s7 + $0x620] sm:$0xff]  }
 0x12a   : > { %13416 = vmatprep.subr.bf16.mxu1 %v14910_v26  ;;  %v14962_v26 = vld [vmem:[%s16203_s7 + $0x668] sm:$0xff]  }
 0x12b   : > { %9710 = vmatmul.mubr.bf16.vlgmr.msra.gmra.mrb[16].mxu0 %v1053_v28  ;;  %v14964_v28 = vld [vmem:[%s16203_s7 + $0x628] sm:$0xff]  }
 0x12c   : > { %9750 = vmatmul.mubr.bf16.vlgmr.msra.gmra.mrb[16].mxu1 %v1055_v29  ;;  %13395 = vmatpush3.bf16.msra.mxu0 %v14911_v27  ;;  %v14963_v27 = vld [vmem:[%s16203_s7 + $0x6e8] sm:$0xff]  }
 0x12d   : > { %13417 = vmatpush3.bf16.msra.mxu1 %v14912_v30  ;;  %13396 = vmatprep.subr.bf16.mxu0 %v14913_v31  ;;  %v14965_v29 = vld [vmem:[%s16203_s7 + $0x6a8] sm:$0xff]   ;;  %v14966_v30 = vld [vmem:[%s16203_s7 + $0x670] sm:$0xff]  }
 0x12e   : > { %13418 = vmatprep.subr.bf16.mxu1 %v14914_v32  ;;  %9789 = vmatprep.mubr.bf16.mxu0 %v1058_v1  ;;  %v14967_v31 = vld [vmem:[%s16203_s7 + $0x6f0] sm:$0xff]   ;;  %v14991_v1 = vld [vmem:[%s16203_s7 + $0x760] sm:$0xff]  }
 0x12f   : > { %9829 = vmatprep.mubr.bf16.mxu1 %v1060_v4  ;;  %v14968_v32 = vld [vmem:[%s16203_s7 + $0x630] sm:$0xff]   ;;  %v14994_v4 = vld [vmem:[%s16203_s7 + $0x7a0] sm:$0xff]  }
 0x130   : > { %13397 = vmatpush3.bf16.msra.mxu0 %v14915_v33  ;;  %v14969_v33 = vld [vmem:[%s16203_s7 + $0x6b0] sm:$0xff]  }
 0x131   : > { %13419 = vmatpush3.bf16.msra.mxu1 %v14916_v34  ;;  %13398 = vmatprep.subr.bf16.mxu0 %v14917_v35  ;;  %v307_v34 = vld [vmem:[%s16221_s27 + $0x30] sm:$0xff]  ;;  %v14970_v35 = vld [vmem:[%s16203_s7 + $0x678] sm:$0xff]  }
 0x132   : > { %13420 = vmatprep.subr.bf16.mxu1 %v14918_v36  ;;  %v474_v36 = vrot.slane %v307_v34, %v16260_v42 }
 0x134   : > { %13399 = vmatpush3.bf16.msra.mxu0 %v14919_v37  ;;  %v467_v37 = vcombine.high %v307_v34, %v307_v34  ;;  %v15008_v34 = vld [vmem:[%s16203_s7 + $0x840] sm:$0xff]  }
 0x135   : > { %13421 = vmatpush3.bf16.msra.mxu1 %v14920_v38  ;;  %13400 = vmatprep.subr.bf16.mxu0 %v14921_v39  ;;  %v14971_v38 = vld [vmem:[%s16203_s7 + $0x6f8] sm:$0xff]  }
 0x136   : > { %13422 = vmatprep.subr.bf16.mxu1 %v14922_v40  ;;  %v14972_v39 = vld [vmem:[%s16203_s7 + $0x638] sm:$0xff]   ;;  %v482_v40 = vcombine.high %v474_v36, %v474_v36 }
 0x138   : > { %13401 = vmatpush3.bf16.msra.mxu0 %v14923_v41  ;;  %v481_v41 = vrot.slane %v467_v37, %v16260_v42  ;;  %v15010_v37 = vld [vmem:[%s16203_s7 + $0x800] sm:$0xff]  }
 0x139   : > { %13423 = vmatpush3.bf16.msra.mxu1 %v14924_v43  ;;  %13402 = vmatprep.subr.bf16.mxu0 %v14925_v44  ;;  %v14973_v43 = vld [vmem:[%s16203_s7 + $0x6b8] sm:$0xff]   ;;  %v1062_v44 = vpack.c.bf16 %v482_v40, %v482_v40 }
 0x13a   : > { %13424 = vmatprep.subr.bf16.mxu1 %v14926_v45  ;;  %v483_v45 = vcombine.high %v481_v41, %v481_v41 }
 0x13c   : > { %13403 = vmatpush3.bf16.msra.mxu0 %v14927_v46  ;;  %v14975_v46 = vld [vmem:[%s16203_s7 + $0x740] sm:$0xff]  }
 0x13d   : > { %13425 = vmatpush3.bf16.msra.mxu1 %v14928_v47  ;;  %13404 = vmatprep.subr.bf16.mxu0 %v14929_v48  ;;  %v14976_v47 = vld [vmem:[%s16203_s7 + $0x7c0] sm:$0xff]   ;;  %v1064_v48 = vpack.c.bf16 %v483_v45, %v483_v45  ;;  %v15014_v45 = vld [vmem:[%s16203_s7 + $0x808] sm:$0xff]  }
 0x13e   : > { %13426 = vmatprep.subr.bf16.mxu1 %v14930_v49  ;;  %v14977_v49 = vld [vmem:[%s16203_s7 + $0x700] sm:$0xff]  }
 0x140   : > { %13405 = vmatpush3.bf16.msra.mxu0 %v14931_v50  ;;  %v1061_v50 = vpack.c.bf16 %v474_v36, %v474_v36  ;;  %v15009_v36 = vld [vmem:[%s16203_s7 + $0x8c0] sm:$0xff]  }
 0x141   : > { %13427 = vmatpush3.bf16.msra.mxu1 %v14932_v51  ;;  %13406 = vmatprep.subr.bf16.mxu0 %v14933_v52  ;;  %v1063_v51 = vpack.c.bf16 %v481_v41, %v481_v41  ;;  %v14978_v52 = vld [vmem:[%s16203_s7 + $0x780] sm:$0xff]  }
 0x142   : > { %13428 = vmatprep.subr.bf16.mxu1 %v14934_v53  ;;  %v14979_v53 = vld [vmem:[%s16203_s7 + $0x748] sm:$0xff]   ;;  %v15011_v41 = vld [vmem:[%s16203_s7 + $0x880] sm:$0xff]  }
 0x144   : > { %13407 = vmatpush3.bf16.msra.mxu0 %v14935_v54  ;;  %v14980_v54 = vld [vmem:[%s16203_s7 + $0x7c8] sm:$0xff]  }
 0x145   : > { %13429 = vmatpush3.bf16.msra.mxu1 %v14936_v56  ;;  %13408 = vmatprep.subr.bf16.mxu0 %v14937_v59  ;;  %v14982_v56 = vld [vmem:[%s16203_s7 + $0x788] sm:$0xff]   ;;  %v14985_v59 = vld [vmem:[%s16203_s7 + $0x710] sm:$0xff]  }
 0x146   : > { %13430 = vmatprep.subr.bf16.mxu1 %v14938_v60  ;;  %v14986_v60 = vld [vmem:[%s16203_s7 + $0x790] sm:$0xff]  }
 0x148   : > { %13409 = vmatpush3.bf16.msra.mxu0 %v14939_v63  ;;  %v14989_v63 = vld [vmem:[%s16203_s7 + $0x718] sm:$0xff]  }
 0x149   : > { %13431 = vmatpush3.bf16.msra.mxu1 %v14940_v0  ;;  %13438 = vmatprep.subr.bf16.mxu0 %v14942_v3  ;;  %v14990_v0 = vld [vmem:[%s16203_s7 + $0x798] sm:$0xff]   ;;  %v14993_v3 = vld [vmem:[%s16203_s7 + $0x720] sm:$0xff]  }
 0x14a   : > { %13460 = vmatprep.subr.bf16.mxu1 %v14943_v5  ;;  %v14995_v5 = vld [vmem:[%s16203_s7 + $0x768] sm:$0xff]  }
 0x14b   : > { %9790 = vmatmul.mubr.bf16.vlgmr.msra.gmra.mrb[20].mxu0 %v1057_v7  ;;  %v14997_v7 = vld [vmem:[%s16203_s7 + $0x728] sm:$0xff]  }
 0x14c   : > { %9830 = vmatmul.mubr.bf16.vlgmr.msra.gmra.mrb[20].mxu1 %v1059_v8  ;;  %13439 = vmatpush3.bf16.msra.mxu0 %v14944_v6  ;;  %v14996_v6 = vld [vmem:[%s16203_s7 + $0x7e8] sm:$0xff]  }
 0x14d   : > { %13461 = vmatpush3.bf16.msra.mxu1 %v14945_v9  ;;  %13440 = vmatprep.subr.bf16.mxu0 %v14946_v10  ;;  %v14998_v8 = vld [vmem:[%s16203_s7 + $0x7a8] sm:$0xff]   ;;  %v14999_v9 = vld [vmem:[%s16203_s7 + $0x770] sm:$0xff]  }
 0x14e   : > { %13462 = vmatprep.subr.bf16.mxu1 %v14947_v11  ;;  %9869 = vmatprep.mubr.bf16.mxu0 %v1062_v44  ;;  %v15000_v10 = vld [vmem:[%s16203_s7 + $0x7f0] sm:$0xff]   ;;  %v15013_v44 = vld [vmem:[%s16203_s7 + $0x8c8] sm:$0xff]  }
 0x14f   : > { %9909 = vmatprep.mubr.bf16.mxu1 %v1064_v48  ;;  %v15017_v48 = vld [vmem:[%s16203_s7 + $0x8d0] sm:$0xff]  }
 0x150   : > { %13441 = vmatpush3.bf16.msra.mxu0 %v14948_v12 }
 0x151   : > { %13463 = vmatpush3.bf16.msra.mxu1 %v14949_v13  ;;  %13442 = vmatprep.subr.bf16.mxu0 %v14950_v14  ;;  %v15001_v13 = vld [vmem:[%s16203_s7 + $0x730] sm:$0xff]  }
 0x152   : > { %13464 = vmatprep.subr.bf16.mxu1 %v14951_v15  ;;  %v15002_v14 = vld [vmem:[%s16203_s7 + $0x7b0] sm:$0xff]  }
 0x154   : > { %13443 = vmatpush3.bf16.msra.mxu0 %v14952_v16 }
 0x155   : > { %13465 = vmatpush3.bf16.msra.mxu1 %v14953_v17  ;;  %13444 = vmatprep.subr.bf16.mxu0 %v14954_v18  ;;  %v15003_v17 = vld [vmem:[%s16203_s7 + $0x778] sm:$0xff]  }
 0x156   : > { %13466 = vmatprep.subr.bf16.mxu1 %v14955_v19  ;;  %v15004_v18 = vld [vmem:[%s16203_s7 + $0x7f8] sm:$0xff]  }
 0x157   : > { %v308_v19 = vld [vmem:[%s16221_s27 + $0x38] sm:$0xff] }
 0x158   : > { %13445 = vmatpush3.bf16.msra.mxu0 %v14956_v20 }
 0x159   : > { %13467 = vmatpush3.bf16.msra.mxu1 %v14957_v21  ;;  %13446 = vmatprep.subr.bf16.mxu0 %v14958_v22 }
 0x15a   : > { %13468 = vmatprep.subr.bf16.mxu1 %v14959_v23 }
 0x15c   : > { %13447 = vmatpush3.bf16.msra.mxu0 %v14960_v24  ;;  %v491_v24 = vrot.slane %v308_v19, %v16260_v42 }
 0x15d   : > { %13469 = vmatpush3.bf16.msra.mxu1 %v14961_v25  ;;  %13448 = vmatprep.subr.bf16.mxu0 %v14962_v26 }
 0x15e   : > { %13470 = vmatprep.subr.bf16.mxu1 %v14963_v27  ;;  %v484_v27 = vcombine.high %v308_v19, %v308_v19  ;;  %v15038_v19 = vld [vmem:[%s16203_s7 + $0x838] sm:$0xff]  }
 0x160   : > { %13449 = vmatpush3.bf16.msra.mxu0 %v14964_v28 }
 0x161   : > { %13471 = vmatpush3.bf16.msra.mxu1 %v14965_v29  ;;  %13450 = vmatprep.subr.bf16.mxu0 %v14966_v30  ;;  %v15005_v29 = vld [vmem:[%s16203_s7 + $0x738] sm:$0xff]   ;;  %v499_v30 = vcombine.high %v491_v24, %v491_v24 }
 0x162   : > { %13472 = vmatprep.subr.bf16.mxu1 %v14967_v31  ;;  %v15006_v31 = vld [vmem:[%s16203_s7 + $0x7b8] sm:$0xff]  }
 0x164   : > { %13451 = vmatpush3.bf16.msra.mxu0 %v14968_v32  ;;  %v498_v32 = vrot.slane %v484_v27, %v16260_v42  ;;  %v15042_v27 = vld [vmem:[%s16203_s7 + $0x9c0] sm:$0xff]  }
 0x165   : > { %13473 = vmatpush3.bf16.msra.mxu1 %v14969_v33  ;;  %13452 = vmatprep.subr.bf16.mxu0 %v14970_v35  ;;  %v1066_v33 = vpack.c.bf16 %v499_v30, %v499_v30 }
 0x166   : > { %13474 = vmatprep.subr.bf16.mxu1 %v14971_v38  ;;  %v500_v35 = vcombine.high %v498_v32, %v498_v32  ;;  %v1067_v40 = vpack.c.bf16 %v498_v32, %v498_v32  ;;  %v15044_v32 = vld [vmem:[%s16203_s7 + $0x980] sm:$0xff]  }
 0x168   : > { %13453 = vmatpush3.bf16.msra.mxu0 %v14972_v39  ;;  %v1068_v38 = vpack.c.bf16 %v500_v35, %v500_v35  ;;  %v1065_v39 = vpack.c.bf16 %v491_v24, %v491_v24  ;;  %v15041_v24 = vld [vmem:[%s16203_s7 + $0x940] sm:$0xff]   ;;  %v15047_v35 = vld [vmem:[%s16203_s7 + $0x908] sm:$0xff]  }
 0x169   : > { %13475 = vmatpush3.bf16.msra.mxu1 %v14973_v43  ;;  %13482 = vmatprep.subr.bf16.mxu0 %v14975_v46  ;;  %v15012_v43 = vld [vmem:[%s16203_s7 + $0x848] sm:$0xff]  }
 0x16a   : > { %13504 = vmatprep.subr.bf16.mxu1 %v14976_v47  ;;  %v15015_v46 = vld [vmem:[%s16203_s7 + $0x888] sm:$0xff]   ;;  %v15016_v47 = vld [vmem:[%s16203_s7 + $0x850] sm:$0xff]  }
 0x16b   : > { %9870 = vmatmul.mubr.bf16.vlgmr.msra.gmra.mrb[24].mxu0 %v1061_v50  ;;  %v15019_v50 = vld [vmem:[%s16203_s7 + $0x890] sm:$0xff]  }
 0x16c   : > { %9910 = vmatmul.mubr.bf16.vlgmr.msra.gmra.mrb[24].mxu1 %v1063_v51  ;;  %13483 = vmatpush3.bf16.msra.mxu0 %v14977_v49  ;;  %v15018_v49 = vld [vmem:[%s16203_s7 + $0x810] sm:$0xff]   ;;  %v15020_v51 = vld [vmem:[%s16203_s7 + $0x858] sm:$0xff]  }
 0x16d   : > { %13505 = vmatpush3.bf16.msra.mxu1 %v14978_v52  ;;  %13484 = vmatprep.subr.bf16.mxu0 %v14979_v53  ;;  %v15021_v52 = vld [vmem:[%s16203_s7 + $0x8d8] sm:$0xff]  }
 0x16e   : > { %13506 = vmatprep.subr.bf16.mxu1 %v14980_v54  ;;  %9949 = vmatprep.mubr.bf16.mxu0 %v1066_v33  ;;  %v15022_v53 = vld [vmem:[%s16203_s7 + $0x818] sm:$0xff]   ;;  %v15045_v33 = vld [vmem:[%s16203_s7 + $0x948] sm:$0xff]  }
 0x16f   : > { %9989 = vmatprep.mubr.bf16.mxu1 %v1068_v38  ;;  %v15023_v54 = vld [vmem:[%s16203_s7 + $0x898] sm:$0xff]   ;;  %v15050_v38 = vld [vmem:[%s16203_s7 + $0x9d0] sm:$0xff]  }
 0x170   : > { %13485 = vmatpush3.bf16.msra.mxu0 %v14981_v55  ;;  %v15024_v55 = vld [vmem:[%s16203_s7 + $0x860] sm:$0xff]  }
 0x171   : > { %13507 = vmatpush3.bf16.msra.mxu1 %v14982_v56  ;;  %13486 = vmatprep.subr.bf16.mxu0 %v14983_v57  ;;  %v15025_v56 = vld [vmem:[%s16203_s7 + $0x8e0] sm:$0xff]  }
 0x172   : > { %13508 = vmatprep.subr.bf16.mxu1 %v14984_v58  ;;  %v15026_v57 = vld [vmem:[%s16203_s7 + $0x820] sm:$0xff]  }
 0x173   : > { %v15027_v58 = vld [vmem:[%s16203_s7 + $0x8a0] sm:$0xff]  }
 0x174   : > { %13487 = vmatpush3.bf16.msra.mxu0 %v14985_v59  ;;  %v15028_v59 = vld [vmem:[%s16203_s7 + $0x868] sm:$0xff]  }
 0x175   : > { %13509 = vmatpush3.bf16.msra.mxu1 %v14986_v60  ;;  %13488 = vmatprep.subr.bf16.mxu0 %v14987_v61  ;;  %v15029_v60 = vld [vmem:[%s16203_s7 + $0x8e8] sm:$0xff]  }
 0x176   : > { %13510 = vmatprep.subr.bf16.mxu1 %v14988_v62  ;;  %v15030_v61 = vld [vmem:[%s16203_s7 + $0x828] sm:$0xff]  }
 0x177   : > { %v15031_v62 = vld [vmem:[%s16203_s7 + $0x8a8] sm:$0xff]  }
 0x178   : > { %13489 = vmatpush3.bf16.msra.mxu0 %v14989_v63  ;;  %v15032_v63 = vld [vmem:[%s16203_s7 + $0x870] sm:$0xff]  }
 0x179   : > { %13511 = vmatpush3.bf16.msra.mxu1 %v14990_v0  ;;  %13490 = vmatprep.subr.bf16.mxu0 %v14991_v1  ;;  %v15033_v0 = vld [vmem:[%s16203_s7 + $0x8f0] sm:$0xff]  }
 0x17a   : > { %13512 = vmatprep.subr.bf16.mxu1 %v14992_v2 }
 0x17c   : > { %13491 = vmatpush3.bf16.msra.mxu0 %v14993_v3  ;;  %v15034_v3 = vld [vmem:[%s16203_s7 + $0x830] sm:$0xff]  }
 0x17d   : > { %13513 = vmatpush3.bf16.msra.mxu1 %v14994_v4  ;;  %13492 = vmatprep.subr.bf16.mxu0 %v14995_v5  ;;  %v15035_v4 = vld [vmem:[%s16203_s7 + $0x8b0] sm:$0xff]  }
 0x17e   : > { %13514 = vmatprep.subr.bf16.mxu1 %v14996_v6  ;;  %v13190_v11 = vpop.f32.mrb[0].mxu0 }
 0x17f   : > { %v13212_v12 = vpop.f32.mrb[0].mxu1  ;;  %v13191_v15 = vpop.f32.mrb[1].mxu0 }
 0x180   : > { %v13213_v16 = vpop.f32.mrb[1].mxu1  ;;  %v13192_v20 = vadd.f32 %v13191_v15, %v13190_v11  ;;  %v13193_v22 = vpop.f32.mrb[2].mxu0  ;;  %13493 = vmatpush3.bf16.msra.mxu0 %v14997_v7  ;;  %v15036_v7 = vld [vmem:[%s16203_s7 + $0x878] sm:$0xff]  }
 0x181   : > { %v13214_v21 = vadd.f32 %v13213_v16, %v13212_v12  ;;  %v13215_v23 = vpop.f32.mrb[2].mxu1  ;;  %13515 = vmatpush3.bf16.msra.mxu1 %v14998_v8  ;;  %v13194_v25 = vpop.f32.mrb[3].mxu0  ;;  %13494 = vmatprep.subr.bf16.mxu0 %v14999_v9  ;;  %v15037_v12 = vld [vmem:[%s16203_s7 + $0x8f8] sm:$0xff]  }
 0x182   : > { %v13216_v26 = vpop.f32.mrb[3].mxu1  ;;  %13516 = vmatprep.subr.bf16.mxu1 %v15000_v10 }
 0x183   : > { %v16504_v28 = vadd.f32 %v13214_v21, %v13192_v20  ;;  %v15039_v20 = vld [vmem:[%s16203_s7 + $0x8b8] sm:$0xff]  }
 0x184   : > { %13495 = vmatpush3.bf16.msra.mxu0 %v15001_v13  ;;  %v309_v13 = vld [vmem:[%s16221_s27 + $0x40] sm:$0xff] }
 0x185   : > { %13517 = vmatpush3.bf16.msra.mxu1 %v15002_v14  ;;  %13496 = vmatprep.subr.bf16.mxu0 %v15003_v17  ;;  %v508_v16 = vrot.slane %v309_v13, %v16260_v42  ;;  %v501_v17 = vcombine.high %v309_v13, %v309_v13 }
 0x186   : > { %13518 = vmatprep.subr.bf16.mxu1 %v15004_v18 }
 0x187   : > { %v516_v21 = vcombine.high %v508_v16, %v508_v16  ;;  %v515_v22 = vrot.slane %v501_v17, %v16260_v42  ;;  %v1069_v30 = vpack.c.bf16 %v508_v16, %v508_v16  ;;  %v15075_v16 = vld [vmem:[%s16203_s7 + $0xac0] sm:$0xff]  }
 0x188   : > { %13497 = vmatpush3.bf16.msra.mxu0 %v15005_v29 }
 0x189   : > { %13519 = vmatpush3.bf16.msra.mxu1 %v15006_v31  ;;  %13526 = vmatprep.subr.bf16.mxu0 %v15008_v34  ;;  %v1070_v25 = vpack.c.bf16 %v516_v21, %v516_v21  ;;  %v517_v26 = vcombine.high %v515_v22, %v515_v22  ;;  %v1071_v31 = vpack.c.bf16 %v515_v22, %v515_v22  ;;  %v15046_v34 = vld [vmem:[%s16203_s7 + $0x9c8] sm:$0xff]   ;;  %v15077_v22 = vld [vmem:[%s16203_s7 + $0xa80] sm:$0xff]  }
 0x18a   : > { %13548 = vmatprep.subr.bf16.mxu1 %v15009_v36  ;;  %v15048_v36 = vld [vmem:[%s16203_s7 + $0x988] sm:$0xff]  }
 0x18b   : > { %9950 = vmatmul.mubr.bf16.vlgmr.msra.gmra.mrb[28].mxu0 %v1065_v39  ;;  %v1072_v29 = vpack.c.bf16 %v517_v26, %v517_v26  ;;  %v15051_v39 = vld [vmem:[%s16203_s7 + $0x910] sm:$0xff]   ;;  %v15080_v26 = vld [vmem:[%s16203_s7 + $0xa08] sm:$0xff]  }
 0x18c   : > { %9990 = vmatmul.mubr.bf16.vlgmr.msra.gmra.mrb[28].mxu1 %v1067_v40  ;;  %13527 = vmatpush3.bf16.msra.mxu0 %v15010_v37  ;;  %v15049_v37 = vld [vmem:[%s16203_s7 + $0x950] sm:$0xff]  }
 0x18d   : > { %13549 = vmatpush3.bf16.msra.mxu1 %v15011_v41  ;;  %13528 = vmatprep.subr.bf16.mxu0 %v15012_v43  ;;  %v15052_v40 = vld [vmem:[%s16203_s7 + $0x990] sm:$0xff]   ;;  %v15053_v41 = vld [vmem:[%s16203_s7 + $0x958] sm:$0xff]  }
 0x18e   : > { %13550 = vmatprep.subr.bf16.mxu1 %v15013_v44  ;;  %10029 = vmatprep.mubr.bf16.mxu0 %v1070_v25  ;;  %v15054_v43 = vld [vmem:[%s16203_s7 + $0x9d8] sm:$0xff]   ;;  %v15079_v25 = vld [vmem:[%s16203_s7 + $0xac8] sm:$0xff]  }
 0x18f   : > { %10069 = vmatprep.mubr.bf16.mxu1 %v1072_v29  ;;  %v15055_v44 = vld [vmem:[%s16203_s7 + $0x918] sm:$0xff]   ;;  %v15083_v29 = vld [vmem:[%s16203_s7 + $0xad0] sm:$0xff]  }
 0x190   : > { %13529 = vmatpush3.bf16.msra.mxu0 %v15014_v45  ;;  %v15056_v45 = vld [vmem:[%s16203_s7 + $0x998] sm:$0xff]  }
 0x191   : > { %13551 = vmatpush3.bf16.msra.mxu1 %v15015_v46  ;;  %13530 = vmatprep.subr.bf16.mxu0 %v15016_v47  ;;  %v15057_v46 = vld [vmem:[%s16203_s7 + $0x960] sm:$0xff]  }
 0x192   : > { %13552 = vmatprep.subr.bf16.mxu1 %v15017_v48  ;;  %v15058_v47 = vld [vmem:[%s16203_s7 + $0x9e0] sm:$0xff]  }
 0x193   : > { %v15059_v48 = vld [vmem:[%s16203_s7 + $0x920] sm:$0xff]  }
 0x194   : > { %13531 = vmatpush3.bf16.msra.mxu0 %v15018_v49  ;;  %v15060_v49 = vld [vmem:[%s16203_s7 + $0x9a0] sm:$0xff]  }
 0x195   : > { %13553 = vmatpush3.bf16.msra.mxu1 %v15019_v50  ;;  %13532 = vmatprep.subr.bf16.mxu0 %v15020_v51  ;;  %v15061_v50 = vld [vmem:[%s16203_s7 + $0x968] sm:$0xff]  }
 0x196   : > { %13554 = vmatprep.subr.bf16.mxu1 %v15021_v52  ;;  %v15062_v51 = vld [vmem:[%s16203_s7 + $0x9e8] sm:$0xff]  }
 0x197   : > { %v15063_v52 = vld [vmem:[%s16203_s7 + $0x928] sm:$0xff]  }
 0x198   : > { %13533 = vmatpush3.bf16.msra.mxu0 %v15022_v53  ;;  %v15064_v53 = vld [vmem:[%s16203_s7 + $0x9a8] sm:$0xff]  }
 0x199   : > { %13555 = vmatpush3.bf16.msra.mxu1 %v15023_v54  ;;  %13534 = vmatprep.subr.bf16.mxu0 %v15024_v55  ;;  %v15065_v54 = vld [vmem:[%s16203_s7 + $0x970] sm:$0xff]  }
 0x19a   : > { %13556 = vmatprep.subr.bf16.mxu1 %v15025_v56  ;;  %v15066_v55 = vld [vmem:[%s16203_s7 + $0x9f0] sm:$0xff]  }
 0x19c   : > { %13535 = vmatpush3.bf16.msra.mxu0 %v15026_v57 }
 0x19d   : > { %13557 = vmatpush3.bf16.msra.mxu1 %v15027_v58  ;;  %13536 = vmatprep.subr.bf16.mxu0 %v15028_v59  ;;  %v15067_v58 = vld [vmem:[%s16203_s7 + $0x930] sm:$0xff]  }
 0x19e   : > { %13558 = vmatprep.subr.bf16.mxu1 %v15029_v60  ;;  %v13234_v1 = vpop.f32.mrb[4].mxu0  ;;  %v15068_v59 = vld [vmem:[%s16203_s7 + $0x9b0] sm:$0xff]  }
 0x19f   : > { %v13256_v2 = vpop.f32.mrb[4].mxu1  ;;  %v13235_v5 = vpop.f32.mrb[5].mxu0 }
 0x1a0   : > { %v13257_v6 = vpop.f32.mrb[5].mxu1  ;;  %v13236_v8 = vadd.f32 %v13235_v5, %v13234_v1  ;;  %v13237_v10 = vpop.f32.mrb[6].mxu0  ;;  %13537 = vmatpush3.bf16.msra.mxu0 %v15030_v61 }
 0x1a1   : > { %v13258_v9 = vadd.f32 %v13257_v6, %v13256_v2  ;;  %v13259_v11 = vpop.f32.mrb[6].mxu1  ;;  %13559 = vmatpush3.bf16.msra.mxu1 %v15031_v62  ;;  %v13238_v14 = vpop.f32.mrb[7].mxu0  ;;  %13538 = vmatprep.subr.bf16.mxu0 %v15032_v63  ;;  %v15069_v2 = vld [vmem:[%s16203_s7 + $0x978] sm:$0xff]  }
 0x1a2   : > { %v13260_v15 = vpop.f32.mrb[7].mxu1  ;;  %13560 = vmatprep.subr.bf16.mxu1 %v15033_v0  ;;  %v9472_v18 = vadd.f32 %v13236_v8, %v16504_v28  ;;  %v15043_v28 = vld [vmem:[%s16203_s7 + $0x900] sm:$0xff]   ;;  %v15071_v8 = vld [vmem:[%s16203_s7 + $0x938] sm:$0xff]  }
 0x1a3   : > { %v15074_v15 = vld [vmem:[%s16203_s7 + $0xa40] sm:$0xff]  }
 0x1a4   : > { %v16545_v23 = vadd.f32 %v13258_v9, %v9472_v18  ;;  %13539 = vmatpush3.bf16.msra.mxu0 %v15034_v3  ;;  %v15070_v3 = vld [vmem:[%s16203_s7 + $0x9f8] sm:$0xff]  }
 0x1a5   : > { %13561 = vmatpush3.bf16.msra.mxu1 %v15035_v4  ;;  %13540 = vmatprep.subr.bf16.mxu0 %v15036_v7  ;;  %v310_v7 = vld [vmem:[%s16221_s27 + $0x48] sm:$0xff] }
 0x1a6   : > { %13562 = vmatprep.subr.bf16.mxu1 %v15037_v12  ;;  %v525_v9 = vrot.slane %v310_v7, %v16260_v42  ;;  %v518_v10 = vcombine.high %v310_v7, %v310_v7  ;;  %v15072_v12 = vld [vmem:[%s16203_s7 + $0x9b8] sm:$0xff]   ;;  %v15108_v7 = vld [vmem:[%s16203_s7 + $0xbc0] sm:$0xff]  }
 0x1a8   : > { %13541 = vmatpush3.bf16.msra.mxu0 %v15038_v19  ;;  %v533_v13 = vcombine.high %v525_v9, %v525_v9  ;;  %v532_v14 = vrot.slane %v518_v10, %v16260_v42  ;;  %v1073_v19 = vpack.c.bf16 %v525_v9, %v525_v9  ;;  %v15109_v9 = vld [vmem:[%s16203_s7 + $0xb00] sm:$0xff]  }
 0x1a9   : > { %13563 = vmatpush3.bf16.msra.mxu1 %v15039_v20  ;;  %13570 = vmatprep.subr.bf16.mxu0 %v15041_v24  ;;  %v15076_v20 = vld [vmem:[%s16203_s7 + $0xa00] sm:$0xff]   ;;  %v15078_v24 = vld [vmem:[%s16203_s7 + $0xa48] sm:$0xff]  }
 0x1aa   : > { %13592 = vmatprep.subr.bf16.mxu1 %v15042_v27  ;;  %v1074_v17 = vpack.c.bf16 %v533_v13, %v533_v13  ;;  %v534_v18 = vcombine.high %v532_v14, %v532_v14  ;;  %v1075_v21 = vpack.c.bf16 %v532_v14, %v532_v14  ;;  %v15081_v27 = vld [vmem:[%s16203_s7 + $0xa88] sm:$0xff]  }
 0x1ab   : > { %10030 = vmatmul.mubr.bf16.vlgmr.msra.gmra.mrb[32].mxu0 %v1069_v30  ;;  %v15084_v30 = vld [vmem:[%s16203_s7 + $0xa10] sm:$0xff]   ;;  %v15111_v14 = vld [vmem:[%s16203_s7 + $0xb48] sm:$0xff]  }
 0x1ac   : > { %10070 = vmatmul.mubr.bf16.vlgmr.msra.gmra.mrb[32].mxu1 %v1071_v31  ;;  %13571 = vmatpush3.bf16.msra.mxu0 %v15043_v28  ;;  %v15082_v28 = vld [vmem:[%s16203_s7 + $0xa50] sm:$0xff]  }
 0x1ad   : > { %13593 = vmatpush3.bf16.msra.mxu1 %v15044_v32  ;;  %13572 = vmatprep.subr.bf16.mxu0 %v15045_v33  ;;  %v15085_v31 = vld [vmem:[%s16203_s7 + $0xa90] sm:$0xff]   ;;  %v15086_v32 = vld [vmem:[%s16203_s7 + $0xa58] sm:$0xff]  }
 0x1ae   : > { %13594 = vmatprep.subr.bf16.mxu1 %v15046_v34  ;;  %10109 = vmatprep.mubr.bf16.mxu0 %v1074_v17  ;;  %v15087_v33 = vld [vmem:[%s16203_s7 + $0xad8] sm:$0xff]   ;;  %v15113_v17 = vld [vmem:[%s16203_s7 + $0xb08] sm:$0xff]  }
 0x1af   : > { %v15088_v34 = vld [vmem:[%s16203_s7 + $0xa18] sm:$0xff]  }
 0x1b0   : > { %13573 = vmatpush3.bf16.msra.mxu0 %v15047_v35  ;;  %v15089_v35 = vld [vmem:[%s16203_s7 + $0xa98] sm:$0xff]  }
 0x1b1   : > { %13595 = vmatpush3.bf16.msra.mxu1 %v15048_v36  ;;  %13574 = vmatprep.subr.bf16.mxu0 %v15049_v37  ;;  %v15090_v36 = vld [vmem:[%s16203_s7 + $0xa60] sm:$0xff]  }
 0x1b2   : > { %13596 = vmatprep.subr.bf16.mxu1 %v15050_v38  ;;  %v15091_v37 = vld [vmem:[%s16203_s7 + $0xae0] sm:$0xff]  }
 0x1b3   : > { %v15092_v38 = vld [vmem:[%s16203_s7 + $0xa20] sm:$0xff]  }
 0x1b4   : > { %13575 = vmatpush3.bf16.msra.mxu0 %v15051_v39  ;;  %v15093_v39 = vld [vmem:[%s16203_s7 + $0xaa0] sm:$0xff]  }
 0x1b5   : > { %13597 = vmatpush3.bf16.msra.mxu1 %v15052_v40  ;;  %13576 = vmatprep.subr.bf16.mxu0 %v15053_v41  ;;  %v15094_v40 = vld [vmem:[%s16203_s7 + $0xa68] sm:$0xff]  }
 0x1b6   : > { %13598 = vmatprep.subr.bf16.mxu1 %v15054_v43  ;;  %v15095_v41 = vld [vmem:[%s16203_s7 + $0xae8] sm:$0xff]  }
 0x1b7   : > { %v15096_v43 = vld [vmem:[%s16203_s7 + $0xa28] sm:$0xff]  }
 0x1b8   : > { %13577 = vmatpush3.bf16.msra.mxu0 %v15055_v44  ;;  %v15097_v44 = vld [vmem:[%s16203_s7 + $0xaa8] sm:$0xff]  }
 0x1b9   : > { %13599 = vmatpush3.bf16.msra.mxu1 %v15056_v45  ;;  %13578 = vmatprep.subr.bf16.mxu0 %v15057_v46  ;;  %v15098_v45 = vld [vmem:[%s16203_s7 + $0xa70] sm:$0xff]  }
 0x1ba   : > { %13600 = vmatprep.subr.bf16.mxu1 %v15058_v47 }
 0x1bc   : > { %13579 = vmatpush3.bf16.msra.mxu0 %v15059_v48  ;;  %v15099_v48 = vld [vmem:[%s16203_s7 + $0xaf0] sm:$0xff]  }
 0x1bd   : > { %13601 = vmatpush3.bf16.msra.mxu1 %v15060_v49  ;;  %13580 = vmatprep.subr.bf16.mxu0 %v15061_v50  ;;  %v15100_v49 = vld [vmem:[%s16203_s7 + $0xa30] sm:$0xff]  }
 0x1be   : > { %13602 = vmatprep.subr.bf16.mxu1 %v15062_v51  ;;  %v13278_v56 = vpop.f32.mrb[8].mxu0 }
 0x1bf   : > { %v13300_v57 = vpop.f32.mrb[8].mxu1  ;;  %v13279_v60 = vpop.f32.mrb[9].mxu0 }
 0x1c0   : > { %v13301_v61 = vpop.f32.mrb[9].mxu1  ;;  %v13280_v62 = vadd.f32 %v13279_v60, %v13278_v56  ;;  %v13281_v0 = vpop.f32.mrb[10].mxu0  ;;  %13581 = vmatpush3.bf16.msra.mxu0 %v15063_v52  ;;  %v15101_v52 = vld [vmem:[%s16203_s7 + $0xab0] sm:$0xff]  }
 0x1c1   : > { %v13302_v63 = vadd.f32 %v13301_v61, %v13300_v57  ;;  %v13303_v1 = vpop.f32.mrb[10].mxu1  ;;  %13603 = vmatpush3.bf16.msra.mxu1 %v15064_v53  ;;  %v13282_v4 = vpop.f32.mrb[11].mxu0  ;;  %13582 = vmatprep.subr.bf16.mxu0 %v15065_v54  ;;  %v15102_v57 = vld [vmem:[%s16203_s7 + $0xa78] sm:$0xff]  }
 0x1c2   : > { %v13304_v5 = vpop.f32.mrb[11].mxu1  ;;  %13604 = vmatprep.subr.bf16.mxu1 %v15066_v55  ;;  %v9552_v6 = vadd.f32 %v13280_v62, %v16545_v23  ;;  %v1076_v23 = vpack.c.bf16 %v534_v18, %v534_v18  ;;  %v15104_v62 = vld [vmem:[%s16203_s7 + $0xa38] sm:$0xff]   ;;  %v15107_v4 = vld [vmem:[%s16203_s7 + $0xb40] sm:$0xff]   ;;  %v15114_v18 = vld [vmem:[%s16203_s7 + $0xb88] sm:$0xff]  }
 0x1c3   : > { %v15105_v1 = vld [vmem:[%s16203_s7 + $0xab8] sm:$0xff]  }
 0x1c4   : > { %v16581_v11 = vadd.f32 %v13302_v63, %v9552_v6  ;;  %13583 = vmatpush3.bf16.msra.mxu0 %v15067_v58  ;;  %10149 = vmatprep.mubr.bf16.mxu1 %v1076_v23  ;;  %v15103_v58 = vld [vmem:[%s16203_s7 + $0xaf8] sm:$0xff]   ;;  %v311_v63 = vld [vmem:[%s16221_s27 + $0x50] sm:$0xff] }
 0x1c5   : > { %13605 = vmatpush3.bf16.msra.mxu1 %v15068_v59  ;;  %13584 = vmatprep.subr.bf16.mxu0 %v15069_v2  ;;  %v542_v2 = vrot.slane %v311_v63, %v16260_v42  ;;  %v15119_v23 = vld [vmem:[%s16203_s7 + $0xb58] sm:$0xff]  }
 0x1c6   : > { %13606 = vmatprep.subr.bf16.mxu1 %v15070_v3  ;;  %v535_v3 = vcombine.high %v311_v63, %v311_v63 }
 0x1c7   : > { %v550_v5 = vcombine.high %v542_v2, %v542_v2 }
 0x1c8   : > { %13585 = vmatpush3.bf16.msra.mxu0 %v15071_v8  ;;  %v549_v6 = vrot.slane %v535_v3, %v16260_v42  ;;  %v1077_v8 = vpack.c.bf16 %v542_v2, %v542_v2  ;;  %v15142_v2 = vld [vmem:[%s16203_s7 + $0xc00] sm:$0xff]  }
 0x1c9   : > { %13607 = vmatpush3.bf16.msra.mxu1 %v15072_v12  ;;  %13614 = vmatprep.subr.bf16.mxu0 %v15074_v15  ;;  %v1078_v10 = vpack.c.bf16 %v550_v5, %v550_v5  ;;  %v15110_v12 = vld [vmem:[%s16203_s7 + $0xb80] sm:$0xff]  }
 0x1ca   : > { %13636 = vmatprep.subr.bf16.mxu1 %v15075_v16  ;;  %v1079_v13 = vpack.c.bf16 %v549_v6, %v549_v6  ;;  %v15112_v16 = vld [vmem:[%s16203_s7 + $0xbc8] sm:$0xff]  }
 0x1cb   : > { %10110 = vmatmul.mubr.bf16.vlgmr.msra.gmra.mrb[36].mxu0 %v1073_v19  ;;  %v15115_v19 = vld [vmem:[%s16203_s7 + $0xb50] sm:$0xff]  }
 0x1cc   : > { %10150 = vmatmul.mubr.bf16.vlgmr.msra.gmra.mrb[36].mxu1 %v1075_v21  ;;  %13615 = vmatpush3.bf16.msra.mxu0 %v15076_v20  ;;  %v15116_v20 = vld [vmem:[%s16203_s7 + $0xbd0] sm:$0xff]  }
 0x1cd   : > { %13637 = vmatpush3.bf16.msra.mxu1 %v15077_v22  ;;  %13616 = vmatprep.subr.bf16.mxu0 %v15078_v24  ;;  %v15117_v21 = vld [vmem:[%s16203_s7 + $0xb10] sm:$0xff]   ;;  %v15120_v24 = vld [vmem:[%s16203_s7 + $0xbd8] sm:$0xff]  }
 0x1ce   : > { %13638 = vmatprep.subr.bf16.mxu1 %v15079_v25  ;;  %10189 = vmatprep.mubr.bf16.mxu0 %v1078_v10  ;;  %v15118_v22 = vld [vmem:[%s16203_s7 + $0xb90] sm:$0xff]   ;;  %v15121_v25 = vld [vmem:[%s16203_s7 + $0xb18] sm:$0xff]   ;;  %v15147_v10 = vld [vmem:[%s16203_s7 + $0xc88] sm:$0xff]  }
 0x1d0   : > { %13617 = vmatpush3.bf16.msra.mxu0 %v15080_v26  ;;  %v15122_v26 = vld [vmem:[%s16203_s7 + $0xb98] sm:$0xff]  }
 0x1d1   : > { %13639 = vmatpush3.bf16.msra.mxu1 %v15081_v27  ;;  %13618 = vmatprep.subr.bf16.mxu0 %v15082_v28  ;;  %v15123_v27 = vld [vmem:[%s16203_s7 + $0xb60] sm:$0xff]  }
 0x1d2   : > { %13640 = vmatprep.subr.bf16.mxu1 %v15083_v29  ;;  %v15124_v28 = vld [vmem:[%s16203_s7 + $0xbe0] sm:$0xff]  }
 0x1d3   : > { %v15125_v29 = vld [vmem:[%s16203_s7 + $0xb20] sm:$0xff]  }
 0x1d4   : > { %13619 = vmatpush3.bf16.msra.mxu0 %v15084_v30  ;;  %v15126_v30 = vld [vmem:[%s16203_s7 + $0xba0] sm:$0xff]  }
 0x1d5   : > { %13641 = vmatpush3.bf16.msra.mxu1 %v15085_v31  ;;  %13620 = vmatprep.subr.bf16.mxu0 %v15086_v32  ;;  %v15127_v31 = vld [vmem:[%s16203_s7 + $0xb68] sm:$0xff]  }
 0x1d6   : > { %13642 = vmatprep.subr.bf16.mxu1 %v15087_v33  ;;  %v15128_v32 = vld [vmem:[%s16203_s7 + $0xbe8] sm:$0xff]  }
 0x1d7   : > { %v15129_v33 = vld [vmem:[%s16203_s7 + $0xb28] sm:$0xff]  }
 0x1d8   : > { %13621 = vmatpush3.bf16.msra.mxu0 %v15088_v34  ;;  %v15130_v34 = vld [vmem:[%s16203_s7 + $0xba8] sm:$0xff]  }
 0x1d9   : > { %13643 = vmatpush3.bf16.msra.mxu1 %v15089_v35  ;;  %13622 = vmatprep.subr.bf16.mxu0 %v15090_v36  ;;  %v15131_v35 = vld [vmem:[%s16203_s7 + $0xb70] sm:$0xff]  }
 0x1da   : > { %13644 = vmatprep.subr.bf16.mxu1 %v15091_v37 }
 0x1dc   : > { %13623 = vmatpush3.bf16.msra.mxu0 %v15092_v38  ;;  %v15132_v38 = vld [vmem:[%s16203_s7 + $0xbf0] sm:$0xff]  }
 0x1dd   : > { %13645 = vmatpush3.bf16.msra.mxu1 %v15093_v39  ;;  %13624 = vmatprep.subr.bf16.mxu0 %v15094_v40  ;;  %v15133_v39 = vld [vmem:[%s16203_s7 + $0xb30] sm:$0xff]  }
 0x1de   : > { %v13322_v46 = vpop.f32.mrb[12].mxu0  ;;  %13646 = vmatprep.subr.bf16.mxu1 %v15095_v41 }
 0x1df   : > { %v13344_v47 = vpop.f32.mrb[12].mxu1  ;;  %v13323_v50 = vpop.f32.mrb[13].mxu0 }
 0x1e0   : > { %v13345_v51 = vpop.f32.mrb[13].mxu1  ;;  %v13324_v53 = vadd.f32 %v13323_v50, %v13322_v46  ;;  %v13325_v55 = vpop.f32.mrb[14].mxu0  ;;  %13625 = vmatpush3.bf16.msra.mxu0 %v15096_v43 }
 0x1e1   : > { %v13346_v54 = vadd.f32 %v13345_v51, %v13344_v47  ;;  %v13347_v56 = vpop.f32.mrb[14].mxu1  ;;  %13647 = vmatpush3.bf16.msra.mxu1 %v15097_v44  ;;  %v13326_v59 = vpop.f32.mrb[15].mxu0  ;;  %13626 = vmatprep.subr.bf16.mxu0 %v15098_v45  ;;  %v15134_v47 = vld [vmem:[%s16203_s7 + $0xbb0] sm:$0xff]  }
 0x1e2   : > { %v13348_v60 = vpop.f32.mrb[15].mxu1  ;;  %v9632_v61 = vadd.f32 %v13324_v53, %v16581_v11  ;;  %13648 = vmatprep.subr.bf16.mxu1 %v15099_v48  ;;  %v551_v11 = vcombine.high %v549_v6, %v549_v6  ;;  %v15135_v48 = vld [vmem:[%s16203_s7 + $0xb78] sm:$0xff]   ;;  %v15143_v6 = vld [vmem:[%s16203_s7 + $0xc80] sm:$0xff]  }
 0x1e3   : > { %v15137_v53 = vld [vmem:[%s16203_s7 + $0xb38] sm:$0xff]  }
 0x1e4   : > { %v16618_v0 = vadd.f32 %v13346_v54, %v9632_v61  ;;  %13627 = vmatpush3.bf16.msra.mxu0 %v15100_v49  ;;  %v1080_v15 = vpack.c.bf16 %v551_v11, %v551_v11  ;;  %v312_v55 = vld [vmem:[%s16221_s27 + $0x58] sm:$0xff] }
 0x1e5   : > { %13649 = vmatpush3.bf16.msra.mxu1 %v15101_v52  ;;  %13628 = vmatprep.subr.bf16.mxu0 %v15102_v57  ;;  %v15136_v52 = vld [vmem:[%s16203_s7 + $0xbf8] sm:$0xff]   ;;  %v559_v56 = vrot.slane %v312_v55, %v16260_v42  ;;  %v552_v57 = vcombine.high %v312_v55, %v312_v55  ;;  %v15149_v11 = vld [vmem:[%s16203_s7 + $0xcd0] sm:$0xff]   ;;  %v15175_v55 = vld [vmem:[%s16203_s7 + $0xd00] sm:$0xff]  }
 0x1e6   : > { %13650 = vmatprep.subr.bf16.mxu1 %v15103_v58  ;;  %10229 = vmatprep.mubr.bf16.mxu1 %v1080_v15  ;;  %v15140_v58 = vld [vmem:[%s16203_s7 + $0xc40] sm:$0xff]   ;;  %v15138_v59 = vld [vmem:[%s16203_s7 + $0xbb8] sm:$0xff]  }
 0x1e7   : > { %v567_v60 = vcombine.high %v559_v56, %v559_v56  ;;  %v566_v61 = vrot.slane %v552_v57, %v16260_v42  ;;  %v1081_v63 = vpack.c.bf16 %v559_v56, %v559_v56  ;;  %v15153_v15 = vld [vmem:[%s16203_s7 + $0xcd8] sm:$0xff]  }
 0x1e8   : > { %13629 = vmatpush3.bf16.msra.mxu0 %v15104_v62  ;;  %v15141_v62 = vld [vmem:[%s16203_s7 + $0xcc0] sm:$0xff]  }
 0x1e9   : > { %13651 = vmatpush3.bf16.msra.mxu1 %v15105_v1  ;;  %13658 = vmatprep.subr.bf16.mxu0 %v15107_v4  ;;  %v568_v1 = vcombine.high %v566_v61, %v566_v61  ;;  %v1083_v3 = vpack.c.bf16 %v566_v61, %v566_v61  ;;  %v15144_v4 = vld [vmem:[%s16203_s7 + $0xc48] sm:$0xff]  }
 0x1ea   : > { %13680 = vmatprep.subr.bf16.mxu1 %v15108_v7  ;;  %v15145_v7 = vld [vmem:[%s16203_s7 + $0xcc8] sm:$0xff]  }
 0x1eb   : > { %10190 = vmatmul.mubr.bf16.vlgmr.msra.gmra.mrb[40].mxu0 %v1077_v8  ;;  %v1084_v5 = vpack.c.bf16 %v568_v1, %v568_v1  ;;  %v15146_v8 = vld [vmem:[%s16203_s7 + $0xc08] sm:$0xff]   ;;  %v15181_v1 = vld [vmem:[%s16203_s7 + $0xd50] sm:$0xff]  }
 0x1ec   : > { %13659 = vmatpush3.bf16.msra.mxu0 %v15109_v9  ;;  %10230 = vmatmul.mubr.bf16.vlgmr.msra.gmra.mrb[40].mxu1 %v1079_v13  ;;  %v15148_v9 = vld [vmem:[%s16203_s7 + $0xc50] sm:$0xff]   ;;  %v15152_v13 = vld [vmem:[%s16203_s7 + $0xc58] sm:$0xff]  }
 0x1ed   : > { %13660 = vmatprep.subr.bf16.mxu0 %v15111_v14  ;;  %13681 = vmatpush3.bf16.msra.mxu1 %v15110_v12  ;;  %v15150_v12 = vld [vmem:[%s16203_s7 + $0xc10] sm:$0xff]  }
 0x1ee   : > { %13682 = vmatprep.subr.bf16.mxu1 %v15112_v16  ;;  %10309 = vmatprep.mubr.bf16.mxu1 %v1084_v5  ;;  %v15151_v14 = vld [vmem:[%s16203_s7 + $0xc90] sm:$0xff]   ;;  %v15154_v16 = vld [vmem:[%s16203_s7 + $0xc18] sm:$0xff]  }
 0x1ef   : > { %v15185_v5 = vld [vmem:[%s16203_s7 + $0xd58] sm:$0xff]  }
 0x1f0   : > { %13661 = vmatpush3.bf16.msra.mxu0 %v15113_v17  ;;  %v15156_v17 = vld [vmem:[%s16203_s7 + $0xc60] sm:$0xff]  }
 0x1f1   : > { %13662 = vmatprep.subr.bf16.mxu0 %v15115_v19  ;;  %13683 = vmatpush3.bf16.msra.mxu1 %v15114_v18  ;;  %v15155_v18 = vld [vmem:[%s16203_s7 + $0xc98] sm:$0xff]   ;;  %v15157_v19 = vld [vmem:[%s16203_s7 + $0xce0] sm:$0xff]  }
 0x1f2   : > { %13684 = vmatprep.subr.bf16.mxu1 %v15116_v20  ;;  %v15158_v20 = vld [vmem:[%s16203_s7 + $0xc20] sm:$0xff]  }
 0x1f4   : > { %13663 = vmatpush3.bf16.msra.mxu0 %v15117_v21  ;;  %v15160_v21 = vld [vmem:[%s16203_s7 + $0xc68] sm:$0xff]  }
 0x1f5   : > { %13664 = vmatprep.subr.bf16.mxu0 %v15119_v23  ;;  %13685 = vmatpush3.bf16.msra.mxu1 %v15118_v22  ;;  %v15159_v22 = vld [vmem:[%s16203_s7 + $0xca0] sm:$0xff]   ;;  %v15161_v23 = vld [vmem:[%s16203_s7 + $0xce8] sm:$0xff]  }
 0x1f6   : > { %13686 = vmatprep.subr.bf16.mxu1 %v15120_v24  ;;  %v15162_v24 = vld [vmem:[%s16203_s7 + $0xc28] sm:$0xff]  }
 0x1f8   : > { %13665 = vmatpush3.bf16.msra.mxu0 %v15121_v25 }
 0x1f9   : > { %13666 = vmatprep.subr.bf16.mxu0 %v15123_v27  ;;  %13687 = vmatpush3.bf16.msra.mxu1 %v15122_v26  ;;  %v15163_v27 = vld [vmem:[%s16203_s7 + $0xca8] sm:$0xff]  }
 0x1fa   : > { %13688 = vmatprep.subr.bf16.mxu1 %v15124_v28  ;;  %v15164_v28 = vld [vmem:[%s16203_s7 + $0xc70] sm:$0xff]  }
 0x1fc   : > { %13667 = vmatpush3.bf16.msra.mxu0 %v15125_v29 }
 0x1fd   : > { %13668 = vmatprep.subr.bf16.mxu0 %v15127_v31  ;;  %13689 = vmatpush3.bf16.msra.mxu1 %v15126_v30 }
 0x1fe   : > { %v13366_v36 = vpop.f32.mrb[16].mxu0  ;;  %13690 = vmatprep.subr.bf16.mxu1 %v15128_v32 }
 0x1ff   : > { %v13388_v37 = vpop.f32.mrb[16].mxu1  ;;  %v13367_v40 = vpop.f32.mrb[17].mxu0 }
 0x200   : > { %v13389_v41 = vpop.f32.mrb[17].mxu1  ;;  %v13368_v43 = vadd.f32 %v13367_v40, %v13366_v36  ;;  %v13369_v45 = vpop.f32.mrb[18].mxu0  ;;  %13669 = vmatpush3.bf16.msra.mxu0 %v15129_v33  ;;  %v15166_v36 = vld [vmem:[%s16203_s7 + $0xc30] sm:$0xff]  }
 0x201   : > { %v13390_v44 = vadd.f32 %v13389_v41, %v13388_v37  ;;  %v13391_v46 = vpop.f32.mrb[18].mxu1  ;;  %v13370_v49 = vpop.f32.mrb[19].mxu0  ;;  %13670 = vmatprep.subr.bf16.mxu0 %v15131_v35  ;;  %13691 = vmatpush3.bf16.msra.mxu1 %v15130_v34  ;;  %v15165_v35 = vld [vmem:[%s16203_s7 + $0xcf0] sm:$0xff]   ;;  %v15168_v41 = vld [vmem:[%s16203_s7 + $0xc78] sm:$0xff]  }
 0x202   : > { %v13392_v50 = vpop.f32.mrb[19].mxu1  ;;  %v9712_v51 = vadd.f32 %v13368_v43, %v16618_v0  ;;  %13692 = vmatprep.subr.bf16.mxu1 %v15132_v38  ;;  %v1082_v0 = vpack.c.bf16 %v567_v60, %v567_v60  ;;  %v15169_v43 = vld [vmem:[%s16203_s7 + $0xcf8] sm:$0xff]   ;;  %v15173_v49 = vld [vmem:[%s16203_s7 + $0xd40] sm:$0xff]   ;;  %v15177_v60 = vld [vmem:[%s16203_s7 + $0xd48] sm:$0xff]  }
 0x203   : > { %v15170_v45 = vld [vmem:[%s16203_s7 + $0xc38] sm:$0xff]  }
 0x204   : > { %v16655_v54 = vadd.f32 %v13390_v44, %v9712_v51  ;;  %13671 = vmatpush3.bf16.msra.mxu0 %v15133_v39  ;;  %10269 = vmatprep.mubr.bf16.mxu0 %v1082_v0  ;;  %v15167_v39 = vld [vmem:[%s16203_s7 + $0xcb0] sm:$0xff]   ;;  %v313_v46 = vld [vmem:[%s16221_s27 + $0x60] sm:$0xff]  ;;  %v15180_v0 = vld [vmem:[%s16203_s7 + $0xd88] sm:$0xff]  }
 0x205   : > { %13672 = vmatprep.subr.bf16.mxu0 %v15135_v48  ;;  %13693 = vmatpush3.bf16.msra.mxu1 %v15134_v47  ;;  %v576_v47 = vrot.slane %v313_v46, %v16260_v42  ;;  %v569_v48 = vcombine.high %v313_v46, %v313_v46  ;;  %v15171_v50 = vld [vmem:[%s16203_s7 + $0xcb8] sm:$0xff]  }
 0x206   : > { %13694 = vmatprep.subr.bf16.mxu1 %v15136_v52 }
 0x207   : > { %v584_v51 = vcombine.high %v576_v47, %v576_v47  ;;  %v583_v52 = vrot.slane %v569_v48, %v16260_v42  ;;  %v15208_v48 = vld [vmem:[%s16203_s7 + $0xe00] sm:$0xff]  }
 0x208   : > { %13673 = vmatpush3.bf16.msra.mxu0 %v15137_v53  ;;  %v15174_v53 = vld [vmem:[%s16203_s7 + $0xdc0] sm:$0xff]  }
 0x209   : > { %13702 = vmatprep.subr.bf16.mxu0 %v15140_v58  ;;  %13695 = vmatpush3.bf16.msra.mxu1 %v15138_v59  ;;  %v1086_v56 = vpack.c.bf16 %v584_v51, %v584_v51  ;;  %v585_v57 = vcombine.high %v583_v52, %v583_v52  ;;  %v15176_v58 = vld [vmem:[%s16203_s7 + $0xd80] sm:$0xff]   ;;  %v1087_v59 = vpack.c.bf16 %v583_v52, %v583_v52 }
 0x20a   : > { %13724 = vmatprep.subr.bf16.mxu1 %v15141_v62  ;;  %v15178_v62 = vld [vmem:[%s16203_s7 + $0xdc8] sm:$0xff]   ;;  %v15209_v52 = vld [vmem:[%s16203_s7 + $0xe80] sm:$0xff]  }
 0x20b   : > { %10270 = vmatmul.mubr.bf16.vlgmr.msra.gmra.mrb[44].mxu0 %v1081_v63  ;;  %v1088_v61 = vpack.c.bf16 %v585_v57, %v585_v57  ;;  %v15179_v63 = vld [vmem:[%s16203_s7 + $0xd08] sm:$0xff]   ;;  %v15215_v57 = vld [vmem:[%s16203_s7 + $0xed0] sm:$0xff]  }
 0x20c   : > { %13703 = vmatpush3.bf16.msra.mxu0 %v15142_v2  ;;  %10310 = vmatmul.mubr.bf16.vlgmr.msra.gmra.mrb[44].mxu1 %v1083_v3  ;;  %v15182_v2 = vld [vmem:[%s16203_s7 + $0xdd0] sm:$0xff]  }
 0x20d   : > { %13704 = vmatprep.subr.bf16.mxu0 %v15144_v4  ;;  %13725 = vmatpush3.bf16.msra.mxu1 %v15143_v6  ;;  %v15183_v3 = vld [vmem:[%s16203_s7 + $0xd10] sm:$0xff]   ;;  %v15186_v6 = vld [vmem:[%s16203_s7 + $0xdd8] sm:$0xff]  }
 0x20e   : > { %13726 = vmatprep.subr.bf16.mxu1 %v15145_v7  ;;  %10349 = vmatprep.mubr.bf16.mxu0 %v1086_v56  ;;  %v15184_v4 = vld [vmem:[%s16203_s7 + $0xd90] sm:$0xff]   ;;  %v15187_v7 = vld [vmem:[%s16203_s7 + $0xd18] sm:$0xff]   ;;  %v15213_v56 = vld [vmem:[%s16203_s7 + $0xe88] sm:$0xff]  }
 0x20f   : > { %10389 = vmatprep.mubr.bf16.mxu1 %v1088_v61  ;;  %v15219_v61 = vld [vmem:[%s16203_s7 + $0xed8] sm:$0xff]  }
 0x210   : > { %13705 = vmatpush3.bf16.msra.mxu0 %v15146_v8  ;;  %v15188_v8 = vld [vmem:[%s16203_s7 + $0xd98] sm:$0xff]  }
 0x211   : > { %13706 = vmatprep.subr.bf16.mxu0 %v15148_v9  ;;  %13727 = vmatpush3.bf16.msra.mxu1 %v15147_v10  ;;  %v15189_v9 = vld [vmem:[%s16203_s7 + $0xd60] sm:$0xff]  }
 0x212   : > { %13728 = vmatprep.subr.bf16.mxu1 %v15149_v11  ;;  %v15190_v10 = vld [vmem:[%s16203_s7 + $0xde0] sm:$0xff]  }
 0x213   : > { %v15191_v11 = vld [vmem:[%s16203_s7 + $0xd20] sm:$0xff]  }
 0x214   : > { %13707 = vmatpush3.bf16.msra.mxu0 %v15150_v12  ;;  %v15192_v12 = vld [vmem:[%s16203_s7 + $0xda0] sm:$0xff]  }
 0x215   : > { %13708 = vmatprep.subr.bf16.mxu0 %v15152_v13  ;;  %13729 = vmatpush3.bf16.msra.mxu1 %v15151_v14  ;;  %v15193_v13 = vld [vmem:[%s16203_s7 + $0xd68] sm:$0xff]  }
 0x216   : > { %13730 = vmatprep.subr.bf16.mxu1 %v15153_v15  ;;  %v15194_v14 = vld [vmem:[%s16203_s7 + $0xde8] sm:$0xff]  }
 0x217   : > { %v15195_v15 = vld [vmem:[%s16203_s7 + $0xd28] sm:$0xff]  }
 0x218   : > { %13709 = vmatpush3.bf16.msra.mxu0 %v15154_v16 }
 0x219   : > { %13710 = vmatprep.subr.bf16.mxu0 %v15156_v17  ;;  %13731 = vmatpush3.bf16.msra.mxu1 %v15155_v18  ;;  %v15196_v18 = vld [vmem:[%s16203_s7 + $0xda8] sm:$0xff]  }
 0x21a   : > { %13732 = vmatprep.subr.bf16.mxu1 %v15157_v19  ;;  %v15197_v19 = vld [vmem:[%s16203_s7 + $0xd70] sm:$0xff]  }
 0x21c   : > { %13711 = vmatpush3.bf16.msra.mxu0 %v15158_v20 }
 0x21d   : > { %13712 = vmatprep.subr.bf16.mxu0 %v15160_v21  ;;  %13733 = vmatpush3.bf16.msra.mxu1 %v15159_v22 }
 0x21e   : > { %v13410_v25 = vpop.f32.mrb[20].mxu0  ;;  %13734 = vmatprep.subr.bf16.mxu1 %v15161_v23 }
 0x21f   : > { %v13432_v26 = vpop.f32.mrb[20].mxu1  ;;  %v13411_v29 = vpop.f32.mrb[21].mxu0 }
 0x220   : > { %v13433_v30 = vpop.f32.mrb[21].mxu1  ;;  %v13412_v31 = vadd.f32 %v13411_v29, %v13410_v25  ;;  %v13413_v33 = vpop.f32.mrb[22].mxu0  ;;  %13713 = vmatpush3.bf16.msra.mxu0 %v15162_v24 }
 0x221   : > { %v13434_v32 = vadd.f32 %v13433_v30, %v13432_v26  ;;  %v13435_v34 = vpop.f32.mrb[22].mxu1  ;;  %v13414_v37 = vpop.f32.mrb[23].mxu0  ;;  %13714 = vmatprep.subr.bf16.mxu0 %v15164_v28  ;;  %13735 = vmatpush3.bf16.msra.mxu1 %v15163_v27  ;;  %v15198_v26 = vld [vmem:[%s16203_s7 + $0xdf0] sm:$0xff]  }
 0x222   : > { %v13436_v38 = vpop.f32.mrb[23].mxu1  ;;  %v9792_v40 = vadd.f32 %v13412_v31, %v16655_v54  ;;  %13736 = vmatprep.subr.bf16.mxu1 %v15165_v35  ;;  %v1085_v54 = vpack.c.bf16 %v576_v47, %v576_v47  ;;  %v15199_v27 = vld [vmem:[%s16203_s7 + $0xd30] sm:$0xff]   ;;  %v15202_v34 = vld [vmem:[%s16203_s7 + $0xdf8] sm:$0xff]  }
 0x223   : > { %v15200_v31 = vld [vmem:[%s16203_s7 + $0xdb0] sm:$0xff]   ;;  %v15203_v35 = vld [vmem:[%s16203_s7 + $0xd38] sm:$0xff]  }
 0x224   : > { %v16692_v44 = vadd.f32 %v13434_v32, %v9792_v40  ;;  %13715 = vmatpush3.bf16.msra.mxu0 %v15166_v36  ;;  %v15201_v32 = vld [vmem:[%s16203_s7 + $0xd78] sm:$0xff]   ;;  %v314_v36 = vld [vmem:[%s16221_s27 + $0x68] sm:$0xff] }
 0x225   : > { %13716 = vmatprep.subr.bf16.mxu0 %v15168_v41  ;;  %13737 = vmatpush3.bf16.msra.mxu1 %v15167_v39  ;;  %v593_v37 = vrot.slane %v314_v36, %v16260_v42  ;;  %v586_v38 = vcombine.high %v314_v36, %v314_v36  ;;  %v15206_v39 = vld [vmem:[%s16203_s7 + $0xe40] sm:$0xff]   ;;  %v15204_v40 = vld [vmem:[%s16203_s7 + $0xdb8] sm:$0xff]  }
 0x226   : > { %13738 = vmatprep.subr.bf16.mxu1 %v15169_v43  ;;  %v15241_v36 = vld [vmem:[%s16203_s7 + $0xf00] sm:$0xff]  }
 0x227   : > { %v601_v41 = vcombine.high %v593_v37, %v593_v37  ;;  %v600_v43 = vrot.slane %v586_v38, %v16260_v42 }
 0x228   : > { %13717 = vmatpush3.bf16.msra.mxu0 %v15170_v45  ;;  %v1089_v45 = vpack.c.bf16 %v593_v37, %v593_v37 }
 0x229   : > { %13746 = vmatprep.subr.bf16.mxu0 %v15173_v49  ;;  %13739 = vmatpush3.bf16.msra.mxu1 %v15171_v50  ;;  %v1090_v46 = vpack.c.bf16 %v601_v41, %v601_v41  ;;  %v602_v47 = vcombine.high %v600_v43, %v600_v43  ;;  %v1091_v49 = vpack.c.bf16 %v600_v43, %v600_v43  ;;  %v15210_v50 = vld [vmem:[%s16203_s7 + $0xe48] sm:$0xff]  }
 0x22a   : > { %13768 = vmatprep.subr.bf16.mxu1 %v15174_v53  ;;  %v15211_v53 = vld [vmem:[%s16203_s7 + $0xec8] sm:$0xff]  }
 0x22b   : > { %10350 = vmatmul.mubr.bf16.vlgmr.msra.gmra.mrb[48].mxu0 %v1085_v54  ;;  %v1092_v51 = vpack.c.bf16 %v602_v47, %v602_v47  ;;  %v15212_v54 = vld [vmem:[%s16203_s7 + $0xe08] sm:$0xff]   ;;  %v15247_v47 = vld [vmem:[%s16203_s7 + $0xf50] sm:$0xff]  }
 0x22c   : > { %13747 = vmatpush3.bf16.msra.mxu0 %v15175_v55  ;;  %10390 = vmatmul.mubr.bf16.vlgmr.msra.gmra.mrb[48].mxu1 %v1087_v59  ;;  %v15214_v55 = vld [vmem:[%s16203_s7 + $0xe50] sm:$0xff]   ;;  %v15218_v59 = vld [vmem:[%s16203_s7 + $0xe58] sm:$0xff]   ;;  %v15243_v41 = vld [vmem:[%s16203_s7 + $0xf48] sm:$0xff]  }
 0x22d   : > { %13748 = vmatprep.subr.bf16.mxu0 %v15177_v60  ;;  %13769 = vmatpush3.bf16.msra.mxu1 %v15176_v58  ;;  %v15216_v58 = vld [vmem:[%s16203_s7 + $0xe10] sm:$0xff]  }
 0x22e   : > { %13770 = vmatprep.subr.bf16.mxu1 %v15178_v62  ;;  %10429 = vmatprep.mubr.bf16.mxu0 %v1090_v46  ;;  %v15217_v60 = vld [vmem:[%s16203_s7 + $0xe90] sm:$0xff]   ;;  %v15220_v62 = vld [vmem:[%s16203_s7 + $0xe18] sm:$0xff]   ;;  %v15246_v46 = vld [vmem:[%s16203_s7 + $0xf88] sm:$0xff]  }
 0x22f   : > { %10469 = vmatprep.mubr.bf16.mxu1 %v1092_v51  ;;  %v15251_v51 = vld [vmem:[%s16203_s7 + $0xf58] sm:$0xff]  }
 0x230   : > { %13749 = vmatpush3.bf16.msra.mxu0 %v15179_v63  ;;  %v15222_v63 = vld [vmem:[%s16203_s7 + $0xe60] sm:$0xff]  }
 0x231   : > { %13750 = vmatprep.subr.bf16.mxu0 %v15181_v1  ;;  %13771 = vmatpush3.bf16.msra.mxu1 %v15180_v0  ;;  %v15221_v0 = vld [vmem:[%s16203_s7 + $0xe98] sm:$0xff]   ;;  %v15223_v1 = vld [vmem:[%s16203_s7 + $0xee0] sm:$0xff]  }
 0x232   : > { %13772 = vmatprep.subr.bf16.mxu1 %v15182_v2  ;;  %v15224_v2 = vld [vmem:[%s16203_s7 + $0xe20] sm:$0xff]  }
 0x234   : > { %13751 = vmatpush3.bf16.msra.mxu0 %v15183_v3  ;;  %v15226_v3 = vld [vmem:[%s16203_s7 + $0xe68] sm:$0xff]  }
 0x235   : > { %13752 = vmatprep.subr.bf16.mxu0 %v15185_v5  ;;  %13773 = vmatpush3.bf16.msra.mxu1 %v15184_v4  ;;  %v15225_v4 = vld [vmem:[%s16203_s7 + $0xea0] sm:$0xff]  }
 0x236   : > { %13774 = vmatprep.subr.bf16.mxu1 %v15186_v6 }
 0x238   : > { %13753 = vmatpush3.bf16.msra.mxu0 %v15187_v7  ;;  %v15227_v7 = vld [vmem:[%s16203_s7 + $0xee8] sm:$0xff]  }
 0x239   : > { %13754 = vmatprep.subr.bf16.mxu0 %v15189_v9  ;;  %13775 = vmatpush3.bf16.msra.mxu1 %v15188_v8  ;;  %v15228_v8 = vld [vmem:[%s16203_s7 + $0xe28] sm:$0xff]  }
 0x23a   : > { %13776 = vmatprep.subr.bf16.mxu1 %v15190_v10 }
 0x23c   : > { %13755 = vmatpush3.bf16.msra.mxu0 %v15191_v11  ;;  %v15229_v11 = vld [vmem:[%s16203_s7 + $0xea8] sm:$0xff]  }
 0x23d   : > { %13756 = vmatprep.subr.bf16.mxu0 %v15193_v13  ;;  %13777 = vmatpush3.bf16.msra.mxu1 %v15192_v12 }
 0x23e   : > { %v13454_v16 = vpop.f32.mrb[24].mxu0  ;;  %13778 = vmatprep.subr.bf16.mxu1 %v15194_v14 }
 0x23f   : > { %v13476_v17 = vpop.f32.mrb[24].mxu1  ;;  %v13455_v20 = vpop.f32.mrb[25].mxu0 }
 0x240   : > { %v13477_v21 = vpop.f32.mrb[25].mxu1  ;;  %v13456_v22 = vadd.f32 %v13455_v20, %v13454_v16  ;;  %v13457_v24 = vpop.f32.mrb[26].mxu0  ;;  %13757 = vmatpush3.bf16.msra.mxu0 %v15195_v15  ;;  %v15230_v16 = vld [vmem:[%s16203_s7 + $0xe70] sm:$0xff]  }
 0x241   : > { %v13478_v23 = vadd.f32 %v13477_v21, %v13476_v17  ;;  %v13479_v25 = vpop.f32.mrb[26].mxu1  ;;  %v13458_v28 = vpop.f32.mrb[27].mxu0  ;;  %13758 = vmatprep.subr.bf16.mxu0 %v15197_v19  ;;  %13779 = vmatpush3.bf16.msra.mxu1 %v15196_v18  ;;  %v15231_v17 = vld [vmem:[%s16203_s7 + $0xef0] sm:$0xff]   ;;  %v15234_v24 = vld [vmem:[%s16203_s7 + $0xe78] sm:$0xff]  }
 0x242   : > { %v13480_v29 = vpop.f32.mrb[27].mxu1  ;;  %v9872_v30 = vadd.f32 %v13456_v22, %v16692_v44  ;;  %13780 = vmatprep.subr.bf16.mxu1 %v15198_v26  ;;  %v15207_v44 = vld [vmem:[%s16203_s7 + $0xec0] sm:$0xff]   ;;  %v15232_v21 = vld [vmem:[%s16203_s7 + $0xe30] sm:$0xff]   ;;  %v15235_v25 = vld [vmem:[%s16203_s7 + $0xef8] sm:$0xff]  }
 0x243   : > { %v15233_v22 = vld [vmem:[%s16203_s7 + $0xeb0] sm:$0xff]   ;;  %v15236_v26 = vld [vmem:[%s16203_s7 + $0xe38] sm:$0xff]  }
 0x244   : > { %v16729_v33 = vadd.f32 %v13478_v23, %v9872_v30  ;;  %13759 = vmatpush3.bf16.msra.mxu0 %v15199_v27  ;;  %v315_v27 = vld [vmem:[%s16221_s27 + $0x70] sm:$0xff]  ;;  %v15239_v30 = vld [vmem:[%s16203_s7 + $0xf40] sm:$0xff]  }
 0x245   : > { %13760 = vmatprep.subr.bf16.mxu0 %v15201_v32  ;;  %13781 = vmatpush3.bf16.msra.mxu1 %v15200_v31  ;;  %v610_v28 = vrot.slane %v315_v27, %v16260_v42  ;;  %v603_v29 = vcombine.high %v315_v27, %v315_v27  ;;  %v15237_v31 = vld [vmem:[%s16203_s7 + $0xeb8] sm:$0xff]   ;;  %v15274_v27 = vld [vmem:[%s16203_s7 + $0x1000] sm:$0xff]  }
 0x246   : > { %13782 = vmatprep.subr.bf16.mxu1 %v15202_v34  ;;  %v15240_v34 = vld [vmem:[%s16203_s7 + $0xfc0] sm:$0xff]  }
 0x247   : > { %v618_v32 = vcombine.high %v610_v28, %v610_v28 }
 0x248   : > { %13761 = vmatpush3.bf16.msra.mxu0 %v15203_v35  ;;  %v1093_v35 = vpack.c.bf16 %v610_v28, %v610_v28 }
 0x249   : > { %13790 = vmatprep.subr.bf16.mxu0 %v15206_v39  ;;  %13783 = vmatpush3.bf16.msra.mxu1 %v15204_v40  ;;  %v1094_v37 = vpack.c.bf16 %v618_v32, %v618_v32  ;;  %v15242_v39 = vld [vmem:[%s16203_s7 + $0xf80] sm:$0xff]   ;;  %v15276_v32 = vld [vmem:[%s16203_s7 + $0x1048] sm:$0xff]  }
 0x24a   : > { %13812 = vmatprep.subr.bf16.mxu1 %v15207_v44  ;;  %v15244_v44 = vld [vmem:[%s16203_s7 + $0xfc8] sm:$0xff]  }
 0x24b   : > { %10430 = vmatmul.mubr.bf16.vlgmr.msra.gmra.mrb[52].mxu0 %v1089_v45  ;;  %v15245_v45 = vld [vmem:[%s16203_s7 + $0xf08] sm:$0xff]  }
 0x24c   : > { %13791 = vmatpush3.bf16.msra.mxu0 %v15208_v48  ;;  %10470 = vmatmul.mubr.bf16.vlgmr.msra.gmra.mrb[52].mxu1 %v1091_v49  ;;  %v15248_v48 = vld [vmem:[%s16203_s7 + $0xfd0] sm:$0xff]  }
 0x24d   : > { %13792 = vmatprep.subr.bf16.mxu0 %v15210_v50  ;;  %13813 = vmatpush3.bf16.msra.mxu1 %v15209_v52  ;;  %v15249_v49 = vld [vmem:[%s16203_s7 + $0xf10] sm:$0xff]   ;;  %v15252_v52 = vld [vmem:[%s16203_s7 + $0xfd8] sm:$0xff]  }
 0x24e   : > { %13814 = vmatprep.subr.bf16.mxu1 %v15211_v53  ;;  %10509 = vmatprep.mubr.bf16.mxu0 %v1094_v37  ;;  %v15250_v50 = vld [vmem:[%s16203_s7 + $0xf90] sm:$0xff]   ;;  %v15253_v53 = vld [vmem:[%s16203_s7 + $0xf18] sm:$0xff]  }
 0x24f   : > { %v15280_v37 = vld [vmem:[%s16203_s7 + $0x1050] sm:$0xff]  }
 0x250   : > { %13793 = vmatpush3.bf16.msra.mxu0 %v15212_v54  ;;  %v15254_v54 = vld [vmem:[%s16203_s7 + $0xf98] sm:$0xff]  }
 0x251   : > { %13794 = vmatprep.subr.bf16.mxu0 %v15214_v55  ;;  %13815 = vmatpush3.bf16.msra.mxu1 %v15213_v56  ;;  %v15255_v55 = vld [vmem:[%s16203_s7 + $0xf60] sm:$0xff]  }
 0x252   : > { %13816 = vmatprep.subr.bf16.mxu1 %v15215_v57  ;;  %v15256_v56 = vld [vmem:[%s16203_s7 + $0xfe0] sm:$0xff]  }
 0x253   : > { %v15257_v57 = vld [vmem:[%s16203_s7 + $0xf20] sm:$0xff]  }
 0x254   : > { %13795 = vmatpush3.bf16.msra.mxu0 %v15216_v58  ;;  %v15258_v58 = vld [vmem:[%s16203_s7 + $0xfa0] sm:$0xff]  }
 0x255   : > { %13796 = vmatprep.subr.bf16.mxu0 %v15218_v59  ;;  %13817 = vmatpush3.bf16.msra.mxu1 %v15217_v60  ;;  %v15259_v59 = vld [vmem:[%s16203_s7 + $0xf68] sm:$0xff]  }
 0x256   : > { %13818 = vmatprep.subr.bf16.mxu1 %v15219_v61 }
 0x258   : > { %13797 = vmatpush3.bf16.msra.mxu0 %v15220_v62  ;;  %v15260_v62 = vld [vmem:[%s16203_s7 + $0xfe8] sm:$0xff]  }
 0x259   : > { %13798 = vmatprep.subr.bf16.mxu0 %v15222_v63  ;;  %13819 = vmatpush3.bf16.msra.mxu1 %v15221_v0  ;;  %v15261_v63 = vld [vmem:[%s16203_s7 + $0xf28] sm:$0xff]  }
 0x25a   : > { %13820 = vmatprep.subr.bf16.mxu1 %v15223_v1 }
 0x25c   : > { %13799 = vmatpush3.bf16.msra.mxu0 %v15224_v2 }
 0x25d   : > { %13800 = vmatprep.subr.bf16.mxu0 %v15226_v3  ;;  %13821 = vmatpush3.bf16.msra.mxu1 %v15225_v4 }
 0x25e   : > { %v13498_v5 = vpop.f32.mrb[28].mxu0  ;;  %13822 = vmatprep.subr.bf16.mxu1 %v15227_v7  ;;  %v15263_v7 = vld [vmem:[%s16203_s7 + $0xf70] sm:$0xff]  }
 0x25f   : > { %v13520_v6 = vpop.f32.mrb[28].mxu1  ;;  %v13499_v9 = vpop.f32.mrb[29].mxu0 }
 0x260   : > { %v13521_v10 = vpop.f32.mrb[29].mxu1  ;;  %v13500_v12 = vadd.f32 %v13499_v9, %v13498_v5  ;;  %v13501_v14 = vpop.f32.mrb[30].mxu0  ;;  %13801 = vmatpush3.bf16.msra.mxu0 %v15228_v8 }
 0x261   : > { %v13522_v13 = vadd.f32 %v13521_v10, %v13520_v6  ;;  %v13523_v15 = vpop.f32.mrb[30].mxu1  ;;  %v13502_v18 = vpop.f32.mrb[31].mxu0  ;;  %13802 = vmatprep.subr.bf16.mxu0 %v15230_v16  ;;  %13823 = vmatpush3.bf16.msra.mxu1 %v15229_v11  ;;  %v15262_v6 = vld [vmem:[%s16203_s7 + $0xfa8] sm:$0xff]   ;;  %v15264_v11 = vld [vmem:[%s16203_s7 + $0xff0] sm:$0xff]   ;;  %v15268_v16 = vld [vmem:[%s16203_s7 + $0xff8] sm:$0xff]  }
 0x262   : > { %v13524_v19 = vpop.f32.mrb[31].mxu1  ;;  %v9952_v20 = vadd.f32 %v13500_v12, %v16729_v33  ;;  %13824 = vmatprep.subr.bf16.mxu1 %v15231_v17  ;;  %v617_v33 = vrot.slane %v603_v29, %v16260_v42  ;;  %v15265_v12 = vld [vmem:[%s16203_s7 + $0xf30] sm:$0xff]   ;;  %v15267_v15 = vld [vmem:[%s16203_s7 + $0xf78] sm:$0xff]  }
 0x263   : > { %v15266_v14 = vld [vmem:[%s16203_s7 + $0xfb0] sm:$0xff]   ;;  %v15269_v17 = vld [vmem:[%s16203_s7 + $0xf38] sm:$0xff]  }
 0x264   : > { %v16766_v23 = vadd.f32 %v13522_v13, %v9952_v20  ;;  %13803 = vmatpush3.bf16.msra.mxu0 %v15232_v21  ;;  %v619_v38 = vcombine.high %v617_v33, %v617_v33  ;;  %v1095_v40 = vpack.c.bf16 %v617_v33, %v617_v33  ;;  %v316_v18 = vld [vmem:[%s16221_s27 + $0x78] sm:$0xff]  ;;  %v15272_v21 = vld [vmem:[%s16203_s7 + $0x1040] sm:$0xff]  }
 0x265   : > { %13804 = vmatprep.subr.bf16.mxu0 %v15234_v24  ;;  %13825 = vmatpush3.bf16.msra.mxu1 %v15233_v22  ;;  %v627_v19 = vrot.slane %v316_v18, %v16260_v42  ;;  %v620_v20 = vcombine.high %v316_v18, %v316_v18  ;;  %v15270_v22 = vld [vmem:[%s16203_s7 + $0xfb8] sm:$0xff]   ;;  %v15307_v18 = vld [vmem:[%s16203_s7 + $0x1100] sm:$0xff]  }
 0x266   : > { %13826 = vmatprep.subr.bf16.mxu1 %v15235_v25  ;;  %v1096_v43 = vpack.c.bf16 %v619_v38, %v619_v38  ;;  %v15273_v25 = vld [vmem:[%s16203_s7 + $0x10c0] sm:$0xff]   ;;  %v15281_v38 = vld [vmem:[%s16203_s7 + $0x10d0] sm:$0xff]  }
 0x267   : > { %v634_v24 = vrot.slane %v620_v20, %v16260_v42 }
 0x268   : > { %13805 = vmatpush3.bf16.msra.mxu0 %v15236_v26  ;;  %10549 = vmatprep.mubr.bf16.mxu1 %v1096_v43  ;;  %v1097_v26 = vpack.c.bf16 %v627_v19, %v627_v19  ;;  %v15285_v43 = vld [vmem:[%s16203_s7 + $0x10d8] sm:$0xff]  }
 0x269   : > { %13834 = vmatprep.subr.bf16.mxu0 %v15239_v30  ;;  %13827 = vmatpush3.bf16.msra.mxu1 %v15237_v31  ;;  %v636_v29 = vcombine.high %v634_v24, %v634_v24  ;;  %v15275_v30 = vld [vmem:[%s16203_s7 + $0x1080] sm:$0xff]   ;;  %v1099_v31 = vpack.c.bf16 %v634_v24, %v634_v24 }
 0x26a   : > { %13856 = vmatprep.subr.bf16.mxu1 %v15240_v34  ;;  %v15277_v34 = vld [vmem:[%s16203_s7 + $0x10c8] sm:$0xff]  }
 0x26b   : > { %10510 = vmatmul.mubr.bf16.vlgmr.msra.gmra.mrb[56].mxu0 %v1093_v35  ;;  %v1100_v33 = vpack.c.bf16 %v636_v29, %v636_v29  ;;  %v15278_v35 = vld [vmem:[%s16203_s7 + $0x1008] sm:$0xff]   ;;  %v15314_v29 = vld [vmem:[%s16203_s7 + $0x11d0] sm:$0xff]  }
 0x26c   : > { %13835 = vmatpush3.bf16.msra.mxu0 %v15241_v36  ;;  %10550 = vmatmul.mubr.bf16.vlgmr.msra.gmra.mrb[56].mxu1 %v1095_v40  ;;  %v15279_v36 = vld [vmem:[%s16203_s7 + $0x1088] sm:$0xff]   ;;  %v15283_v40 = vld [vmem:[%s16203_s7 + $0x1090] sm:$0xff]  }
 0x26d   : > { %13836 = vmatprep.subr.bf16.mxu0 %v15243_v41  ;;  %13857 = vmatpush3.bf16.msra.mxu1 %v15242_v39  ;;  %v15282_v39 = vld [vmem:[%s16203_s7 + $0x1010] sm:$0xff]   ;;  %v15284_v41 = vld [vmem:[%s16203_s7 + $0x1058] sm:$0xff]  }
 0x26e   : > { %13858 = vmatprep.subr.bf16.mxu1 %v15244_v44  ;;  %10629 = vmatprep.mubr.bf16.mxu1 %v1100_v33  ;;  %v15286_v44 = vld [vmem:[%s16203_s7 + $0x1018] sm:$0xff]  }
 0x26f   : > { %v15318_v33 = vld [vmem:[%s16203_s7 + $0x11d8] sm:$0xff]  }
 0x270   : > { %13837 = vmatpush3.bf16.msra.mxu0 %v15245_v45  ;;  %v15287_v45 = vld [vmem:[%s16203_s7 + $0x1098] sm:$0xff]  }
 0x271   : > { %13838 = vmatprep.subr.bf16.mxu0 %v15247_v47  ;;  %13859 = vmatpush3.bf16.msra.mxu1 %v15246_v46  ;;  %v15288_v46 = vld [vmem:[%s16203_s7 + $0x1060] sm:$0xff]  }
 0x272   : > { %13860 = vmatprep.subr.bf16.mxu1 %v15248_v48  ;;  %v15289_v47 = vld [vmem:[%s16203_s7 + $0x10e0] sm:$0xff]  }
 0x273   : > { %v15290_v48 = vld [vmem:[%s16203_s7 + $0x1020] sm:$0xff]  }
 0x274   : > { %13839 = vmatpush3.bf16.msra.mxu0 %v15249_v49  ;;  %v15291_v49 = vld [vmem:[%s16203_s7 + $0x10a0] sm:$0xff]  }
 0x275   : > { %13840 = vmatprep.subr.bf16.mxu0 %v15251_v51  ;;  %13861 = vmatpush3.bf16.msra.mxu1 %v15250_v50  ;;  %v15292_v51 = vld [vmem:[%s16203_s7 + $0x1068] sm:$0xff]  }
 0x276   : > { %13862 = vmatprep.subr.bf16.mxu1 %v15252_v52 }
 0x278   : > { %13841 = vmatpush3.bf16.msra.mxu0 %v15253_v53 }
 0x279   : > { %13842 = vmatprep.subr.bf16.mxu0 %v15255_v55  ;;  %13863 = vmatpush3.bf16.msra.mxu1 %v15254_v54  ;;  %v15293_v54 = vld [vmem:[%s16203_s7 + $0x10e8] sm:$0xff]  }
 0x27a   : > { %13864 = vmatprep.subr.bf16.mxu1 %v15256_v56  ;;  %v15294_v55 = vld [vmem:[%s16203_s7 + $0x1028] sm:$0xff]  }
 0x27c   : > { %13843 = vmatpush3.bf16.msra.mxu0 %v15257_v57 }
 0x27d   : > { %13844 = vmatprep.subr.bf16.mxu0 %v15259_v59  ;;  %13865 = vmatpush3.bf16.msra.mxu1 %v15258_v58 }
 0x27e   : > { %v13542_v60 = vpop.f32.mrb[32].mxu0  ;;  %13866 = vmatprep.subr.bf16.mxu1 %v15260_v62 }
 0x27f   : > { %v13564_v61 = vpop.f32.mrb[32].mxu1  ;;  %v13543_v0 = vpop.f32.mrb[33].mxu0 }
 0x280   : > { %v13565_v1 = vpop.f32.mrb[33].mxu1  ;;  %v13544_v2 = vadd.f32 %v13543_v0, %v13542_v60  ;;  %v13545_v4 = vpop.f32.mrb[34].mxu0  ;;  %13845 = vmatpush3.bf16.msra.mxu0 %v15261_v63  ;;  %v15296_v63 = vld [vmem:[%s16203_s7 + $0x1070] sm:$0xff]  }
 0x281   : > { %v13566_v3 = vadd.f32 %v13565_v1, %v13564_v61  ;;  %v13567_v5 = vpop.f32.mrb[34].mxu1  ;;  %v13546_v8 = vpop.f32.mrb[35].mxu0  ;;  %13846 = vmatprep.subr.bf16.mxu0 %v15263_v7  ;;  %13867 = vmatpush3.bf16.msra.mxu1 %v15262_v6  ;;  %v15295_v61 = vld [vmem:[%s16203_s7 + $0x10a8] sm:$0xff]   ;;  %v15298_v4 = vld [vmem:[%s16203_s7 + $0x1030] sm:$0xff]   ;;  %v15300_v6 = vld [vmem:[%s16203_s7 + $0x1078] sm:$0xff]  }
 0x282   : > { %v13568_v9 = vpop.f32.mrb[35].mxu1  ;;  %v10032_v10 = vadd.f32 %v13544_v2, %v16766_v23  ;;  %13868 = vmatprep.subr.bf16.mxu1 %v15264_v11  ;;  %v635_v23 = vcombine.high %v627_v19, %v627_v19  ;;  %v15297_v2 = vld [vmem:[%s16203_s7 + $0x10f0] sm:$0xff]   ;;  %v15301_v7 = vld [vmem:[%s16203_s7 + $0x10f8] sm:$0xff]  }
 0x283   : > { %v15299_v5 = vld [vmem:[%s16203_s7 + $0x10b0] sm:$0xff]   ;;  %v15302_v8 = vld [vmem:[%s16203_s7 + $0x1038] sm:$0xff]  }
 0x284   : > { %v16803_v13 = vadd.f32 %v13566_v3, %v10032_v10  ;;  %13847 = vmatpush3.bf16.msra.mxu0 %v15265_v12  ;;  %v1098_v28 = vpack.c.bf16 %v635_v23, %v635_v23  ;;  %v317_v9 = vld [vmem:[%s16221_s27 + $0x80] sm:$0xff]  ;;  %v15309_v23 = vld [vmem:[%s16203_s7 + $0x1148] sm:$0xff]  }
 0x285   : > { %13848 = vmatprep.subr.bf16.mxu0 %v15267_v15  ;;  %13869 = vmatpush3.bf16.msra.mxu1 %v15266_v14  ;;  %v15303_v10 = vld [vmem:[%s16203_s7 + $0x10b8] sm:$0xff]   ;;  %v644_v11 = vrot.slane %v317_v9, %v16260_v42  ;;  %v637_v12 = vcombine.high %v317_v9, %v317_v9 }
 0x286   : > { %13870 = vmatprep.subr.bf16.mxu1 %v15268_v16  ;;  %10589 = vmatprep.mubr.bf16.mxu0 %v1098_v28  ;;  %v15306_v16 = vld [vmem:[%s16203_s7 + $0x11c0] sm:$0xff]   ;;  %v15313_v28 = vld [vmem:[%s16203_s7 + $0x1150] sm:$0xff]  }
 0x287   : > { %v652_v14 = vcombine.high %v644_v11, %v644_v11  ;;  %v651_v15 = vrot.slane %v637_v12, %v16260_v42 }
 0x288   : > { %13849 = vmatpush3.bf16.msra.mxu0 %v15269_v17  ;;  %v1101_v17 = vpack.c.bf16 %v644_v11, %v644_v11  ;;  %v15340_v11 = vld [vmem:[%s16203_s7 + $0x1200] sm:$0xff]  }
 0x289   : > { %13878 = vmatprep.subr.bf16.mxu0 %v15272_v21  ;;  %13871 = vmatpush3.bf16.msra.mxu1 %v15270_v22  ;;  %v1102_v19 = vpack.c.bf16 %v652_v14, %v652_v14  ;;  %v653_v20 = vcombine.high %v651_v15, %v651_v15  ;;  %v15308_v21 = vld [vmem:[%s16203_s7 + $0x1180] sm:$0xff]   ;;  %v1103_v22 = vpack.c.bf16 %v651_v15, %v651_v15 }
 0x28a   : > { %13900 = vmatprep.subr.bf16.mxu1 %v15273_v25  ;;  %v15310_v25 = vld [vmem:[%s16203_s7 + $0x11c8] sm:$0xff]   ;;  %v15341_v15 = vld [vmem:[%s16203_s7 + $0x1280] sm:$0xff]  }
 0x28b   : > { %10590 = vmatmul.mubr.bf16.vlgmr.msra.gmra.mrb[60].mxu0 %v1097_v26  ;;  %v1104_v24 = vpack.c.bf16 %v653_v20, %v653_v20  ;;  %v15311_v26 = vld [vmem:[%s16203_s7 + $0x1108] sm:$0xff]   ;;  %v15347_v20 = vld [vmem:[%s16203_s7 + $0x12d0] sm:$0xff]  }
 0x28c   : > { %13879 = vmatpush3.bf16.msra.mxu0 %v15274_v27  ;;  %10630 = vmatmul.mubr.bf16.vlgmr.msra.gmra.mrb[60].mxu1 %v1099_v31  ;;  %v15312_v27 = vld [vmem:[%s16203_s7 + $0x1188] sm:$0xff]   ;;  %v15316_v31 = vld [vmem:[%s16203_s7 + $0x1190] sm:$0xff]  }
 0x28d   : > { %13880 = vmatprep.subr.bf16.mxu0 %v15276_v32  ;;  %13901 = vmatpush3.bf16.msra.mxu1 %v15275_v30  ;;  %v15315_v30 = vld [vmem:[%s16203_s7 + $0x1110] sm:$0xff]   ;;  %v15317_v32 = vld [vmem:[%s16203_s7 + $0x1158] sm:$0xff]  }
 0x28e   : > { %13902 = vmatprep.subr.bf16.mxu1 %v15277_v34  ;;  %10669 = vmatprep.mubr.bf16.mxu0 %v1102_v19  ;;  %v15319_v34 = vld [vmem:[%s16203_s7 + $0x1118] sm:$0xff]   ;;  %v15345_v19 = vld [vmem:[%s16203_s7 + $0x1288] sm:$0xff]  }
 0x28f   : > { %10709 = vmatprep.mubr.bf16.mxu1 %v1104_v24  ;;  %v15351_v24 = vld [vmem:[%s16203_s7 + $0x12d8] sm:$0xff]  }
 0x290   : > { %13881 = vmatpush3.bf16.msra.mxu0 %v15278_v35  ;;  %v15320_v35 = vld [vmem:[%s16203_s7 + $0x1198] sm:$0xff]  }
 0x291   : > { %13882 = vmatprep.subr.bf16.mxu0 %v15280_v37  ;;  %13903 = vmatpush3.bf16.msra.mxu1 %v15279_v36  ;;  %v15321_v36 = vld [vmem:[%s16203_s7 + $0x1160] sm:$0xff]  }
 0x292   : > { %13904 = vmatprep.subr.bf16.mxu1 %v15281_v38  ;;  %v15322_v37 = vld [vmem:[%s16203_s7 + $0x11e0] sm:$0xff]  }
 0x293   : > { %v15323_v38 = vld [vmem:[%s16203_s7 + $0x1120] sm:$0xff]  }
 0x294   : > { %13883 = vmatpush3.bf16.msra.mxu0 %v15282_v39  ;;  %v15324_v39 = vld [vmem:[%s16203_s7 + $0x11a0] sm:$0xff]  }
 0x295   : > { %13884 = vmatprep.subr.bf16.mxu0 %v15284_v41  ;;  %13905 = vmatpush3.bf16.msra.mxu1 %v15283_v40  ;;  %v15325_v41 = vld [vmem:[%s16203_s7 + $0x1168] sm:$0xff]  }
 0x296   : > { %13906 = vmatprep.subr.bf16.mxu1 %v15285_v43 }
 0x298   : > { %13885 = vmatpush3.bf16.msra.mxu0 %v15286_v44  ;;  %v15326_v44 = vld [vmem:[%s16203_s7 + $0x11e8] sm:$0xff]  }
 0x299   : > { %13886 = vmatprep.subr.bf16.mxu0 %v15288_v46  ;;  %13907 = vmatpush3.bf16.msra.mxu1 %v15287_v45 }
 0x29a   : > { %13908 = vmatprep.subr.bf16.mxu1 %v15289_v47 }
 0x29c   : > { %13887 = vmatpush3.bf16.msra.mxu0 %v15290_v48 }
 0x29d   : > { %13888 = vmatprep.subr.bf16.mxu0 %v15292_v51  ;;  %13909 = vmatpush3.bf16.msra.mxu1 %v15291_v49  ;;  %v15327_v49 = vld [vmem:[%s16203_s7 + $0x1128] sm:$0xff]  }
 0x29e   : > { %v13586_v50 = vpop.f32.mrb[36].mxu0  ;;  %13910 = vmatprep.subr.bf16.mxu1 %v15293_v54 }
 0x29f   : > { %v13608_v52 = vpop.f32.mrb[36].mxu1  ;;  %v13587_v53 = vpop.f32.mrb[37].mxu0 }
 0x2a0   : > { %v13588_v56 = vadd.f32 %v13587_v53, %v13586_v50  ;;  %v13609_v57 = vpop.f32.mrb[37].mxu1  ;;  %v13589_v58 = vpop.f32.mrb[38].mxu0  ;;  %13889 = vmatpush3.bf16.msra.mxu0 %v15294_v55  ;;  %v15328_v50 = vld [vmem:[%s16203_s7 + $0x11a8] sm:$0xff]   ;;  %v15329_v55 = vld [vmem:[%s16203_s7 + $0x1170] sm:$0xff]  }
 0x2a1   : > { %v13610_v59 = vadd.f32 %v13609_v57, %v13608_v52  ;;  %v13611_v60 = vpop.f32.mrb[38].mxu1  ;;  %v13590_v62 = vpop.f32.mrb[39].mxu0  ;;  %13890 = vmatprep.subr.bf16.mxu0 %v15296_v63  ;;  %13911 = vmatpush3.bf16.msra.mxu1 %v15295_v61  ;;  %v15330_v57 = vld [vmem:[%s16203_s7 + $0x11f0] sm:$0xff]   ;;  %v15335_v63 = vld [vmem:[%s16203_s7 + $0x1138] sm:$0xff]  }
 0x2a2   : > { %v10112_v0 = vadd.f32 %v13588_v56, %v16803_v13  ;;  %v13612_v1 = vpop.f32.mrb[39].mxu1  ;;  %13912 = vmatprep.subr.bf16.mxu1 %v15297_v2  ;;  %v15305_v13 = vld [vmem:[%s16203_s7 + $0x1140] sm:$0xff]   ;;  %v15333_v60 = vld [vmem:[%s16203_s7 + $0x1178] sm:$0xff]   ;;  %v15332_v61 = vld [vmem:[%s16203_s7 + $0x11b0] sm:$0xff]  }
 0x2a3   : > { %v15334_v62 = vld [vmem:[%s16203_s7 + $0x11f8] sm:$0xff]  }
 0x2a4   : > { %v16840_v3 = vadd.f32 %v13610_v59, %v10112_v0  ;;  %13891 = vmatpush3.bf16.msra.mxu0 %v15298_v4  ;;  %v15331_v59 = vld [vmem:[%s16203_s7 + $0x1130] sm:$0xff]   ;;  %v318_v0 = vld [vmem:[%s16221_s27 + $0x88] sm:$0xff]  ;;  %v15336_v4 = vld [vmem:[%s16203_s7 + $0x11b8] sm:$0xff]  }
 0x2a5   : > { %13892 = vmatprep.subr.bf16.mxu0 %v15300_v6  ;;  %13913 = vmatpush3.bf16.msra.mxu1 %v15299_v5  ;;  %v661_v1 = vrot.slane %v318_v0, %v16260_v42  ;;  %v654_v2 = vcombine.high %v318_v0, %v318_v0 }
 0x2a6   : > { %13914 = vmatprep.subr.bf16.mxu1 %v15301_v7  ;;  %v15339_v7 = vld [vmem:[%s16203_s7 + $0x12c0] sm:$0xff]  }
 0x2a7   : > { %v669_v5 = vcombine.high %v661_v1, %v661_v1  ;;  %v668_v6 = vrot.slane %v654_v2, %v16260_v42  ;;  %v15373_v2 = vld [vmem:[%s16203_s7 + $0x1300] sm:$0xff]  }
 0x2a8   : > { %13893 = vmatpush3.bf16.msra.mxu0 %v15302_v8  ;;  %v1105_v8 = vpack.c.bf16 %v661_v1, %v661_v1 }
 0x2a9   : > { %13922 = vmatprep.subr.bf16.mxu0 %v15305_v13  ;;  %13915 = vmatpush3.bf16.msra.mxu1 %v15303_v10  ;;  %v1106_v9 = vpack.c.bf16 %v669_v5, %v669_v5  ;;  %v670_v10 = vcombine.high %v668_v6, %v668_v6  ;;  %v1107_v12 = vpack.c.bf16 %v668_v6, %v668_v6  ;;  %v15342_v13 = vld [vmem:[%s16203_s7 + $0x1248] sm:$0xff]   ;;  %v15374_v6 = vld [vmem:[%s16203_s7 + $0x1380] sm:$0xff]  }
 0x2aa   : > { %13944 = vmatprep.subr.bf16.mxu1 %v15306_v16  ;;  %v15343_v16 = vld [vmem:[%s16203_s7 + $0x12c8] sm:$0xff]  }
 0x2ab   : > { %10670 = vmatmul.mubr.bf16.vlgmr.msra.gmra.mrb[64].mxu0 %v1101_v17  ;;  %v1108_v14 = vpack.c.bf16 %v670_v10, %v670_v10  ;;  %v15344_v17 = vld [vmem:[%s16203_s7 + $0x1208] sm:$0xff]  }
 0x2ac   : > { %13923 = vmatpush3.bf16.msra.mxu0 %v15307_v18  ;;  %10710 = vmatmul.mubr.bf16.vlgmr.msra.gmra.mrb[64].mxu1 %v1103_v22  ;;  %v15346_v18 = vld [vmem:[%s16203_s7 + $0x1250] sm:$0xff]   ;;  %v15350_v22 = vld [vmem:[%s16203_s7 + $0x1258] sm:$0xff]   ;;  %v15378_v10 = vld [vmem:[%s16203_s7 + $0x1388] sm:$0xff]  }
 0x2ad   : > { %13924 = vmatprep.subr.bf16.mxu0 %v15309_v23  ;;  %13945 = vmatpush3.bf16.msra.mxu1 %v15308_v21  ;;  %v15348_v21 = vld [vmem:[%s16203_s7 + $0x1210] sm:$0xff]  }
 0x2ae   : > { %13946 = vmatprep.subr.bf16.mxu1 %v15310_v25  ;;  %10749 = vmatprep.mubr.bf16.mxu0 %v1106_v9  ;;  %v15349_v23 = vld [vmem:[%s16203_s7 + $0x1290] sm:$0xff]   ;;  %v15352_v25 = vld [vmem:[%s16203_s7 + $0x1218] sm:$0xff]  }
 0x2af   : > { %10789 = vmatprep.mubr.bf16.mxu1 %v1108_v14  ;;  %v15379_v9 = vld [vmem:[%s16203_s7 + $0x1350] sm:$0xff]  }
 0x2b0   : > { %13925 = vmatpush3.bf16.msra.mxu0 %v15311_v26  ;;  %v15354_v26 = vld [vmem:[%s16203_s7 + $0x1260] sm:$0xff]   ;;  %v15382_v14 = vld [vmem:[%s16203_s7 + $0x1390] sm:$0xff]  }
 0x2b1   : > { %13926 = vmatprep.subr.bf16.mxu0 %v15313_v28  ;;  %13947 = vmatpush3.bf16.msra.mxu1 %v15312_v27  ;;  %v15353_v27 = vld [vmem:[%s16203_s7 + $0x1298] sm:$0xff]   ;;  %v15355_v28 = vld [vmem:[%s16203_s7 + $0x12e0] sm:$0xff]  }
 0x2b2   : > { %13948 = vmatprep.subr.bf16.mxu1 %v15314_v29  ;;  %v15356_v29 = vld [vmem:[%s16203_s7 + $0x1220] sm:$0xff]  }
 0x2b4   : > { %13927 = vmatpush3.bf16.msra.mxu0 %v15315_v30 }
 0x2b5   : > { %13928 = vmatprep.subr.bf16.mxu0 %v15317_v32  ;;  %13949 = vmatpush3.bf16.msra.mxu1 %v15316_v31  ;;  %v15358_v31 = vld [vmem:[%s16203_s7 + $0x1268] sm:$0xff]   ;;  %v15357_v32 = vld [vmem:[%s16203_s7 + $0x12a0] sm:$0xff]  }
 0x2b6   : > { %13950 = vmatprep.subr.bf16.mxu1 %v15318_v33 }
 0x2b8   : > { %13929 = vmatpush3.bf16.msra.mxu0 %v15319_v34 }
 0x2b9   : > { %13930 = vmatprep.subr.bf16.mxu0 %v15321_v36  ;;  %13951 = vmatpush3.bf16.msra.mxu1 %v15320_v35  ;;  %v15359_v36 = vld [vmem:[%s16203_s7 + $0x12e8] sm:$0xff]  }
 0x2ba   : > { %13952 = vmatprep.subr.bf16.mxu1 %v15322_v37 }
 0x2bc   : > { %13931 = vmatpush3.bf16.msra.mxu0 %v15323_v38  ;;  %v15360_v38 = vld [vmem:[%s16203_s7 + $0x1228] sm:$0xff]  }
 0x2bd   : > { %13932 = vmatprep.subr.bf16.mxu0 %v15325_v41  ;;  %13953 = vmatpush3.bf16.msra.mxu1 %v15324_v39 }
 0x2be   : > { %v13630_v40 = vpop.f32.mrb[40].mxu0  ;;  %13954 = vmatprep.subr.bf16.mxu1 %v15326_v44 }
 0x2bf   : > { %v13631_v43 = vpop.f32.mrb[41].mxu0  ;;  %v13652_v45 = vpop.f32.mrb[40].mxu1 }
 0x2c0   : > { %v13632_v46 = vadd.f32 %v13631_v43, %v13630_v40  ;;  %v13633_v47 = vpop.f32.mrb[42].mxu0  ;;  %v13653_v48 = vpop.f32.mrb[41].mxu1  ;;  %13933 = vmatpush3.bf16.msra.mxu0 %v15327_v49  ;;  %v15361_v40 = vld [vmem:[%s16203_s7 + $0x12a8] sm:$0xff]  }
 0x2c1   : > { %v13634_v51 = vpop.f32.mrb[43].mxu0  ;;  %v13654_v53 = vadd.f32 %v13653_v48, %v13652_v45  ;;  %v13655_v54 = vpop.f32.mrb[42].mxu1  ;;  %13934 = vmatprep.subr.bf16.mxu0 %v15329_v55  ;;  %13955 = vmatpush3.bf16.msra.mxu1 %v15328_v50  ;;  %v15363_v48 = vld [vmem:[%s16203_s7 + $0x12f0] sm:$0xff]  }
 0x2c2   : > { %v10192_v52 = vadd.f32 %v13632_v46, %v16840_v3  ;;  %v13656_v56 = vpop.f32.mrb[43].mxu1  ;;  %13956 = vmatprep.subr.bf16.mxu1 %v15330_v57  ;;  %v15338_v3 = vld [vmem:[%s16203_s7 + $0x1240] sm:$0xff]   ;;  %v15362_v46 = vld [vmem:[%s16203_s7 + $0x1270] sm:$0xff]   ;;  %v15368_v54 = vld [vmem:[%s16203_s7 + $0x1238] sm:$0xff]  }
 0x2c3   : > { %v15364_v50 = vld [vmem:[%s16203_s7 + $0x1230] sm:$0xff]  }
 0x2c4   : > { %v16878_v58 = vadd.f32 %v13654_v53, %v10192_v52  ;;  %13935 = vmatpush3.bf16.msra.mxu0 %v15331_v59  ;;  %v15365_v51 = vld [vmem:[%s16203_s7 + $0x12b0] sm:$0xff]   ;;  %v15366_v52 = vld [vmem:[%s16203_s7 + $0x1278] sm:$0xff]  }
 0x2c5   : > { %13936 = vmatprep.subr.bf16.mxu0 %v15333_v60  ;;  %13957 = vmatpush3.bf16.msra.mxu1 %v15332_v61  ;;  %v15367_v53 = vld [vmem:[%s16203_s7 + $0x12f8] sm:$0xff]   ;;  %v319_v55 = vld [vmem:[%s16221_s27 + $0x90] sm:$0xff] }
 0x2c6   : > { %13958 = vmatprep.subr.bf16.mxu1 %v15334_v62  ;;  %v678_v56 = vrot.slane %v319_v55, %v16260_v42  ;;  %v671_v57 = vcombine.high %v319_v55, %v319_v55  ;;  %v15369_v59 = vld [vmem:[%s16203_s7 + $0x12b8] sm:$0xff]   ;;  %v15372_v62 = vld [vmem:[%s16203_s7 + $0x13c0] sm:$0xff]  }
 0x2c7   : > { %v15406_v55 = vld [vmem:[%s16203_s7 + $0x1400] sm:$0xff]  }
 0x2c8   : > { %13937 = vmatpush3.bf16.msra.mxu0 %v15335_v63  ;;  %v686_v60 = vcombine.high %v678_v56, %v678_v56  ;;  %v685_v61 = vrot.slane %v671_v57, %v16260_v42  ;;  %v1109_v63 = vpack.c.bf16 %v678_v56, %v678_v56 }
 0x2c9   : > { %13966 = vmatprep.subr.bf16.mxu0 %v15338_v3  ;;  %13959 = vmatpush3.bf16.msra.mxu1 %v15336_v4  ;;  %v15375_v4 = vld [vmem:[%s16203_s7 + $0x1348] sm:$0xff]  }
 0x2ca   : > { %13988 = vmatprep.subr.bf16.mxu1 %v15339_v7  ;;  %v1110_v0 = vpack.c.bf16 %v686_v60, %v686_v60  ;;  %v687_v1 = vcombine.high %v685_v61, %v685_v61  ;;  %v1111_v3 = vpack.c.bf16 %v685_v61, %v685_v61  ;;  %v15376_v7 = vld [vmem:[%s16203_s7 + $0x13c8] sm:$0xff]  }
 0x2cb   : > { %10750 = vmatmul.mubr.bf16.vlgmr.msra.gmra.mrb[68].mxu0 %v1105_v8  ;;  %v15377_v8 = vld [vmem:[%s16203_s7 + $0x1308] sm:$0xff]  }
 0x2cc   : > { %13967 = vmatpush3.bf16.msra.mxu0 %v15340_v11  ;;  %10790 = vmatmul.mubr.bf16.vlgmr.msra.gmra.mrb[68].mxu1 %v1107_v12  ;;  %v1112_v5 = vpack.c.bf16 %v687_v1, %v687_v1  ;;  %v15380_v11 = vld [vmem:[%s16203_s7 + $0x13d0] sm:$0xff]   ;;  %v15408_v60 = vld [vmem:[%s16203_s7 + $0x1448] sm:$0xff]  }
 0x2cd   : > { %13968 = vmatprep.subr.bf16.mxu0 %v15342_v13  ;;  %13989 = vmatpush3.bf16.msra.mxu1 %v15341_v15  ;;  %v15381_v12 = vld [vmem:[%s16203_s7 + $0x1310] sm:$0xff]   ;;  %v15383_v13 = vld [vmem:[%s16203_s7 + $0x1358] sm:$0xff]  }
 0x2ce   : > { %13990 = vmatprep.subr.bf16.mxu1 %v15343_v16  ;;  %10829 = vmatprep.mubr.bf16.mxu0 %v1110_v0  ;;  %v15384_v15 = vld [vmem:[%s16203_s7 + $0x13d8] sm:$0xff]   ;;  %v15411_v0 = vld [vmem:[%s16203_s7 + $0x1488] sm:$0xff]   ;;  %v15412_v1 = vld [vmem:[%s16203_s7 + $0x1450] sm:$0xff]  }
 0x2cf   : > { %10869 = vmatprep.mubr.bf16.mxu1 %v1112_v5  ;;  %v15385_v16 = vld [vmem:[%s16203_s7 + $0x1318] sm:$0xff]  }
 0x2d0   : > { %13969 = vmatpush3.bf16.msra.mxu0 %v15344_v17  ;;  %v15387_v17 = vld [vmem:[%s16203_s7 + $0x1360] sm:$0xff]   ;;  %v15416_v5 = vld [vmem:[%s16203_s7 + $0x1458] sm:$0xff]  }
 0x2d1   : > { %13970 = vmatprep.subr.bf16.mxu0 %v15346_v18  ;;  %13991 = vmatpush3.bf16.msra.mxu1 %v15345_v19  ;;  %v15386_v18 = vld [vmem:[%s16203_s7 + $0x1398] sm:$0xff]   ;;  %v15388_v19 = vld [vmem:[%s16203_s7 + $0x13e0] sm:$0xff]  }
 0x2d2   : > { %13992 = vmatprep.subr.bf16.mxu1 %v15347_v20  ;;  %v15389_v20 = vld [vmem:[%s16203_s7 + $0x1320] sm:$0xff]  }
 0x2d4   : > { %13971 = vmatpush3.bf16.msra.mxu0 %v15348_v21 }
 0x2d5   : > { %13972 = vmatprep.subr.bf16.mxu0 %v15350_v22  ;;  %13993 = vmatpush3.bf16.msra.mxu1 %v15349_v23  ;;  %v15391_v22 = vld [vmem:[%s16203_s7 + $0x1368] sm:$0xff]   ;;  %v15390_v23 = vld [vmem:[%s16203_s7 + $0x13a0] sm:$0xff]  }
 0x2d6   : > { %13994 = vmatprep.subr.bf16.mxu1 %v15351_v24 }
 0x2d8   : > { %13973 = vmatpush3.bf16.msra.mxu0 %v15352_v25 }
 0x2d9   : > { %13974 = vmatprep.subr.bf16.mxu0 %v15354_v26  ;;  %13995 = vmatpush3.bf16.msra.mxu1 %v15353_v27  ;;  %v15392_v27 = vld [vmem:[%s16203_s7 + $0x13e8] sm:$0xff]  }
 0x2da   : > { %13996 = vmatprep.subr.bf16.mxu1 %v15355_v28 }
 0x2dc   : > { %13975 = vmatpush3.bf16.msra.mxu0 %v15356_v29  ;;  %v15393_v29 = vld [vmem:[%s16203_s7 + $0x1328] sm:$0xff]  }
 0x2dd   : > { %13976 = vmatprep.subr.bf16.mxu0 %v15358_v31  ;;  %13997 = vmatpush3.bf16.msra.mxu1 %v15357_v32  ;;  %v15394_v31 = vld [vmem:[%s16203_s7 + $0x13a8] sm:$0xff]  }
 0x2de   : > { %v13674_v30 = vpop.f32.mrb[44].mxu0  ;;  %13998 = vmatprep.subr.bf16.mxu1 %v15359_v36  ;;  %v15395_v36 = vld [vmem:[%s16203_s7 + $0x1370] sm:$0xff]  }
 0x2df   : > { %v13675_v33 = vpop.f32.mrb[45].mxu0  ;;  %v13696_v34 = vpop.f32.mrb[44].mxu1 }
 0x2e0   : > { %v13676_v35 = vadd.f32 %v13675_v33, %v13674_v30  ;;  %v13677_v37 = vpop.f32.mrb[46].mxu0  ;;  %v13697_v39 = vpop.f32.mrb[45].mxu1  ;;  %13977 = vmatpush3.bf16.msra.mxu0 %v15360_v38  ;;  %v15396_v38 = vld [vmem:[%s16203_s7 + $0x13f0] sm:$0xff]  }
 0x2e1   : > { %v13678_v41 = vpop.f32.mrb[47].mxu0  ;;  %v13698_v44 = vadd.f32 %v13697_v39, %v13696_v34  ;;  %v13699_v45 = vpop.f32.mrb[46].mxu1  ;;  %13978 = vmatprep.subr.bf16.mxu0 %v15362_v46  ;;  %13999 = vmatpush3.bf16.msra.mxu1 %v15361_v40  ;;  %v15397_v40 = vld [vmem:[%s16203_s7 + $0x1330] sm:$0xff]  }
 0x2e2   : > { %v10272_v43 = vadd.f32 %v13676_v35, %v16878_v58  ;;  %v13700_v47 = vpop.f32.mrb[47].mxu1  ;;  %14000 = vmatprep.subr.bf16.mxu1 %v15363_v48  ;;  %v15371_v58 = vld [vmem:[%s16203_s7 + $0x1340] sm:$0xff]   ;;  %v15398_v41 = vld [vmem:[%s16203_s7 + $0x13b0] sm:$0xff]   ;;  %v15401_v45 = vld [vmem:[%s16203_s7 + $0x1338] sm:$0xff]  }
 0x2e3   : > { %v320_v46 = vld [vmem:[%s16221_s27 + $0x98] sm:$0xff] }
 0x2e4   : > { %v16916_v49 = vadd.f32 %v13698_v44, %v10272_v43  ;;  %13979 = vmatpush3.bf16.msra.mxu0 %v15364_v50  ;;  %v15399_v43 = vld [vmem:[%s16203_s7 + $0x1378] sm:$0xff]   ;;  %v695_v48 = vrot.slane %v320_v46, %v16260_v42  ;;  %v15404_v50 = vld [vmem:[%s16203_s7 + $0x1440] sm:$0xff]  }
 0x2e5   : > { %13980 = vmatprep.subr.bf16.mxu0 %v15366_v52  ;;  %14001 = vmatpush3.bf16.msra.mxu1 %v15365_v51  ;;  %v15400_v44 = vld [vmem:[%s16203_s7 + $0x13f8] sm:$0xff]  }
 0x2e6   : > { %14002 = vmatprep.subr.bf16.mxu1 %v15367_v53  ;;  %v15402_v47 = vld [vmem:[%s16203_s7 + $0x13b8] sm:$0xff]   ;;  %v703_v51 = vcombine.high %v695_v48, %v695_v48  ;;  %v15405_v53 = vld [vmem:[%s16203_s7 + $0x14c0] sm:$0xff]  }
 0x2e8   : > { %13981 = vmatpush3.bf16.msra.mxu0 %v15368_v54  ;;  %v1113_v54 = vpack.c.bf16 %v695_v48, %v695_v48  ;;  %v1114_v56 = vpack.c.bf16 %v703_v51, %v703_v51  ;;  %v15441_v51 = vld [vmem:[%s16203_s7 + $0x1548] sm:$0xff]  }
 0x2e9   : > { %14010 = vmatprep.subr.bf16.mxu0 %v15371_v58  ;;  %14003 = vmatpush3.bf16.msra.mxu1 %v15369_v59  ;;  %v15407_v58 = vld [vmem:[%s16203_s7 + $0x1480] sm:$0xff]  }
 0x2ea   : > { %14032 = vmatprep.subr.bf16.mxu1 %v15372_v62  ;;  %v15409_v62 = vld [vmem:[%s16203_s7 + $0x14c8] sm:$0xff]  }
 0x2eb   : > { %10830 = vmatmul.mubr.bf16.vlgmr.msra.gmra.mrb[72].mxu0 %v1109_v63  ;;  %v15410_v63 = vld [vmem:[%s16203_s7 + $0x1408] sm:$0xff]  }
 0x2ec   : > { %14011 = vmatpush3.bf16.msra.mxu0 %v15373_v2  ;;  %10870 = vmatmul.mubr.bf16.vlgmr.msra.gmra.mrb[72].mxu1 %v1111_v3  ;;  %v15413_v2 = vld [vmem:[%s16203_s7 + $0x14d0] sm:$0xff]  }
 0x2ed   : > { %14012 = vmatprep.subr.bf16.mxu0 %v15375_v4  ;;  %14033 = vmatpush3.bf16.msra.mxu1 %v15374_v6  ;;  %v15414_v3 = vld [vmem:[%s16203_s7 + $0x1410] sm:$0xff]   ;;  %v15417_v6 = vld [vmem:[%s16203_s7 + $0x14d8] sm:$0xff]  }
 0x2ee   : > { %14034 = vmatprep.subr.bf16.mxu1 %v15376_v7  ;;  %10909 = vmatprep.mubr.bf16.mxu0 %v1114_v56  ;;  %v15415_v4 = vld [vmem:[%s16203_s7 + $0x1490] sm:$0xff]   ;;  %v15418_v7 = vld [vmem:[%s16203_s7 + $0x1418] sm:$0xff]  }
 0x2ef   : > { %v15445_v56 = vld [vmem:[%s16203_s7 + $0x1550] sm:$0xff]  }
 0x2f0   : > { %14013 = vmatpush3.bf16.msra.mxu0 %v15377_v8  ;;  %v15419_v8 = vld [vmem:[%s16203_s7 + $0x1498] sm:$0xff]  }
 0x2f1   : > { %14014 = vmatprep.subr.bf16.mxu0 %v15379_v9  ;;  %14035 = vmatpush3.bf16.msra.mxu1 %v15378_v10  ;;  %v15420_v9 = vld [vmem:[%s16203_s7 + $0x1460] sm:$0xff]  }
 0x2f2   : > { %14036 = vmatprep.subr.bf16.mxu1 %v15380_v11  ;;  %v15421_v10 = vld [vmem:[%s16203_s7 + $0x14e0] sm:$0xff]  }
 0x2f3   : > { %v15422_v11 = vld [vmem:[%s16203_s7 + $0x1420] sm:$0xff]  }
 0x2f4   : > { %14015 = vmatpush3.bf16.msra.mxu0 %v15381_v12  ;;  %v15423_v12 = vld [vmem:[%s16203_s7 + $0x14a0] sm:$0xff]  }
 0x2f5   : > { %14016 = vmatprep.subr.bf16.mxu0 %v15383_v13  ;;  %14037 = vmatpush3.bf16.msra.mxu1 %v15382_v14  ;;  %v15424_v13 = vld [vmem:[%s16203_s7 + $0x1468] sm:$0xff]  }
 0x2f6   : > { %14038 = vmatprep.subr.bf16.mxu1 %v15384_v15  ;;  %v15425_v15 = vld [vmem:[%s16203_s7 + $0x14e8] sm:$0xff]  }
 0x2f8   : > { %14017 = vmatpush3.bf16.msra.mxu0 %v15385_v16 }
 0x2f9   : > { %14018 = vmatprep.subr.bf16.mxu0 %v15387_v17  ;;  %14039 = vmatpush3.bf16.msra.mxu1 %v15386_v18  ;;  %v15426_v17 = vld [vmem:[%s16203_s7 + $0x1428] sm:$0xff]  }
 0x2fa   : > { %14040 = vmatprep.subr.bf16.mxu1 %v15388_v19 }
 0x2fc   : > { %14019 = vmatpush3.bf16.msra.mxu0 %v15389_v20 }
 0x2fd   : > { %14020 = vmatprep.subr.bf16.mxu0 %v15391_v22  ;;  %14041 = vmatpush3.bf16.msra.mxu1 %v15390_v23  ;;  %v15427_v22 = vld [vmem:[%s16203_s7 + $0x14a8] sm:$0xff]  }
 0x2fe   : > { %v13718_v21 = vpop.f32.mrb[48].mxu0  ;;  %14042 = vmatprep.subr.bf16.mxu1 %v15392_v27 }
 0x2ff   : > { %v13719_v24 = vpop.f32.mrb[49].mxu0  ;;  %v13740_v25 = vpop.f32.mrb[48].mxu1 }
 0x300   : > { %v13720_v26 = vadd.f32 %v13719_v24, %v13718_v21  ;;  %v13721_v28 = vpop.f32.mrb[50].mxu0  ;;  %v13741_v30 = vpop.f32.mrb[49].mxu1  ;;  %14021 = vmatpush3.bf16.msra.mxu0 %v15393_v29  ;;  %v15428_v24 = vld [vmem:[%s16203_s7 + $0x1470] sm:$0xff]  }
 0x301   : > { %v13722_v32 = vpop.f32.mrb[51].mxu0  ;;  %v13742_v34 = vadd.f32 %v13741_v30, %v13740_v25  ;;  %v13743_v35 = vpop.f32.mrb[50].mxu1  ;;  %14022 = vmatprep.subr.bf16.mxu0 %v15395_v36  ;;  %14043 = vmatpush3.bf16.msra.mxu1 %v15394_v31  ;;  %v15429_v28 = vld [vmem:[%s16203_s7 + $0x14f0] sm:$0xff]   ;;  %v321_v36 = vld [vmem:[%s16221_s27 + $0xa0] sm:$0xff] }
 0x302   : > { %v10352_v33 = vadd.f32 %v13720_v26, %v16916_v49  ;;  %v13744_v37 = vpop.f32.mrb[51].mxu1  ;;  %14044 = vmatprep.subr.bf16.mxu1 %v15396_v38  ;;  %v688_v49 = vcombine.high %v320_v46, %v320_v46  ;;  %v15430_v30 = vld [vmem:[%s16203_s7 + $0x1430] sm:$0xff]   ;;  %v15432_v32 = vld [vmem:[%s16203_s7 + $0x1478] sm:$0xff]   ;;  %v705_v38 = vcombine.high %v321_v36, %v321_v36  ;;  %v15439_v46 = vld [vmem:[%s16203_s7 + $0x1500] sm:$0xff]  }
 0x303   : > { %v15434_v35 = vld [vmem:[%s16203_s7 + $0x1438] sm:$0xff]   ;;  %v712_v37 = vrot.slane %v321_v36, %v16260_v42  ;;  %v15472_v36 = vld [vmem:[%s16203_s7 + $0x1600] sm:$0xff]  }
 0x304   : > { %v16954_v39 = vadd.f32 %v13742_v34, %v10352_v33  ;;  %14023 = vmatpush3.bf16.msra.mxu0 %v15397_v40  ;;  %v702_v52 = vrot.slane %v688_v49, %v16260_v42  ;;  %v15431_v33 = vld [vmem:[%s16203_s7 + $0x14b0] sm:$0xff]   ;;  %v15433_v34 = vld [vmem:[%s16203_s7 + $0x14f8] sm:$0xff]   ;;  %v15440_v49 = vld [vmem:[%s16203_s7 + $0x1580] sm:$0xff]  }
 0x305   : > { %14024 = vmatprep.subr.bf16.mxu0 %v15399_v43  ;;  %14045 = vmatpush3.bf16.msra.mxu1 %v15398_v41  ;;  %v15435_v40 = vld [vmem:[%s16203_s7 + $0x14b8] sm:$0xff]   ;;  %v720_v41 = vcombine.high %v712_v37, %v712_v37  ;;  %v719_v43 = vrot.slane %v705_v38, %v16260_v42 }
 0x306   : > { %14046 = vmatprep.subr.bf16.mxu1 %v15400_v44  ;;  %v704_v57 = vcombine.high %v702_v52, %v702_v52  ;;  %v1115_v59 = vpack.c.bf16 %v702_v52, %v702_v52  ;;  %v15438_v44 = vld [vmem:[%s16203_s7 + $0x15c0] sm:$0xff]  }
 0x307   : > { %v721_v48 = vcombine.high %v719_v43, %v719_v43 }
 0x308   : > { %14025 = vmatpush3.bf16.msra.mxu0 %v15401_v45  ;;  %v1116_v61 = vpack.c.bf16 %v704_v57, %v704_v57  ;;  %v1117_v45 = vpack.c.bf16 %v712_v37, %v712_v37  ;;  %v15446_v57 = vld [vmem:[%s16203_s7 + $0x15d0] sm:$0xff]  }
 0x309   : > { %14054 = vmatprep.subr.bf16.mxu0 %v15404_v50  ;;  %14047 = vmatpush3.bf16.msra.mxu1 %v15402_v47  ;;  %v1118_v47 = vpack.c.bf16 %v720_v41, %v720_v41  ;;  %v1119_v50 = vpack.c.bf16 %v719_v43, %v719_v43  ;;  %v1120_v52 = vpack.c.bf16 %v721_v48, %v721_v48  ;;  %v15474_v41 = vld [vmem:[%s16203_s7 + $0x1648] sm:$0xff]   ;;  %v15479_v48 = vld [vmem:[%s16203_s7 + $0x16d0] sm:$0xff]  }
 0x30a   : > { %14076 = vmatprep.subr.bf16.mxu1 %v15405_v53  ;;  %10949 = vmatprep.mubr.bf16.mxu1 %v1116_v61  ;;  %v15442_v53 = vld [vmem:[%s16203_s7 + $0x15c8] sm:$0xff]   ;;  %v15450_v61 = vld [vmem:[%s16203_s7 + $0x15d8] sm:$0xff]  }
 0x30b   : > { %10910 = vmatmul.mubr.bf16.vlgmr.msra.gmra.mrb[76].mxu0 %v1113_v54  ;;  %v15443_v54 = vld [vmem:[%s16203_s7 + $0x1508] sm:$0xff]  }
 0x30c   : > { %14055 = vmatpush3.bf16.msra.mxu0 %v15406_v55  ;;  %10950 = vmatmul.mubr.bf16.vlgmr.msra.gmra.mrb[76].mxu1 %v1115_v59  ;;  %v15444_v55 = vld [vmem:[%s16203_s7 + $0x1588] sm:$0xff]   ;;  %v15448_v59 = vld [vmem:[%s16203_s7 + $0x1590] sm:$0xff]  }
 0x30d   : > { %14056 = vmatprep.subr.bf16.mxu0 %v15408_v60  ;;  %14077 = vmatpush3.bf16.msra.mxu1 %v15407_v58  ;;  %v15447_v58 = vld [vmem:[%s16203_s7 + $0x1510] sm:$0xff]   ;;  %v15449_v60 = vld [vmem:[%s16203_s7 + $0x1558] sm:$0xff]  }
 0x30e   : > { %14078 = vmatprep.subr.bf16.mxu1 %v15409_v62  ;;  %10989 = vmatprep.mubr.bf16.mxu0 %v1118_v47  ;;  %v15451_v62 = vld [vmem:[%s16203_s7 + $0x1518] sm:$0xff]   ;;  %v15478_v47 = vld [vmem:[%s16203_s7 + $0x1650] sm:$0xff]  }
 0x30f   : > { %11029 = vmatprep.mubr.bf16.mxu1 %v1120_v52  ;;  %v15483_v52 = vld [vmem:[%s16203_s7 + $0x16d8] sm:$0xff]  }
 0x310   : > { %14057 = vmatpush3.bf16.msra.mxu0 %v15410_v63  ;;  %v15452_v63 = vld [vmem:[%s16203_s7 + $0x1598] sm:$0xff]  }
 0x311   : > { %14058 = vmatprep.subr.bf16.mxu0 %v15412_v1  ;;  %14079 = vmatpush3.bf16.msra.mxu1 %v15411_v0  ;;  %v15453_v0 = vld [vmem:[%s16203_s7 + $0x1560] sm:$0xff]  }
 0x312   : > { %14080 = vmatprep.subr.bf16.mxu1 %v15413_v2  ;;  %v15454_v1 = vld [vmem:[%s16203_s7 + $0x15e0] sm:$0xff]  }
 0x313   : > { %v15455_v2 = vld [vmem:[%s16203_s7 + $0x1520] sm:$0xff]  }
 0x314   : > { %14059 = vmatpush3.bf16.msra.mxu0 %v15414_v3  ;;  %v15456_v3 = vld [vmem:[%s16203_s7 + $0x15a0] sm:$0xff]  }
 0x315   : > { %14060 = vmatprep.subr.bf16.mxu0 %v15416_v5  ;;  %14081 = vmatpush3.bf16.msra.mxu1 %v15415_v4  ;;  %v15457_v4 = vld [vmem:[%s16203_s7 + $0x1568] sm:$0xff]  }
 0x316   : > { %14082 = vmatprep.subr.bf16.mxu1 %v15417_v6  ;;  %v15458_v6 = vld [vmem:[%s16203_s7 + $0x15e8] sm:$0xff]  }
 0x318   : > { %14061 = vmatpush3.bf16.msra.mxu0 %v15418_v7 }
 0x319   : > { %14062 = vmatprep.subr.bf16.mxu0 %v15420_v9  ;;  %14083 = vmatpush3.bf16.msra.mxu1 %v15419_v8  ;;  %v15459_v8 = vld [vmem:[%s16203_s7 + $0x1528] sm:$0xff]  }
 0x31a   : > { %14084 = vmatprep.subr.bf16.mxu1 %v15421_v10 }
 0x31c   : > { %14063 = vmatpush3.bf16.msra.mxu0 %v15422_v11 }
 0x31d   : > { %14064 = vmatprep.subr.bf16.mxu0 %v15424_v13  ;;  %14085 = vmatpush3.bf16.msra.mxu1 %v15423_v12  ;;  %v15460_v12 = vld [vmem:[%s16203_s7 + $0x15a8] sm:$0xff]   ;;  %v15461_v13 = vld [vmem:[%s16203_s7 + $0x1570] sm:$0xff]  }
 0x31e   : > { %v13762_v14 = vpop.f32.mrb[52].mxu0  ;;  %14086 = vmatprep.subr.bf16.mxu1 %v15425_v15 }
 0x31f   : > { %v13763_v16 = vpop.f32.mrb[53].mxu0  ;;  %v13784_v18 = vpop.f32.mrb[52].mxu1 }
 0x320   : > { %v13764_v19 = vadd.f32 %v13763_v16, %v13762_v14  ;;  %v13765_v20 = vpop.f32.mrb[54].mxu0  ;;  %v13785_v21 = vpop.f32.mrb[53].mxu1  ;;  %14065 = vmatpush3.bf16.msra.mxu0 %v15426_v17 }
 0x321   : > { %v13766_v23 = vpop.f32.mrb[55].mxu0  ;;  %v13786_v26 = vadd.f32 %v13785_v21, %v13784_v18  ;;  %v13787_v27 = vpop.f32.mrb[54].mxu1  ;;  %14066 = vmatprep.subr.bf16.mxu0 %v15428_v24  ;;  %14087 = vmatpush3.bf16.msra.mxu1 %v15427_v22  ;;  %v15463_v21 = vld [vmem:[%s16203_s7 + $0x1530] sm:$0xff]   ;;  %v15465_v24 = vld [vmem:[%s16203_s7 + $0x1578] sm:$0xff]  }
 0x322   : > { %v10432_v25 = vadd.f32 %v13764_v19, %v16954_v39  ;;  %v13788_v29 = vpop.f32.mrb[55].mxu1  ;;  %14088 = vmatprep.subr.bf16.mxu1 %v15429_v28  ;;  %v15437_v39 = vld [vmem:[%s16203_s7 + $0x1540] sm:$0xff]   ;;  %v15462_v19 = vld [vmem:[%s16203_s7 + $0x15f0] sm:$0xff]  }
 0x323   : > { %v15464_v23 = vld [vmem:[%s16203_s7 + $0x15b0] sm:$0xff]   ;;  %v322_v27 = vld [vmem:[%s16221_s27 + $0xa8] sm:$0xff] }
 0x324   : > { %v16993_v31 = vadd.f32 %v13786_v26, %v10432_v25  ;;  %14067 = vmatpush3.bf16.msra.mxu0 %v15430_v30  ;;  %v15466_v25 = vld [vmem:[%s16203_s7 + $0x15f8] sm:$0xff]   ;;  %v729_v28 = vrot.slane %v322_v27, %v16260_v42  ;;  %v722_v29 = vcombine.high %v322_v27, %v322_v27  ;;  %v15470_v30 = vld [vmem:[%s16203_s7 + $0x1640] sm:$0xff]  }
 0x325   : > { %14068 = vmatprep.subr.bf16.mxu0 %v15432_v32  ;;  %14089 = vmatpush3.bf16.msra.mxu1 %v15431_v33  ;;  %v15467_v26 = vld [vmem:[%s16203_s7 + $0x1538] sm:$0xff]   ;;  %v15505_v27 = vld [vmem:[%s16203_s7 + $0x1700] sm:$0xff]  }
 0x326   : > { %14090 = vmatprep.subr.bf16.mxu1 %v15433_v34  ;;  %v737_v32 = vcombine.high %v729_v28, %v729_v28  ;;  %v736_v33 = vrot.slane %v722_v29, %v16260_v42  ;;  %v15471_v34 = vld [vmem:[%s16203_s7 + $0x16c0] sm:$0xff]  }
 0x328   : > { %14069 = vmatpush3.bf16.msra.mxu0 %v15434_v35  ;;  %v1121_v35 = vpack.c.bf16 %v729_v28, %v729_v28  ;;  %v1122_v37 = vpack.c.bf16 %v737_v32, %v737_v32  ;;  %v738_v38 = vcombine.high %v736_v33, %v736_v33  ;;  %v15507_v32 = vld [vmem:[%s16203_s7 + $0x1748] sm:$0xff]  }
 0x329   : > { %14098 = vmatprep.subr.bf16.mxu0 %v15437_v39  ;;  %14091 = vmatpush3.bf16.msra.mxu1 %v15435_v40  ;;  %v15473_v39 = vld [vmem:[%s16203_s7 + $0x1680] sm:$0xff]   ;;  %v1123_v40 = vpack.c.bf16 %v736_v33, %v736_v33 }
 0x32a   : > { %14120 = vmatprep.subr.bf16.mxu1 %v15438_v44  ;;  %v1124_v43 = vpack.c.bf16 %v738_v38, %v738_v38  ;;  %v15475_v44 = vld [vmem:[%s16203_s7 + $0x16c8] sm:$0xff]   ;;  %v15512_v38 = vld [vmem:[%s16203_s7 + $0x17d0] sm:$0xff]  }
 0x32b   : > { %10990 = vmatmul.mubr.bf16.vlgmr.msra.gmra.mrb[80].mxu0 %v1117_v45  ;;  %v15476_v45 = vld [vmem:[%s16203_s7 + $0x1608] sm:$0xff]  }
 0x32c   : > { %14099 = vmatpush3.bf16.msra.mxu0 %v15439_v46  ;;  %11030 = vmatmul.mubr.bf16.vlgmr.msra.gmra.mrb[80].mxu1 %v1119_v50  ;;  %v15477_v46 = vld [vmem:[%s16203_s7 + $0x1688] sm:$0xff]   ;;  %v15481_v50 = vld [vmem:[%s16203_s7 + $0x1690] sm:$0xff]  }
 0x32d   : > { %14100 = vmatprep.subr.bf16.mxu0 %v15441_v51  ;;  %14121 = vmatpush3.bf16.msra.mxu1 %v15440_v49  ;;  %v15480_v49 = vld [vmem:[%s16203_s7 + $0x1610] sm:$0xff]   ;;  %v15482_v51 = vld [vmem:[%s16203_s7 + $0x1658] sm:$0xff]  }
 0x32e   : > { %14122 = vmatprep.subr.bf16.mxu1 %v15442_v53  ;;  %11069 = vmatprep.mubr.bf16.mxu0 %v1122_v37  ;;  %v15484_v53 = vld [vmem:[%s16203_s7 + $0x1618] sm:$0xff]   ;;  %v15511_v37 = vld [vmem:[%s16203_s7 + $0x1750] sm:$0xff]  }
 0x32f   : > { %11109 = vmatprep.mubr.bf16.mxu1 %v1124_v43  ;;  %v15516_v43 = vld [vmem:[%s16203_s7 + $0x17d8] sm:$0xff]  }
 0x330   : > { %14101 = vmatpush3.bf16.msra.mxu0 %v15443_v54  ;;  %v15485_v54 = vld [vmem:[%s16203_s7 + $0x1698] sm:$0xff]  }
 0x331   : > { %14102 = vmatprep.subr.bf16.mxu0 %v15445_v56  ;;  %14123 = vmatpush3.bf16.msra.mxu1 %v15444_v55  ;;  %v15486_v55 = vld [vmem:[%s16203_s7 + $0x1660] sm:$0xff]  }
 0x332   : > { %14124 = vmatprep.subr.bf16.mxu1 %v15446_v57  ;;  %v15487_v56 = vld [vmem:[%s16203_s7 + $0x16e0] sm:$0xff]  }
 0x333   : > { %v15488_v57 = vld [vmem:[%s16203_s7 + $0x1620] sm:$0xff]  }
 0x334   : > { %14103 = vmatpush3.bf16.msra.mxu0 %v15447_v58  ;;  %v15489_v58 = vld [vmem:[%s16203_s7 + $0x16a0] sm:$0xff]  }
 0x335   : > { %14104 = vmatprep.subr.bf16.mxu0 %v15449_v60  ;;  %14125 = vmatpush3.bf16.msra.mxu1 %v15448_v59  ;;  %v15490_v59 = vld [vmem:[%s16203_s7 + $0x1668] sm:$0xff]  }
 0x336   : > { %14126 = vmatprep.subr.bf16.mxu1 %v15450_v61  ;;  %v15491_v61 = vld [vmem:[%s16203_s7 + $0x16e8] sm:$0xff]  }
 0x338   : > { %14105 = vmatpush3.bf16.msra.mxu0 %v15451_v62 }
 0x339   : > { %14106 = vmatprep.subr.bf16.mxu0 %v15453_v0  ;;  %14127 = vmatpush3.bf16.msra.mxu1 %v15452_v63  ;;  %v15492_v63 = vld [vmem:[%s16203_s7 + $0x1628] sm:$0xff]  }
 0x33a   : > { %14128 = vmatprep.subr.bf16.mxu1 %v15454_v1 }
 0x33c   : > { %14107 = vmatpush3.bf16.msra.mxu0 %v15455_v2 }
 0x33d   : > { %14108 = vmatprep.subr.bf16.mxu0 %v15457_v4  ;;  %14129 = vmatpush3.bf16.msra.mxu1 %v15456_v3  ;;  %v15493_v3 = vld [vmem:[%s16203_s7 + $0x16a8] sm:$0xff]   ;;  %v15494_v4 = vld [vmem:[%s16203_s7 + $0x1670] sm:$0xff]  }
 0x33e   : > { %v13806_v5 = vpop.f32.mrb[56].mxu0  ;;  %14130 = vmatprep.subr.bf16.mxu1 %v15458_v6 }
 0x33f   : > { %v13807_v7 = vpop.f32.mrb[57].mxu0  ;;  %v13828_v9 = vpop.f32.mrb[56].mxu1 }
 0x340   : > { %v13808_v10 = vadd.f32 %v13807_v7, %v13806_v5  ;;  %v13809_v11 = vpop.f32.mrb[58].mxu0  ;;  %v13829_v14 = vpop.f32.mrb[57].mxu1  ;;  %14109 = vmatpush3.bf16.msra.mxu0 %v15459_v8 }
 0x341   : > { %v13810_v15 = vpop.f32.mrb[59].mxu0  ;;  %v13830_v17 = vadd.f32 %v13829_v14, %v13828_v9  ;;  %v13831_v18 = vpop.f32.mrb[58].mxu1  ;;  %14110 = vmatprep.subr.bf16.mxu0 %v15461_v13  ;;  %14131 = vmatpush3.bf16.msra.mxu1 %v15460_v12  ;;  %v15496_v12 = vld [vmem:[%s16203_s7 + $0x1630] sm:$0xff]  }
 0x342   : > { %v10512_v16 = vadd.f32 %v13808_v10, %v16993_v31  ;;  %v13832_v20 = vpop.f32.mrb[59].mxu1  ;;  %14132 = vmatprep.subr.bf16.mxu1 %v15462_v19  ;;  %v15468_v31 = vld [vmem:[%s16203_s7 + $0x15b8] sm:$0xff]   ;;  %v15495_v10 = vld [vmem:[%s16203_s7 + $0x16f0] sm:$0xff]  }
 0x343   : > { %v15497_v14 = vld [vmem:[%s16203_s7 + $0x16b0] sm:$0xff]   ;;  %v15498_v15 = vld [vmem:[%s16203_s7 + $0x1678] sm:$0xff]  }
 0x344   : > { %v17031_v22 = vadd.f32 %v13830_v17, %v10512_v16  ;;  %14111 = vmatpush3.bf16.msra.mxu0 %v15463_v21  ;;  %v15499_v16 = vld [vmem:[%s16203_s7 + $0x16f8] sm:$0xff]   ;;  %v323_v18 = vld [vmem:[%s16221_s27 + $0xb0] sm:$0xff] }
 0x345   : > { %14112 = vmatprep.subr.bf16.mxu0 %v15465_v24  ;;  %14133 = vmatpush3.bf16.msra.mxu1 %v15464_v23  ;;  %v15500_v17 = vld [vmem:[%s16203_s7 + $0x1638] sm:$0xff]   ;;  %v746_v20 = vrot.slane %v323_v18, %v16260_v42  ;;  %v739_v21 = vcombine.high %v323_v18, %v323_v18  ;;  %v15538_v18 = vld [vmem:[%s16203_s7 + $0x1800] sm:$0xff]  }
 0x346   : > { %14134 = vmatprep.subr.bf16.mxu1 %v15466_v25  ;;  %v15501_v19 = vld [vmem:[%s16203_s7 + $0x16b8] sm:$0xff]   ;;  %v15504_v25 = vld [vmem:[%s16203_s7 + $0x17c0] sm:$0xff]  }
 0x347   : > { %v754_v23 = vcombine.high %v746_v20, %v746_v20  ;;  %v753_v24 = vrot.slane %v739_v21, %v16260_v42  ;;  %v15539_v21 = vld [vmem:[%s16203_s7 + $0x1880] sm:$0xff]  }
 0x348   : > { %14113 = vmatpush3.bf16.msra.mxu0 %v15467_v26  ;;  %v1125_v26 = vpack.c.bf16 %v746_v20, %v746_v20 }
 0x349   : > { %14142 = vmatprep.subr.bf16.mxu0 %v15470_v30  ;;  %14135 = vmatpush3.bf16.msra.mxu1 %v15468_v31  ;;  %v1126_v28 = vpack.c.bf16 %v754_v23, %v754_v23  ;;  %v755_v29 = vcombine.high %v753_v24, %v753_v24  ;;  %v15506_v30 = vld [vmem:[%s16203_s7 + $0x1780] sm:$0xff]   ;;  %v1127_v31 = vpack.c.bf16 %v753_v24, %v753_v24  ;;  %v15540_v23 = vld [vmem:[%s16203_s7 + $0x1848] sm:$0xff]  }
 0x34a   : > { %14164 = vmatprep.subr.bf16.mxu1 %v15471_v34  ;;  %v15508_v34 = vld [vmem:[%s16203_s7 + $0x17c8] sm:$0xff]  }
 0x34b   : > { %11070 = vmatmul.mubr.bf16.vlgmr.msra.gmra.mrb[84].mxu0 %v1121_v35  ;;  %v1128_v33 = vpack.c.bf16 %v755_v29, %v755_v29  ;;  %v15509_v35 = vld [vmem:[%s16203_s7 + $0x1708] sm:$0xff]   ;;  %v15545_v29 = vld [vmem:[%s16203_s7 + $0x18d0] sm:$0xff]  }
 0x34c   : > { %14143 = vmatpush3.bf16.msra.mxu0 %v15472_v36  ;;  %11110 = vmatmul.mubr.bf16.vlgmr.msra.gmra.mrb[84].mxu1 %v1123_v40  ;;  %v15510_v36 = vld [vmem:[%s16203_s7 + $0x1788] sm:$0xff]   ;;  %v15514_v40 = vld [vmem:[%s16203_s7 + $0x1790] sm:$0xff]  }
 0x34d   : > { %14144 = vmatprep.subr.bf16.mxu0 %v15474_v41  ;;  %14165 = vmatpush3.bf16.msra.mxu1 %v15473_v39  ;;  %v15513_v39 = vld [vmem:[%s16203_s7 + $0x1710] sm:$0xff]   ;;  %v15515_v41 = vld [vmem:[%s16203_s7 + $0x1758] sm:$0xff]  }
 0x34e   : > { %14166 = vmatprep.subr.bf16.mxu1 %v15475_v44  ;;  %11149 = vmatprep.mubr.bf16.mxu0 %v1126_v28  ;;  %v15517_v44 = vld [vmem:[%s16203_s7 + $0x1718] sm:$0xff]   ;;  %v15544_v28 = vld [vmem:[%s16203_s7 + $0x1850] sm:$0xff]  }
 0x34f   : > { %11189 = vmatprep.mubr.bf16.mxu1 %v1128_v33  ;;  %v15549_v33 = vld [vmem:[%s16203_s7 + $0x18d8] sm:$0xff]  }
 0x350   : > { %14145 = vmatpush3.bf16.msra.mxu0 %v15476_v45  ;;  %v15518_v45 = vld [vmem:[%s16203_s7 + $0x1798] sm:$0xff]  }
 0x351   : > { %14146 = vmatprep.subr.bf16.mxu0 %v15478_v47  ;;  %14167 = vmatpush3.bf16.msra.mxu1 %v15477_v46  ;;  %v15519_v46 = vld [vmem:[%s16203_s7 + $0x1760] sm:$0xff]  }
 0x352   : > { %14168 = vmatprep.subr.bf16.mxu1 %v15479_v48  ;;  %v15520_v47 = vld [vmem:[%s16203_s7 + $0x17e0] sm:$0xff]  }
 0x353   : > { %v15521_v48 = vld [vmem:[%s16203_s7 + $0x1720] sm:$0xff]  }
 0x354   : > { %14147 = vmatpush3.bf16.msra.mxu0 %v15480_v49  ;;  %v15522_v49 = vld [vmem:[%s16203_s7 + $0x17a0] sm:$0xff]  }
 0x355   : > { %14148 = vmatprep.subr.bf16.mxu0 %v15482_v51  ;;  %14169 = vmatpush3.bf16.msra.mxu1 %v15481_v50  ;;  %v15523_v50 = vld [vmem:[%s16203_s7 + $0x1768] sm:$0xff]  }
 0x356   : > { %14170 = vmatprep.subr.bf16.mxu1 %v15483_v52  ;;  %v15524_v52 = vld [vmem:[%s16203_s7 + $0x17e8] sm:$0xff]  }
 0x358   : > { %14149 = vmatpush3.bf16.msra.mxu0 %v15484_v53 }
 0x359   : > { %14150 = vmatprep.subr.bf16.mxu0 %v15486_v55  ;;  %14171 = vmatpush3.bf16.msra.mxu1 %v15485_v54  ;;  %v15525_v54 = vld [vmem:[%s16203_s7 + $0x1728] sm:$0xff]  }
 0x35a   : > { %14172 = vmatprep.subr.bf16.mxu1 %v15487_v56 }
 0x35c   : > { %14151 = vmatpush3.bf16.msra.mxu0 %v15488_v57 }
 0x35d   : > { %14152 = vmatprep.subr.bf16.mxu0 %v15490_v59  ;;  %14173 = vmatpush3.bf16.msra.mxu1 %v15489_v58  ;;  %v15526_v59 = vld [vmem:[%s16203_s7 + $0x17a8] sm:$0xff]  }
 0x35e   : > { %v13850_v60 = vpop.f32.mrb[60].mxu0  ;;  %14174 = vmatprep.subr.bf16.mxu1 %v15491_v61  ;;  %v15527_v61 = vld [vmem:[%s16203_s7 + $0x1770] sm:$0xff]  }
 0x35f   : > { %v13851_v62 = vpop.f32.mrb[61].mxu0  ;;  %v13872_v0 = vpop.f32.mrb[60].mxu1 }
 0x360   : > { %v13852_v1 = vadd.f32 %v13851_v62, %v13850_v60  ;;  %v13853_v2 = vpop.f32.mrb[62].mxu0  ;;  %v13873_v5 = vpop.f32.mrb[61].mxu1  ;;  %14153 = vmatpush3.bf16.msra.mxu0 %v15492_v63 }
 0x361   : > { %v13854_v6 = vpop.f32.mrb[63].mxu0  ;;  %v13874_v8 = vadd.f32 %v13873_v5, %v13872_v0  ;;  %v13875_v9 = vpop.f32.mrb[62].mxu1  ;;  %14154 = vmatprep.subr.bf16.mxu0 %v15494_v4  ;;  %14175 = vmatpush3.bf16.msra.mxu1 %v15493_v3  ;;  %v15529_v3 = vld [vmem:[%s16203_s7 + $0x1730] sm:$0xff]   ;;  %v15531_v5 = vld [vmem:[%s16203_s7 + $0x1778] sm:$0xff]  }
 0x362   : > { %v10592_v7 = vadd.f32 %v13852_v1, %v17031_v22  ;;  %v13876_v11 = vpop.f32.mrb[63].mxu1  ;;  %14176 = vmatprep.subr.bf16.mxu1 %v15495_v10  ;;  %v15503_v22 = vld [vmem:[%s16203_s7 + $0x1740] sm:$0xff]   ;;  %v15528_v1 = vld [vmem:[%s16203_s7 + $0x17f0] sm:$0xff]  }
 0x363   : > { %v15530_v6 = vld [vmem:[%s16203_s7 + $0x17b0] sm:$0xff]  }
 0x364   : > { %v17069_v13 = vadd.f32 %v13874_v8, %v10592_v7  ;;  %14155 = vmatpush3.bf16.msra.mxu0 %v15496_v12  ;;  %v15532_v7 = vld [vmem:[%s16203_s7 + $0x17f8] sm:$0xff]   ;;  %v15536_v12 = vld [vmem:[%s16203_s7 + $0x1840] sm:$0xff]  }
 0x365   : > { %14156 = vmatprep.subr.bf16.mxu0 %v15498_v15  ;;  %14177 = vmatpush3.bf16.msra.mxu1 %v15497_v14  ;;  %v15533_v8 = vld [vmem:[%s16203_s7 + $0x1738] sm:$0xff]  }
 0x366   : > { %14178 = vmatprep.subr.bf16.mxu1 %v15499_v16  ;;  %v324_v9 = vld [vmem:[%s16221_s27 + $0xb8] sm:$0xff]  ;;  %v15537_v16 = vld [vmem:[%s16203_s7 + $0x18c0] sm:$0xff]  }
 0x367   : > { %v763_v10 = vrot.slane %v324_v9, %v16260_v42  ;;  %v756_v11 = vcombine.high %v324_v9, %v324_v9  ;;  %v15571_v9 = vld [vmem:[%s16203_s7 + $0x1900] sm:$0xff]  }
 0x368   : > { %14157 = vmatpush3.bf16.msra.mxu0 %v15500_v17 }
 0x369   : > { %14186 = vmatprep.subr.bf16.mxu0 %v15503_v22  ;;  %14179 = vmatpush3.bf16.msra.mxu1 %v15501_v19  ;;  %v771_v14 = vcombine.high %v763_v10, %v763_v10  ;;  %v770_v15 = vrot.slane %v756_v11, %v16260_v42  ;;  %v1129_v17 = vpack.c.bf16 %v763_v10, %v763_v10 }
 0x36a   : > { %14208 = vmatprep.subr.bf16.mxu1 %v15504_v25  ;;  %v15541_v25 = vld [vmem:[%s16203_s7 + $0x18c8] sm:$0xff]  }
 0x36b   : > { %11150 = vmatmul.mubr.bf16.vlgmr.msra.gmra.mrb[88].mxu0 %v1125_v26  ;;  %v1130_v19 = vpack.c.bf16 %v771_v14, %v771_v14  ;;  %v772_v20 = vcombine.high %v770_v15, %v770_v15  ;;  %v1131_v22 = vpack.c.bf16 %v770_v15, %v770_v15  ;;  %v15542_v26 = vld [vmem:[%s16203_s7 + $0x1808] sm:$0xff]  }
 0x36c   : > { %14187 = vmatpush3.bf16.msra.mxu0 %v15505_v27  ;;  %11190 = vmatmul.mubr.bf16.vlgmr.msra.gmra.mrb[88].mxu1 %v1127_v31  ;;  %v15543_v27 = vld [vmem:[%s16203_s7 + $0x1888] sm:$0xff]   ;;  %v15547_v31 = vld [vmem:[%s16203_s7 + $0x1890] sm:$0xff]  }
 0x36d   : > { %14188 = vmatprep.subr.bf16.mxu0 %v15507_v32  ;;  %14209 = vmatpush3.bf16.msra.mxu1 %v15506_v30  ;;  %v1132_v24 = vpack.c.bf16 %v772_v20, %v772_v20  ;;  %v15546_v30 = vld [vmem:[%s16203_s7 + $0x1810] sm:$0xff]   ;;  %v15548_v32 = vld [vmem:[%s16203_s7 + $0x1858] sm:$0xff]   ;;  %v15573_v14 = vld [vmem:[%s16203_s7 + $0x1948] sm:$0xff]  }
 0x36e   : > { %14210 = vmatprep.subr.bf16.mxu1 %v15508_v34  ;;  %11229 = vmatprep.mubr.bf16.mxu0 %v1130_v19  ;;  %v15550_v34 = vld [vmem:[%s16203_s7 + $0x1818] sm:$0xff]   ;;  %v15577_v19 = vld [vmem:[%s16203_s7 + $0x1950] sm:$0xff]  }
 0x36f   : > { %11269 = vmatprep.mubr.bf16.mxu1 %v1132_v24  ;;  %v15578_v20 = vld [vmem:[%s16203_s7 + $0x19d0] sm:$0xff]   ;;  %v15582_v24 = vld [vmem:[%s16203_s7 + $0x19d8] sm:$0xff]  }
 0x370   : > { %14189 = vmatpush3.bf16.msra.mxu0 %v15509_v35  ;;  %v15551_v35 = vld [vmem:[%s16203_s7 + $0x1898] sm:$0xff]  }
 0x371   : > { %14190 = vmatprep.subr.bf16.mxu0 %v15511_v37  ;;  %14211 = vmatpush3.bf16.msra.mxu1 %v15510_v36  ;;  %v15552_v36 = vld [vmem:[%s16203_s7 + $0x1860] sm:$0xff]  }
 0x372   : > { %14212 = vmatprep.subr.bf16.mxu1 %v15512_v38  ;;  %v15553_v37 = vld [vmem:[%s16203_s7 + $0x18e0] sm:$0xff]  }
 0x373   : > { %v15554_v38 = vld [vmem:[%s16203_s7 + $0x1820] sm:$0xff]  }
 0x374   : > { %14191 = vmatpush3.bf16.msra.mxu0 %v15513_v39  ;;  %v15555_v39 = vld [vmem:[%s16203_s7 + $0x18a0] sm:$0xff]  }
 0x375   : > { %14192 = vmatprep.subr.bf16.mxu0 %v15515_v41  ;;  %14213 = vmatpush3.bf16.msra.mxu1 %v15514_v40  ;;  %v15556_v40 = vld [vmem:[%s16203_s7 + $0x1868] sm:$0xff]  }
 0x376   : > { %14214 = vmatprep.subr.bf16.mxu1 %v15516_v43  ;;  %v15557_v43 = vld [vmem:[%s16203_s7 + $0x18e8] sm:$0xff]  }
 0x378   : > { %14193 = vmatpush3.bf16.msra.mxu0 %v15517_v44 }
 0x379   : > { %14194 = vmatprep.subr.bf16.mxu0 %v15519_v46  ;;  %14215 = vmatpush3.bf16.msra.mxu1 %v15518_v45  ;;  %v15558_v45 = vld [vmem:[%s16203_s7 + $0x1828] sm:$0xff]  }
 0x37a   : > { %14216 = vmatprep.subr.bf16.mxu1 %v15520_v47 }
 0x37c   : > { %14195 = vmatpush3.bf16.msra.mxu0 %v15521_v48 }
 0x37d   : > { %14196 = vmatprep.subr.bf16.mxu0 %v15523_v50  ;;  %14217 = vmatpush3.bf16.msra.mxu1 %v15522_v49  ;;  %v15559_v49 = vld [vmem:[%s16203_s7 + $0x18a8] sm:$0xff]   ;;  %v15560_v50 = vld [vmem:[%s16203_s7 + $0x1870] sm:$0xff]  }
 0x37e   : > { %v13894_v51 = vpop.f32.mrb[64].mxu0  ;;  %14218 = vmatprep.subr.bf16.mxu1 %v15524_v52 }
 0x37f   : > { %v13895_v53 = vpop.f32.mrb[65].mxu0  ;;  %v13916_v55 = vpop.f32.mrb[64].mxu1 }
 0x380   : > { %v13896_v56 = vadd.f32 %v13895_v53, %v13894_v51  ;;  %v13897_v57 = vpop.f32.mrb[66].mxu0  ;;  %v13917_v58 = vpop.f32.mrb[65].mxu1  ;;  %14197 = vmatpush3.bf16.msra.mxu0 %v15525_v54 }
 0x381   : > { %v13898_v60 = vpop.f32.mrb[67].mxu0  ;;  %v13918_v63 = vadd.f32 %v13917_v58, %v13916_v55  ;;  %v13919_v0 = vpop.f32.mrb[66].mxu1  ;;  %14198 = vmatprep.subr.bf16.mxu0 %v15527_v61  ;;  %14219 = vmatpush3.bf16.msra.mxu1 %v15526_v59  ;;  %v15562_v58 = vld [vmem:[%s16203_s7 + $0x1830] sm:$0xff]   ;;  %v15564_v61 = vld [vmem:[%s16203_s7 + $0x1878] sm:$0xff]  }
 0x382   : > { %v10672_v62 = vadd.f32 %v13896_v56, %v17069_v13  ;;  %v13920_v2 = vpop.f32.mrb[67].mxu1  ;;  %14220 = vmatprep.subr.bf16.mxu1 %v15528_v1  ;;  %v15534_v13 = vld [vmem:[%s16203_s7 + $0x17b8] sm:$0xff]   ;;  %v15561_v56 = vld [vmem:[%s16203_s7 + $0x18f0] sm:$0xff]  }
 0x383   : > { %v15563_v60 = vld [vmem:[%s16203_s7 + $0x18b0] sm:$0xff]   ;;  %v325_v0 = vld [vmem:[%s16221_s27 + $0xc0] sm:$0xff] }
 0x384   : > { %v17107_v4 = vadd.f32 %v13918_v63, %v10672_v62  ;;  %14199 = vmatpush3.bf16.msra.mxu0 %v15529_v3  ;;  %v15565_v62 = vld [vmem:[%s16203_s7 + $0x18f8] sm:$0xff]   ;;  %v780_v1 = vrot.slane %v325_v0, %v16260_v42  ;;  %v773_v2 = vcombine.high %v325_v0, %v325_v0  ;;  %v15569_v3 = vld [vmem:[%s16203_s7 + $0x1940] sm:$0xff]  }
 0x385   : > { %14200 = vmatprep.subr.bf16.mxu0 %v15531_v5  ;;  %14221 = vmatpush3.bf16.msra.mxu1 %v15530_v6  ;;  %v15566_v63 = vld [vmem:[%s16203_s7 + $0x1838] sm:$0xff]   ;;  %v15604_v0 = vld [vmem:[%s16203_s7 + $0x1a00] sm:$0xff]  }
 0x386   : > { %14222 = vmatprep.subr.bf16.mxu1 %v15532_v7  ;;  %v788_v5 = vcombine.high %v780_v1, %v780_v1  ;;  %v787_v6 = vrot.slane %v773_v2, %v16260_v42  ;;  %v15570_v7 = vld [vmem:[%s16203_s7 + $0x19c0] sm:$0xff]  }
 0x388   : > { %14201 = vmatpush3.bf16.msra.mxu0 %v15533_v8  ;;  %v1133_v8 = vpack.c.bf16 %v780_v1, %v780_v1  ;;  %v1134_v10 = vpack.c.bf16 %v788_v5, %v788_v5  ;;  %v789_v11 = vcombine.high %v787_v6, %v787_v6  ;;  %v15606_v5 = vld [vmem:[%s16203_s7 + $0x1a48] sm:$0xff]  }
 0x389   : > { %14230 = vmatprep.subr.bf16.mxu0 %v15536_v12  ;;  %14223 = vmatpush3.bf16.msra.mxu1 %v15534_v13  ;;  %v15572_v12 = vld [vmem:[%s16203_s7 + $0x1980] sm:$0xff]   ;;  %v1135_v13 = vpack.c.bf16 %v787_v6, %v787_v6 }
 0x38a   : > { %14252 = vmatprep.subr.bf16.mxu1 %v15537_v16  ;;  %v1136_v15 = vpack.c.bf16 %v789_v11, %v789_v11  ;;  %v15574_v16 = vld [vmem:[%s16203_s7 + $0x19c8] sm:$0xff]   ;;  %v15611_v11 = vld [vmem:[%s16203_s7 + $0x1ad0] sm:$0xff]  }
 0x38b   : > { %11230 = vmatmul.mubr.bf16.vlgmr.msra.gmra.mrb[92].mxu0 %v1129_v17  ;;  %v15575_v17 = vld [vmem:[%s16203_s7 + $0x1908] sm:$0xff]  }
 0x38c   : > { %14231 = vmatpush3.bf16.msra.mxu0 %v15538_v18  ;;  %11270 = vmatmul.mubr.bf16.vlgmr.msra.gmra.mrb[92].mxu1 %v1131_v22  ;;  %v15576_v18 = vld [vmem:[%s16203_s7 + $0x1988] sm:$0xff]   ;;  %v15580_v22 = vld [vmem:[%s16203_s7 + $0x1990] sm:$0xff]  }
 0x38d   : > { %14232 = vmatprep.subr.bf16.mxu0 %v15540_v23  ;;  %14253 = vmatpush3.bf16.msra.mxu1 %v15539_v21  ;;  %v15579_v21 = vld [vmem:[%s16203_s7 + $0x1910] sm:$0xff]   ;;  %v15581_v23 = vld [vmem:[%s16203_s7 + $0x1958] sm:$0xff]  }
 0x38e   : > { %14254 = vmatprep.subr.bf16.mxu1 %v15541_v25  ;;  %11309 = vmatprep.mubr.bf16.mxu0 %v1134_v10  ;;  %v15583_v25 = vld [vmem:[%s16203_s7 + $0x1918] sm:$0xff]   ;;  %v15610_v10 = vld [vmem:[%s16203_s7 + $0x1a50] sm:$0xff]  }
 0x38f   : > { %11349 = vmatprep.mubr.bf16.mxu1 %v1136_v15  ;;  %v15615_v15 = vld [vmem:[%s16203_s7 + $0x1ad8] sm:$0xff]  }
 0x390   : > { %14233 = vmatpush3.bf16.msra.mxu0 %v15542_v26  ;;  %v15584_v26 = vld [vmem:[%s16203_s7 + $0x1998] sm:$0xff]  }
 0x391   : > { %14234 = vmatprep.subr.bf16.mxu0 %v15544_v28  ;;  %14255 = vmatpush3.bf16.msra.mxu1 %v15543_v27  ;;  %v15585_v27 = vld [vmem:[%s16203_s7 + $0x1960] sm:$0xff]  }
 0x392   : > { %14256 = vmatprep.subr.bf16.mxu1 %v15545_v29  ;;  %v15586_v28 = vld [vmem:[%s16203_s7 + $0x19e0] sm:$0xff]  }
 0x393   : > { %v15587_v29 = vld [vmem:[%s16203_s7 + $0x1920] sm:$0xff]  }
 0x394   : > { %14235 = vmatpush3.bf16.msra.mxu0 %v15546_v30  ;;  %v15588_v30 = vld [vmem:[%s16203_s7 + $0x19a0] sm:$0xff]  }
 0x395   : > { %14236 = vmatprep.subr.bf16.mxu0 %v15548_v32  ;;  %14257 = vmatpush3.bf16.msra.mxu1 %v15547_v31  ;;  %v15589_v31 = vld [vmem:[%s16203_s7 + $0x1968] sm:$0xff]  }
 0x396   : > { %14258 = vmatprep.subr.bf16.mxu1 %v15549_v33  ;;  %v15590_v33 = vld [vmem:[%s16203_s7 + $0x19e8] sm:$0xff]  }
 0x398   : > { %14237 = vmatpush3.bf16.msra.mxu0 %v15550_v34 }
 0x399   : > { %14238 = vmatprep.subr.bf16.mxu0 %v15552_v36  ;;  %14259 = vmatpush3.bf16.msra.mxu1 %v15551_v35  ;;  %v15591_v35 = vld [vmem:[%s16203_s7 + $0x1928] sm:$0xff]  }
 0x39a   : > { %14260 = vmatprep.subr.bf16.mxu1 %v15553_v37 }
 0x39c   : > { %14239 = vmatpush3.bf16.msra.mxu0 %v15554_v38 }
 0x39d   : > { %14240 = vmatprep.subr.bf16.mxu0 %v15556_v40  ;;  %14261 = vmatpush3.bf16.msra.mxu1 %v15555_v39  ;;  %v15592_v39 = vld [vmem:[%s16203_s7 + $0x19a8] sm:$0xff]   ;;  %v15593_v40 = vld [vmem:[%s16203_s7 + $0x1970] sm:$0xff]  }
 0x39e   : > { %v13938_v41 = vpop.f32.mrb[68].mxu0  ;;  %14262 = vmatprep.subr.bf16.mxu1 %v15557_v43 }
 0x39f   : > { %v13939_v44 = vpop.f32.mrb[69].mxu0  ;;  %v13960_v46 = vpop.f32.mrb[68].mxu1 }
 0x3a0   : > { %v13940_v47 = vadd.f32 %v13939_v44, %v13938_v41  ;;  %v13941_v48 = vpop.f32.mrb[70].mxu0  ;;  %v13961_v51 = vpop.f32.mrb[69].mxu1  ;;  %14241 = vmatpush3.bf16.msra.mxu0 %v15558_v45 }
 0x3a1   : > { %v13942_v52 = vpop.f32.mrb[71].mxu0  ;;  %v13962_v54 = vadd.f32 %v13961_v51, %v13960_v46  ;;  %v13963_v55 = vpop.f32.mrb[70].mxu1  ;;  %14242 = vmatprep.subr.bf16.mxu0 %v15560_v50  ;;  %14263 = vmatpush3.bf16.msra.mxu1 %v15559_v49  ;;  %v15595_v49 = vld [vmem:[%s16203_s7 + $0x1930] sm:$0xff]  }
 0x3a2   : > { %v10752_v53 = vadd.f32 %v13940_v47, %v17107_v4  ;;  %v13964_v57 = vpop.f32.mrb[71].mxu1  ;;  %14264 = vmatprep.subr.bf16.mxu1 %v15561_v56  ;;  %v15567_v4 = vld [vmem:[%s16203_s7 + $0x18b8] sm:$0xff]   ;;  %v15594_v47 = vld [vmem:[%s16203_s7 + $0x19f0] sm:$0xff]   ;;  %v326_v55 = vld [vmem:[%s16221_s27 + $0xc8] sm:$0xff] }
 0x3a3   : > { %v15596_v51 = vld [vmem:[%s16203_s7 + $0x19b0] sm:$0xff]   ;;  %v15597_v52 = vld [vmem:[%s16203_s7 + $0x1978] sm:$0xff]   ;;  %v797_v57 = vrot.slane %v326_v55, %v16260_v42 }
 0x3a4   : > { %v17145_v59 = vadd.f32 %v13962_v54, %v10752_v53  ;;  %14243 = vmatpush3.bf16.msra.mxu0 %v15562_v58  ;;  %v15598_v53 = vld [vmem:[%s16203_s7 + $0x19f8] sm:$0xff]   ;;  %v790_v58 = vcombine.high %v326_v55, %v326_v55  ;;  %v15637_v55 = vld [vmem:[%s16203_s7 + $0x1b00] sm:$0xff]  }
 0x3a5   : > { %14244 = vmatprep.subr.bf16.mxu0 %v15564_v61  ;;  %14265 = vmatpush3.bf16.msra.mxu1 %v15563_v60  ;;  %v15599_v54 = vld [vmem:[%s16203_s7 + $0x1938] sm:$0xff]   ;;  %v805_v60 = vcombine.high %v797_v57, %v797_v57 }
 0x3a6   : > { %14266 = vmatprep.subr.bf16.mxu1 %v15565_v62  ;;  %v15600_v56 = vld [vmem:[%s16203_s7 + $0x19b8] sm:$0xff]   ;;  %v804_v61 = vrot.slane %v790_v58, %v16260_v42  ;;  %v15603_v62 = vld [vmem:[%s16203_s7 + $0x1ac0] sm:$0xff]  }
 0x3a7   : > { %v1138_v1 = vpack.c.bf16 %v805_v60, %v805_v60  ;;  %v15638_v58 = vld [vmem:[%s16203_s7 + $0x1b80] sm:$0xff]   ;;  %v15639_v60 = vld [vmem:[%s16203_s7 + $0x1b48] sm:$0xff]  }
 0x3a8   : > { %14245 = vmatpush3.bf16.msra.mxu0 %v15566_v63  ;;  %v1137_v63 = vpack.c.bf16 %v797_v57, %v797_v57  ;;  %v806_v2 = vcombine.high %v804_v61, %v804_v61 }
 0x3a9   : > { %14274 = vmatprep.subr.bf16.mxu0 %v15569_v3  ;;  %14267 = vmatpush3.bf16.msra.mxu1 %v15567_v4  ;;  %v15605_v3 = vld [vmem:[%s16203_s7 + $0x1a80] sm:$0xff]   ;;  %v1139_v4 = vpack.c.bf16 %v804_v61, %v804_v61 }
 0x3aa   : > { %14296 = vmatprep.subr.bf16.mxu1 %v15570_v7  ;;  %v1140_v6 = vpack.c.bf16 %v806_v2, %v806_v2  ;;  %v15607_v7 = vld [vmem:[%s16203_s7 + $0x1ac8] sm:$0xff]   ;;  %v15644_v2 = vld [vmem:[%s16203_s7 + $0x1bd0] sm:$0xff]  }
 0x3ab   : > { %11310 = vmatmul.mubr.bf16.vlgmr.msra.gmra.mrb[96].mxu0 %v1133_v8  ;;  %v15608_v8 = vld [vmem:[%s16203_s7 + $0x1a08] sm:$0xff]  }
 0x3ac   : > { %14275 = vmatpush3.bf16.msra.mxu0 %v15571_v9  ;;  %11350 = vmatmul.mubr.bf16.vlgmr.msra.gmra.mrb[96].mxu1 %v1135_v13  ;;  %v15609_v9 = vld [vmem:[%s16203_s7 + $0x1a88] sm:$0xff]   ;;  %v15613_v13 = vld [vmem:[%s16203_s7 + $0x1a90] sm:$0xff]  }
 0x3ad   : > { %14276 = vmatprep.subr.bf16.mxu0 %v15573_v14  ;;  %14297 = vmatpush3.bf16.msra.mxu1 %v15572_v12  ;;  %v15612_v12 = vld [vmem:[%s16203_s7 + $0x1a10] sm:$0xff]   ;;  %v15614_v14 = vld [vmem:[%s16203_s7 + $0x1a58] sm:$0xff]  }
 0x3ae   : > { %14298 = vmatprep.subr.bf16.mxu1 %v15574_v16  ;;  %11389 = vmatprep.mubr.bf16.mxu0 %v1138_v1  ;;  %v15616_v16 = vld [vmem:[%s16203_s7 + $0x1a18] sm:$0xff]   ;;  %v15643_v1 = vld [vmem:[%s16203_s7 + $0x1b50] sm:$0xff]  }
 0x3af   : > { %11429 = vmatprep.mubr.bf16.mxu1 %v1140_v6  ;;  %v15648_v6 = vld [vmem:[%s16203_s7 + $0x1bd8] sm:$0xff]  }
 0x3b0   : > { %14277 = vmatpush3.bf16.msra.mxu0 %v15575_v17  ;;  %v15617_v17 = vld [vmem:[%s16203_s7 + $0x1a98] sm:$0xff]  }
 0x3b1   : > { %14278 = vmatprep.subr.bf16.mxu0 %v15577_v19  ;;  %14299 = vmatpush3.bf16.msra.mxu1 %v15576_v18  ;;  %v15618_v18 = vld [vmem:[%s16203_s7 + $0x1a60] sm:$0xff]  }
 0x3b2   : > { %14300 = vmatprep.subr.bf16.mxu1 %v15578_v20  ;;  %v15619_v19 = vld [vmem:[%s16203_s7 + $0x1ae0] sm:$0xff]  }
 0x3b3   : > { %v15620_v20 = vld [vmem:[%s16203_s7 + $0x1a20] sm:$0xff]  }
 0x3b4   : > { %14279 = vmatpush3.bf16.msra.mxu0 %v15579_v21  ;;  %v15621_v21 = vld [vmem:[%s16203_s7 + $0x1aa0] sm:$0xff]  }
 0x3b5   : > { %14280 = vmatprep.subr.bf16.mxu0 %v15581_v23  ;;  %14301 = vmatpush3.bf16.msra.mxu1 %v15580_v22  ;;  %v15622_v22 = vld [vmem:[%s16203_s7 + $0x1a68] sm:$0xff]  }
 0x3b6   : > { %14302 = vmatprep.subr.bf16.mxu1 %v15582_v24  ;;  %v15623_v24 = vld [vmem:[%s16203_s7 + $0x1ae8] sm:$0xff]  }
 0x3b8   : > { %14281 = vmatpush3.bf16.msra.mxu0 %v15583_v25 }
 0x3b9   : > { %14282 = vmatprep.subr.bf16.mxu0 %v15585_v27  ;;  %14303 = vmatpush3.bf16.msra.mxu1 %v15584_v26  ;;  %v15624_v26 = vld [vmem:[%s16203_s7 + $0x1a28] sm:$0xff]  }
 0x3ba   : > { %14304 = vmatprep.subr.bf16.mxu1 %v15586_v28 }
 0x3bc   : > { %14283 = vmatpush3.bf16.msra.mxu0 %v15587_v29 }
 0x3bd   : > { %14284 = vmatprep.subr.bf16.mxu0 %v15589_v31  ;;  %14305 = vmatpush3.bf16.msra.mxu1 %v15588_v30  ;;  %v15625_v31 = vld [vmem:[%s16203_s7 + $0x1aa8] sm:$0xff]  }
 0x3be   : > { %v13982_v32 = vpop.f32.mrb[72].mxu0  ;;  %14306 = vmatprep.subr.bf16.mxu1 %v15590_v33  ;;  %v15626_v33 = vld [vmem:[%s16203_s7 + $0x1a70] sm:$0xff]  }
 0x3bf   : > { %v13983_v34 = vpop.f32.mrb[73].mxu0  ;;  %v14004_v36 = vpop.f32.mrb[72].mxu1 }
 0x3c0   : > { %v13984_v37 = vadd.f32 %v13983_v34, %v13982_v32  ;;  %v13985_v38 = vpop.f32.mrb[74].mxu0  ;;  %v14005_v41 = vpop.f32.mrb[73].mxu1  ;;  %14285 = vmatpush3.bf16.msra.mxu0 %v15591_v35 }
 0x3c1   : > { %v13986_v43 = vpop.f32.mrb[75].mxu0  ;;  %v14006_v45 = vadd.f32 %v14005_v41, %v14004_v36  ;;  %v14007_v46 = vpop.f32.mrb[74].mxu1  ;;  %14286 = vmatprep.subr.bf16.mxu0 %v15593_v40  ;;  %14307 = vmatpush3.bf16.msra.mxu1 %v15592_v39  ;;  %v15628_v39 = vld [vmem:[%s16203_s7 + $0x1a30] sm:$0xff]   ;;  %v15630_v41 = vld [vmem:[%s16203_s7 + $0x1a78] sm:$0xff]  }
 0x3c2   : > { %v10832_v44 = vadd.f32 %v13984_v37, %v17145_v59  ;;  %v14008_v48 = vpop.f32.mrb[75].mxu1  ;;  %14308 = vmatprep.subr.bf16.mxu1 %v15594_v47  ;;  %v15602_v59 = vld [vmem:[%s16203_s7 + $0x1a40] sm:$0xff]   ;;  %v15627_v37 = vld [vmem:[%s16203_s7 + $0x1af0] sm:$0xff]  }
 0x3c3   : > { %v15629_v43 = vld [vmem:[%s16203_s7 + $0x1ab0] sm:$0xff]  }
 0x3c4   : > { %v17183_v50 = vadd.f32 %v14006_v45, %v10832_v44  ;;  %14287 = vmatpush3.bf16.msra.mxu0 %v15595_v49  ;;  %v15631_v44 = vld [vmem:[%s16203_s7 + $0x1af8] sm:$0xff]   ;;  %v327_v46 = vld [vmem:[%s16221_s27 + $0xd0] sm:$0xff]  ;;  %v15635_v49 = vld [vmem:[%s16203_s7 + $0x1b40] sm:$0xff]  }
 0x3c5   : > { %14288 = vmatprep.subr.bf16.mxu0 %v15597_v52  ;;  %14309 = vmatpush3.bf16.msra.mxu1 %v15596_v51  ;;  %v15632_v45 = vld [vmem:[%s16203_s7 + $0x1a38] sm:$0xff]   ;;  %v814_v47 = vrot.slane %v327_v46, %v16260_v42  ;;  %v807_v48 = vcombine.high %v327_v46, %v327_v46  ;;  %v15670_v46 = vld [vmem:[%s16203_s7 + $0x1c00] sm:$0xff]  }
 0x3c6   : > { %14310 = vmatprep.subr.bf16.mxu1 %v15598_v53  ;;  %v15636_v53 = vld [vmem:[%s16203_s7 + $0x1bc0] sm:$0xff]  }
 0x3c7   : > { %v822_v51 = vcombine.high %v814_v47, %v814_v47  ;;  %v821_v52 = vrot.slane %v807_v48, %v16260_v42 }
 0x3c8   : > { %14289 = vmatpush3.bf16.msra.mxu0 %v15599_v54  ;;  %v1141_v54 = vpack.c.bf16 %v814_v47, %v814_v47 }
 0x3c9   : > { %14318 = vmatprep.subr.bf16.mxu0 %v15602_v59  ;;  %14311 = vmatpush3.bf16.msra.mxu1 %v15600_v56  ;;  %v1142_v56 = vpack.c.bf16 %v822_v51, %v822_v51  ;;  %v823_v57 = vcombine.high %v821_v52, %v821_v52  ;;  %v1143_v59 = vpack.c.bf16 %v821_v52, %v821_v52  ;;  %v15672_v51 = vld [vmem:[%s16203_s7 + $0x1c48] sm:$0xff]  }
 0x3ca   : > { %14340 = vmatprep.subr.bf16.mxu1 %v15603_v62  ;;  %v15640_v62 = vld [vmem:[%s16203_s7 + $0x1bc8] sm:$0xff]  }
 0x3cb   : > { %11390 = vmatmul.mubr.bf16.vlgmr.msra.gmra.mrb[100].mxu0 %v1137_v63  ;;  %v1144_v61 = vpack.c.bf16 %v823_v57, %v823_v57  ;;  %v15641_v63 = vld [vmem:[%s16203_s7 + $0x1b08] sm:$0xff]   ;;  %v15677_v57 = vld [vmem:[%s16203_s7 + $0x1cd0] sm:$0xff]  }
 0x3cc   : > { %14319 = vmatpush3.bf16.msra.mxu0 %v15604_v0  ;;  %11430 = vmatmul.mubr.bf16.vlgmr.msra.gmra.mrb[100].mxu1 %v1139_v4  ;;  %v15642_v0 = vld [vmem:[%s16203_s7 + $0x1b88] sm:$0xff]   ;;  %v15646_v4 = vld [vmem:[%s16203_s7 + $0x1b90] sm:$0xff]  }
 0x3cd   : > { %14320 = vmatprep.subr.bf16.mxu0 %v15606_v5  ;;  %14341 = vmatpush3.bf16.msra.mxu1 %v15605_v3  ;;  %v15645_v3 = vld [vmem:[%s16203_s7 + $0x1b10] sm:$0xff]   ;;  %v15647_v5 = vld [vmem:[%s16203_s7 + $0x1b58] sm:$0xff]  }
 0x3ce   : > { %14342 = vmatprep.subr.bf16.mxu1 %v15607_v7  ;;  %11469 = vmatprep.mubr.bf16.mxu0 %v1142_v56  ;;  %v15649_v7 = vld [vmem:[%s16203_s7 + $0x1b18] sm:$0xff]   ;;  %v15676_v56 = vld [vmem:[%s16203_s7 + $0x1c50] sm:$0xff]  }
 0x3cf   : > { %11509 = vmatprep.mubr.bf16.mxu1 %v1144_v61  ;;  %v15681_v61 = vld [vmem:[%s16203_s7 + $0x1cd8] sm:$0xff]  }
 0x3d0   : > { %14321 = vmatpush3.bf16.msra.mxu0 %v15608_v8  ;;  %v15650_v8 = vld [vmem:[%s16203_s7 + $0x1b98] sm:$0xff]  }
 0x3d1   : > { %14322 = vmatprep.subr.bf16.mxu0 %v15610_v10  ;;  %14343 = vmatpush3.bf16.msra.mxu1 %v15609_v9  ;;  %v15651_v9 = vld [vmem:[%s16203_s7 + $0x1b60] sm:$0xff]  }
 0x3d2   : > { %14344 = vmatprep.subr.bf16.mxu1 %v15611_v11  ;;  %v15652_v10 = vld [vmem:[%s16203_s7 + $0x1be0] sm:$0xff]  }
 0x3d3   : > { %v15653_v11 = vld [vmem:[%s16203_s7 + $0x1b20] sm:$0xff]  }
 0x3d4   : > { %14323 = vmatpush3.bf16.msra.mxu0 %v15612_v12  ;;  %v15654_v12 = vld [vmem:[%s16203_s7 + $0x1ba0] sm:$0xff]  }
 0x3d5   : > { %14324 = vmatprep.subr.bf16.mxu0 %v15614_v14  ;;  %14345 = vmatpush3.bf16.msra.mxu1 %v15613_v13  ;;  %v15655_v13 = vld [vmem:[%s16203_s7 + $0x1b68] sm:$0xff]  }
 0x3d6   : > { %14346 = vmatprep.subr.bf16.mxu1 %v15615_v15  ;;  %v15656_v15 = vld [vmem:[%s16203_s7 + $0x1be8] sm:$0xff]  }
 0x3d8   : > { %14325 = vmatpush3.bf16.msra.mxu0 %v15616_v16 }
 0x3d9   : > { %14326 = vmatprep.subr.bf16.mxu0 %v15618_v18  ;;  %14347 = vmatpush3.bf16.msra.mxu1 %v15617_v17  ;;  %v15657_v17 = vld [vmem:[%s16203_s7 + $0x1b28] sm:$0xff]  }
 0x3da   : > { %14348 = vmatprep.subr.bf16.mxu1 %v15619_v19 }
 0x3dc   : > { %14327 = vmatpush3.bf16.msra.mxu0 %v15620_v20 }
 0x3dd   : > { %14328 = vmatprep.subr.bf16.mxu0 %v15622_v22  ;;  %14349 = vmatpush3.bf16.msra.mxu1 %v15621_v21  ;;  %v15658_v21 = vld [vmem:[%s16203_s7 + $0x1ba8] sm:$0xff]   ;;  %v15659_v22 = vld [vmem:[%s16203_s7 + $0x1b70] sm:$0xff]  }
 0x3de   : > { %v14026_v23 = vpop.f32.mrb[76].mxu0  ;;  %14350 = vmatprep.subr.bf16.mxu1 %v15623_v24 }
 0x3df   : > { %v14027_v25 = vpop.f32.mrb[77].mxu0  ;;  %v14048_v27 = vpop.f32.mrb[76].mxu1 }
 0x3e0   : > { %v14028_v28 = vadd.f32 %v14027_v25, %v14026_v23  ;;  %v14029_v29 = vpop.f32.mrb[78].mxu0  ;;  %v14049_v30 = vpop.f32.mrb[77].mxu1  ;;  %14329 = vmatpush3.bf16.msra.mxu0 %v15624_v26 }
 0x3e1   : > { %v14030_v32 = vpop.f32.mrb[79].mxu0  ;;  %v14050_v35 = vadd.f32 %v14049_v30, %v14048_v27  ;;  %v14051_v36 = vpop.f32.mrb[78].mxu1  ;;  %14330 = vmatprep.subr.bf16.mxu0 %v15626_v33  ;;  %14351 = vmatpush3.bf16.msra.mxu1 %v15625_v31  ;;  %v15661_v30 = vld [vmem:[%s16203_s7 + $0x1b30] sm:$0xff]   ;;  %v15663_v33 = vld [vmem:[%s16203_s7 + $0x1b78] sm:$0xff]  }
 0x3e2   : > { %v10912_v34 = vadd.f32 %v14028_v28, %v17183_v50  ;;  %v14052_v38 = vpop.f32.mrb[79].mxu1  ;;  %14352 = vmatprep.subr.bf16.mxu1 %v15627_v37  ;;  %v15633_v50 = vld [vmem:[%s16203_s7 + $0x1ab8] sm:$0xff]   ;;  %v15660_v28 = vld [vmem:[%s16203_s7 + $0x1bf0] sm:$0xff]  }
 0x3e3   : > { %v15662_v32 = vld [vmem:[%s16203_s7 + $0x1bb0] sm:$0xff]  }
 0x3e4   : > { %v17221_v40 = vadd.f32 %v14050_v35, %v10912_v34  ;;  %14331 = vmatpush3.bf16.msra.mxu0 %v15628_v39  ;;  %v15664_v34 = vld [vmem:[%s16203_s7 + $0x1bf8] sm:$0xff]   ;;  %v15668_v39 = vld [vmem:[%s16203_s7 + $0x1c40] sm:$0xff]  }
 0x3e5   : > { %14332 = vmatprep.subr.bf16.mxu0 %v15630_v41  ;;  %14353 = vmatpush3.bf16.msra.mxu1 %v15629_v43  ;;  %v15665_v35 = vld [vmem:[%s16203_s7 + $0x1b38] sm:$0xff]  }
 0x3e6   : > { %14354 = vmatprep.subr.bf16.mxu1 %v15631_v44  ;;  %v328_v36 = vld [vmem:[%s16221_s27 + $0xd8] sm:$0xff]  ;;  %v15669_v44 = vld [vmem:[%s16203_s7 + $0x1cc0] sm:$0xff]  }
 0x3e7   : > { %v831_v37 = vrot.slane %v328_v36, %v16260_v42  ;;  %v824_v38 = vcombine.high %v328_v36, %v328_v36  ;;  %v15703_v36 = vld [vmem:[%s16203_s7 + $0x1d00] sm:$0xff]  }
 0x3e8   : > { %14333 = vmatpush3.bf16.msra.mxu0 %v15632_v45 }
 0x3e9   : > { %14362 = vmatprep.subr.bf16.mxu0 %v15635_v49  ;;  %14355 = vmatpush3.bf16.msra.mxu1 %v15633_v50  ;;  %v839_v41 = vcombine.high %v831_v37, %v831_v37  ;;  %v838_v43 = vrot.slane %v824_v38, %v16260_v42  ;;  %v1145_v45 = vpack.c.bf16 %v831_v37, %v831_v37  ;;  %v15671_v49 = vld [vmem:[%s16203_s7 + $0x1c80] sm:$0xff]  }
 0x3ea   : > { %14384 = vmatprep.subr.bf16.mxu1 %v15636_v53  ;;  %v15673_v53 = vld [vmem:[%s16203_s7 + $0x1cc8] sm:$0xff]  }
 0x3eb   : > { %11470 = vmatmul.mubr.bf16.vlgmr.msra.gmra.mrb[104].mxu0 %v1141_v54  ;;  %v1146_v47 = vpack.c.bf16 %v839_v41, %v839_v41  ;;  %v840_v48 = vcombine.high %v838_v43, %v838_v43  ;;  %v1147_v50 = vpack.c.bf16 %v838_v43, %v838_v43  ;;  %v15674_v54 = vld [vmem:[%s16203_s7 + $0x1c08] sm:$0xff]  }
 0x3ec   : > { %14363 = vmatpush3.bf16.msra.mxu0 %v15637_v55  ;;  %11510 = vmatmul.mubr.bf16.vlgmr.msra.gmra.mrb[104].mxu1 %v1143_v59  ;;  %v15675_v55 = vld [vmem:[%s16203_s7 + $0x1c88] sm:$0xff]   ;;  %v15679_v59 = vld [vmem:[%s16203_s7 + $0x1c90] sm:$0xff]  }
 0x3ed   : > { %14364 = vmatprep.subr.bf16.mxu0 %v15639_v60  ;;  %14385 = vmatpush3.bf16.msra.mxu1 %v15638_v58  ;;  %v1148_v52 = vpack.c.bf16 %v840_v48, %v840_v48  ;;  %v15678_v58 = vld [vmem:[%s16203_s7 + $0x1c10] sm:$0xff]   ;;  %v15680_v60 = vld [vmem:[%s16203_s7 + $0x1c58] sm:$0xff]   ;;  %v15705_v41 = vld [vmem:[%s16203_s7 + $0x1d48] sm:$0xff]  }
 0x3ee   : > { %14386 = vmatprep.subr.bf16.mxu1 %v15640_v62  ;;  %11549 = vmatprep.mubr.bf16.mxu0 %v1146_v47  ;;  %v15682_v62 = vld [vmem:[%s16203_s7 + $0x1c18] sm:$0xff]   ;;  %v15709_v47 = vld [vmem:[%s16203_s7 + $0x1d50] sm:$0xff]  }
 0x3ef   : > { %11589 = vmatprep.mubr.bf16.mxu1 %v1148_v52  ;;  %v15710_v48 = vld [vmem:[%s16203_s7 + $0x1dd0] sm:$0xff]   ;;  %v15714_v52 = vld [vmem:[%s16203_s7 + $0x1dd8] sm:$0xff]  }
 0x3f0   : > { %14365 = vmatpush3.bf16.msra.mxu0 %v15641_v63  ;;  %v15683_v63 = vld [vmem:[%s16203_s7 + $0x1c98] sm:$0xff]  }
 0x3f1   : > { %14366 = vmatprep.subr.bf16.mxu0 %v15643_v1  ;;  %14387 = vmatpush3.bf16.msra.mxu1 %v15642_v0  ;;  %v15684_v0 = vld [vmem:[%s16203_s7 + $0x1c60] sm:$0xff]  }
 0x3f2   : > { %14388 = vmatprep.subr.bf16.mxu1 %v15644_v2  ;;  %v15685_v1 = vld [vmem:[%s16203_s7 + $0x1ce0] sm:$0xff]  }
 0x3f3   : > { %v15686_v2 = vld [vmem:[%s16203_s7 + $0x1c20] sm:$0xff]  }
 0x3f4   : > { %14367 = vmatpush3.bf16.msra.mxu0 %v15645_v3  ;;  %v15687_v3 = vld [vmem:[%s16203_s7 + $0x1ca0] sm:$0xff]  }
 0x3f5   : > { %14368 = vmatprep.subr.bf16.mxu0 %v15647_v5  ;;  %14389 = vmatpush3.bf16.msra.mxu1 %v15646_v4  ;;  %v15688_v4 = vld [vmem:[%s16203_s7 + $0x1c68] sm:$0xff]  }
 0x3f6   : > { %14390 = vmatprep.subr.bf16.mxu1 %v15648_v6  ;;  %v15689_v6 = vld [vmem:[%s16203_s7 + $0x1ce8] sm:$0xff]  }
 0x3f8   : > { %14369 = vmatpush3.bf16.msra.mxu0 %v15649_v7 }
 0x3f9   : > { %14370 = vmatprep.subr.bf16.mxu0 %v15651_v9  ;;  %14391 = vmatpush3.bf16.msra.mxu1 %v15650_v8  ;;  %v15690_v8 = vld [vmem:[%s16203_s7 + $0x1c28] sm:$0xff]  }
 0x3fa   : > { %14392 = vmatprep.subr.bf16.mxu1 %v15652_v10 }
 0x3fc   : > { %14371 = vmatpush3.bf16.msra.mxu0 %v15653_v11 }
 0x3fd   : > { %14372 = vmatprep.subr.bf16.mxu0 %v15655_v13  ;;  %14393 = vmatpush3.bf16.msra.mxu1 %v15654_v12  ;;  %v15691_v12 = vld [vmem:[%s16203_s7 + $0x1ca8] sm:$0xff]   ;;  %v15692_v13 = vld [vmem:[%s16203_s7 + $0x1c70] sm:$0xff]  }
 0x3fe   : > { %v14070_v14 = vpop.f32.mrb[80].mxu0  ;;  %14394 = vmatprep.subr.bf16.mxu1 %v15656_v15 }
 0x3ff   : > { %v14071_v16 = vpop.f32.mrb[81].mxu0  ;;  %v14092_v18 = vpop.f32.mrb[80].mxu1 }
 0x400   : > { %v14072_v19 = vadd.f32 %v14071_v16, %v14070_v14  ;;  %v14073_v20 = vpop.f32.mrb[82].mxu0  ;;  %v14093_v23 = vpop.f32.mrb[81].mxu1  ;;  %14373 = vmatpush3.bf16.msra.mxu0 %v15657_v17 }
 0x401   : > { %v14074_v24 = vpop.f32.mrb[83].mxu0  ;;  %v14094_v26 = vadd.f32 %v14093_v23, %v14092_v18  ;;  %v14095_v27 = vpop.f32.mrb[82].mxu1  ;;  %14374 = vmatprep.subr.bf16.mxu0 %v15659_v22  ;;  %14395 = vmatpush3.bf16.msra.mxu1 %v15658_v21  ;;  %v15694_v21 = vld [vmem:[%s16203_s7 + $0x1c30] sm:$0xff]  }
 0x402   : > { %v10992_v25 = vadd.f32 %v14072_v19, %v17221_v40  ;;  %v14096_v29 = vpop.f32.mrb[83].mxu1  ;;  %14396 = vmatprep.subr.bf16.mxu1 %v15660_v28  ;;  %v15666_v40 = vld [vmem:[%s16203_s7 + $0x1bb8] sm:$0xff]   ;;  %v15693_v19 = vld [vmem:[%s16203_s7 + $0x1cf0] sm:$0xff]  }
 0x403   : > { %v15695_v23 = vld [vmem:[%s16203_s7 + $0x1cb0] sm:$0xff]   ;;  %v15696_v24 = vld [vmem:[%s16203_s7 + $0x1c78] sm:$0xff]  }
 0x404   : > { %v17259_v31 = vadd.f32 %v14094_v26, %v10992_v25  ;;  %14375 = vmatpush3.bf16.msra.mxu0 %v15661_v30  ;;  %v15697_v25 = vld [vmem:[%s16203_s7 + $0x1cf8] sm:$0xff]  }
 0x405   : > { %14376 = vmatprep.subr.bf16.mxu0 %v15663_v33  ;;  %14397 = vmatpush3.bf16.msra.mxu1 %v15662_v32  ;;  %v15698_v26 = vld [vmem:[%s16203_s7 + $0x1c38] sm:$0xff]  }
 0x406   : > { %14398 = vmatprep.subr.bf16.mxu1 %v15664_v34  ;;  %v329_v27 = vld [vmem:[%s16221_s27 + $0xe0] sm:$0xff] }
 0x407   : > { %v15699_v28 = vld [vmem:[%s16203_s7 + $0x1cb8] sm:$0xff]   ;;  %v848_v29 = vrot.slane %v329_v27, %v16260_v42  ;;  %v841_v30 = vcombine.high %v329_v27, %v329_v27  ;;  %v15702_v34 = vld [vmem:[%s16203_s7 + $0x1dc0] sm:$0xff]  }
 0x408   : > { %14377 = vmatpush3.bf16.msra.mxu0 %v15665_v35  ;;  %v15736_v27 = vld [vmem:[%s16203_s7 + $0x1e00] sm:$0xff]  }
 0x409   : > { %14406 = vmatprep.subr.bf16.mxu0 %v15668_v39  ;;  %14399 = vmatpush3.bf16.msra.mxu1 %v15666_v40  ;;  %v856_v32 = vcombine.high %v848_v29, %v848_v29  ;;  %v855_v33 = vrot.slane %v841_v30, %v16260_v42  ;;  %v1149_v35 = vpack.c.bf16 %v848_v29, %v848_v29  ;;  %v15704_v39 = vld [vmem:[%s16203_s7 + $0x1d80] sm:$0xff]  }
 0x40a   : > { %14428 = vmatprep.subr.bf16.mxu1 %v15669_v44  ;;  %v15706_v44 = vld [vmem:[%s16203_s7 + $0x1dc8] sm:$0xff]   ;;  %v15737_v30 = vld [vmem:[%s16203_s7 + $0x1e80] sm:$0xff]  }
 0x40b   : > { %11550 = vmatmul.mubr.bf16.vlgmr.msra.gmra.mrb[108].mxu0 %v1145_v45  ;;  %v1150_v37 = vpack.c.bf16 %v856_v32, %v856_v32  ;;  %v857_v38 = vcombine.high %v855_v33, %v855_v33  ;;  %v1151_v40 = vpack.c.bf16 %v855_v33, %v855_v33  ;;  %v15707_v45 = vld [vmem:[%s16203_s7 + $0x1d08] sm:$0xff]  }
 0x40c   : > { %14407 = vmatpush3.bf16.msra.mxu0 %v15670_v46  ;;  %11590 = vmatmul.mubr.bf16.vlgmr.msra.gmra.mrb[108].mxu1 %v1147_v50  ;;  %v15708_v46 = vld [vmem:[%s16203_s7 + $0x1d88] sm:$0xff]   ;;  %v15712_v50 = vld [vmem:[%s16203_s7 + $0x1d90] sm:$0xff]  }
 0x40d   : > { %14408 = vmatprep.subr.bf16.mxu0 %v15672_v51  ;;  %14429 = vmatpush3.bf16.msra.mxu1 %v15671_v49  ;;  %v1152_v43 = vpack.c.bf16 %v857_v38, %v857_v38  ;;  %v15711_v49 = vld [vmem:[%s16203_s7 + $0x1d10] sm:$0xff]   ;;  %v15713_v51 = vld [vmem:[%s16203_s7 + $0x1d58] sm:$0xff]   ;;  %v15738_v32 = vld [vmem:[%s16203_s7 + $0x1e48] sm:$0xff]  }
 0x40e   : > { %14430 = vmatprep.subr.bf16.mxu1 %v15673_v53  ;;  %11629 = vmatprep.mubr.bf16.mxu0 %v1150_v37  ;;  %v15715_v53 = vld [vmem:[%s16203_s7 + $0x1d18] sm:$0xff]   ;;  %v15742_v37 = vld [vmem:[%s16203_s7 + $0x1e50] sm:$0xff]  }
 0x40f   : > { %11669 = vmatprep.mubr.bf16.mxu1 %v1152_v43  ;;  %v15743_v38 = vld [vmem:[%s16203_s7 + $0x1ed0] sm:$0xff]   ;;  %v15747_v43 = vld [vmem:[%s16203_s7 + $0x1ed8] sm:$0xff]  }
 0x410   : > { %14409 = vmatpush3.bf16.msra.mxu0 %v15674_v54  ;;  %v15716_v54 = vld [vmem:[%s16203_s7 + $0x1d98] sm:$0xff]  }
 0x411   : > { %14410 = vmatprep.subr.bf16.mxu0 %v15676_v56  ;;  %14431 = vmatpush3.bf16.msra.mxu1 %v15675_v55  ;;  %v15717_v55 = vld [vmem:[%s16203_s7 + $0x1d60] sm:$0xff]  }
 0x412   : > { %14432 = vmatprep.subr.bf16.mxu1 %v15677_v57  ;;  %v15718_v56 = vld [vmem:[%s16203_s7 + $0x1de0] sm:$0xff]  }
 0x413   : > { %v15719_v57 = vld [vmem:[%s16203_s7 + $0x1d20] sm:$0xff]  }
 0x414   : > { %14411 = vmatpush3.bf16.msra.mxu0 %v15678_v58  ;;  %v15720_v58 = vld [vmem:[%s16203_s7 + $0x1da0] sm:$0xff]  }
 0x415   : > { %14412 = vmatprep.subr.bf16.mxu0 %v15680_v60  ;;  %14433 = vmatpush3.bf16.msra.mxu1 %v15679_v59  ;;  %v15721_v59 = vld [vmem:[%s16203_s7 + $0x1d68] sm:$0xff]  }
 0x416   : > { %14434 = vmatprep.subr.bf16.mxu1 %v15681_v61  ;;  %v15722_v61 = vld [vmem:[%s16203_s7 + $0x1de8] sm:$0xff]  }
 0x418   : > { %14413 = vmatpush3.bf16.msra.mxu0 %v15682_v62 }
 0x419   : > { %14414 = vmatprep.subr.bf16.mxu0 %v15684_v0  ;;  %14435 = vmatpush3.bf16.msra.mxu1 %v15683_v63  ;;  %v15723_v63 = vld [vmem:[%s16203_s7 + $0x1d28] sm:$0xff]  }
 0x41a   : > { %14436 = vmatprep.subr.bf16.mxu1 %v15685_v1 }
 0x41c   : > { %14415 = vmatpush3.bf16.msra.mxu0 %v15686_v2 }
 0x41d   : > { %14416 = vmatprep.subr.bf16.mxu0 %v15688_v4  ;;  %14437 = vmatpush3.bf16.msra.mxu1 %v15687_v3  ;;  %v15724_v4 = vld [vmem:[%s16203_s7 + $0x1da8] sm:$0xff]  }
 0x41e   : > { %v14114_v5 = vpop.f32.mrb[84].mxu0  ;;  %14438 = vmatprep.subr.bf16.mxu1 %v15689_v6  ;;  %v15725_v6 = vld [vmem:[%s16203_s7 + $0x1d70] sm:$0xff]  }
 0x41f   : > { %v14115_v7 = vpop.f32.mrb[85].mxu0  ;;  %v14136_v9 = vpop.f32.mrb[84].mxu1 }
 0x420   : > { %v14116_v10 = vadd.f32 %v14115_v7, %v14114_v5  ;;  %v14117_v11 = vpop.f32.mrb[86].mxu0  ;;  %v14137_v14 = vpop.f32.mrb[85].mxu1  ;;  %14417 = vmatpush3.bf16.msra.mxu0 %v15690_v8 }
 0x421   : > { %v14118_v15 = vpop.f32.mrb[87].mxu0  ;;  %v14138_v17 = vadd.f32 %v14137_v14, %v14136_v9  ;;  %v14139_v18 = vpop.f32.mrb[86].mxu1  ;;  %14418 = vmatprep.subr.bf16.mxu0 %v15692_v13  ;;  %14439 = vmatpush3.bf16.msra.mxu1 %v15691_v12  ;;  %v15727_v12 = vld [vmem:[%s16203_s7 + $0x1d30] sm:$0xff]   ;;  %v15729_v14 = vld [vmem:[%s16203_s7 + $0x1d78] sm:$0xff]  }
 0x422   : > { %v11072_v16 = vadd.f32 %v14116_v10, %v17259_v31  ;;  %v14140_v20 = vpop.f32.mrb[87].mxu1  ;;  %14440 = vmatprep.subr.bf16.mxu1 %v15693_v19  ;;  %v15701_v31 = vld [vmem:[%s16203_s7 + $0x1d40] sm:$0xff]   ;;  %v15726_v10 = vld [vmem:[%s16203_s7 + $0x1df0] sm:$0xff]  }
 0x423   : > { %v15728_v15 = vld [vmem:[%s16203_s7 + $0x1db0] sm:$0xff]   ;;  %v330_v18 = vld [vmem:[%s16221_s27 + $0xe8] sm:$0xff] }
 0x424   : > { %v17297_v22 = vadd.f32 %v14138_v17, %v11072_v16  ;;  %14419 = vmatpush3.bf16.msra.mxu0 %v15694_v21  ;;  %v15730_v16 = vld [vmem:[%s16203_s7 + $0x1df8] sm:$0xff]   ;;  %v865_v19 = vrot.slane %v330_v18, %v16260_v42  ;;  %v858_v20 = vcombine.high %v330_v18, %v330_v18  ;;  %v15734_v21 = vld [vmem:[%s16203_s7 + $0x1e40] sm:$0xff]  }
 0x425   : > { %14420 = vmatprep.subr.bf16.mxu0 %v15696_v24  ;;  %14441 = vmatpush3.bf16.msra.mxu1 %v15695_v23  ;;  %v15731_v17 = vld [vmem:[%s16203_s7 + $0x1d38] sm:$0xff]  }
 0x426   : > { %14442 = vmatprep.subr.bf16.mxu1 %v15697_v25  ;;  %v873_v23 = vcombine.high %v865_v19, %v865_v19  ;;  %v872_v24 = vrot.slane %v858_v20, %v16260_v42  ;;  %v15735_v25 = vld [vmem:[%s16203_s7 + $0x1ec0] sm:$0xff]  }
 0x427   : > { %v15769_v20 = vld [vmem:[%s16203_s7 + $0x1f00] sm:$0xff]  }
 0x428   : > { %14421 = vmatpush3.bf16.msra.mxu0 %v15698_v26  ;;  %v1153_v26 = vpack.c.bf16 %v865_v19, %v865_v19  ;;  %v874_v29 = vcombine.high %v872_v24, %v872_v24 }
 0x429   : > { %14450 = vmatprep.subr.bf16.mxu0 %v15701_v31  ;;  %14443 = vmatpush3.bf16.msra.mxu1 %v15699_v28  ;;  %v1154_v28 = vpack.c.bf16 %v873_v23, %v873_v23  ;;  %v1155_v31 = vpack.c.bf16 %v872_v24, %v872_v24  ;;  %v15770_v24 = vld [vmem:[%s16203_s7 + $0x1f80] sm:$0xff]  }
 0x42a   : > { %14472 = vmatprep.subr.bf16.mxu1 %v15702_v34  ;;  %v1156_v33 = vpack.c.bf16 %v874_v29, %v874_v29  ;;  %v15739_v34 = vld [vmem:[%s16203_s7 + $0x1ec8] sm:$0xff]   ;;  %v15776_v29 = vld [vmem:[%s16203_s7 + $0x1fd0] sm:$0xff]  }
 0x42b   : > { %11630 = vmatmul.mubr.bf16.vlgmr.msra.gmra.mrb[112].mxu0 %v1149_v35  ;;  %v15740_v35 = vld [vmem:[%s16203_s7 + $0x1e08] sm:$0xff]  }
 0x42c   : > { %14451 = vmatpush3.bf16.msra.mxu0 %v15703_v36  ;;  %11670 = vmatmul.mubr.bf16.vlgmr.msra.gmra.mrb[112].mxu1 %v1151_v40  ;;  %v15741_v36 = vld [vmem:[%s16203_s7 + $0x1e88] sm:$0xff]   ;;  %v15745_v40 = vld [vmem:[%s16203_s7 + $0x1e90] sm:$0xff]  }
 0x42d   : > { %14452 = vmatprep.subr.bf16.mxu0 %v15705_v41  ;;  %14473 = vmatpush3.bf16.msra.mxu1 %v15704_v39  ;;  %v15744_v39 = vld [vmem:[%s16203_s7 + $0x1e10] sm:$0xff]   ;;  %v15746_v41 = vld [vmem:[%s16203_s7 + $0x1e58] sm:$0xff]  }
 0x42e   : > { %14474 = vmatprep.subr.bf16.mxu1 %v15706_v44  ;;  %11709 = vmatprep.mubr.bf16.mxu0 %v1154_v28  ;;  %v15748_v44 = vld [vmem:[%s16203_s7 + $0x1e18] sm:$0xff]   ;;  %v15774_v28 = vld [vmem:[%s16203_s7 + $0x1f88] sm:$0xff]  }
 0x42f   : > { %11749 = vmatprep.mubr.bf16.mxu1 %v1156_v33  ;;  %v15780_v33 = vld [vmem:[%s16203_s7 + $0x1fd8] sm:$0xff]  }
 0x430   : > { %14453 = vmatpush3.bf16.msra.mxu0 %v15707_v45  ;;  %v15749_v45 = vld [vmem:[%s16203_s7 + $0x1e98] sm:$0xff]  }
 0x431   : > { %14454 = vmatprep.subr.bf16.mxu0 %v15709_v47  ;;  %14475 = vmatpush3.bf16.msra.mxu1 %v15708_v46  ;;  %v15750_v46 = vld [vmem:[%s16203_s7 + $0x1e60] sm:$0xff]  }
 0x432   : > { %14476 = vmatprep.subr.bf16.mxu1 %v15710_v48  ;;  %v15751_v47 = vld [vmem:[%s16203_s7 + $0x1ee0] sm:$0xff]  }
 0x433   : > { %v15752_v48 = vld [vmem:[%s16203_s7 + $0x1e20] sm:$0xff]  }
 0x434   : > { %14455 = vmatpush3.bf16.msra.mxu0 %v15711_v49  ;;  %v15753_v49 = vld [vmem:[%s16203_s7 + $0x1ea0] sm:$0xff]  }
 0x435   : > { %14456 = vmatprep.subr.bf16.mxu0 %v15713_v51  ;;  %14477 = vmatpush3.bf16.msra.mxu1 %v15712_v50  ;;  %v15754_v50 = vld [vmem:[%s16203_s7 + $0x1e68] sm:$0xff]  }
 0x436   : > { %14478 = vmatprep.subr.bf16.mxu1 %v15714_v52  ;;  %v15755_v52 = vld [vmem:[%s16203_s7 + $0x1ee8] sm:$0xff]  }
 0x438   : > { %14457 = vmatpush3.bf16.msra.mxu0 %v15715_v53 }
 0x439   : > { %14458 = vmatprep.subr.bf16.mxu0 %v15717_v55  ;;  %14479 = vmatpush3.bf16.msra.mxu1 %v15716_v54  ;;  %v15756_v54 = vld [vmem:[%s16203_s7 + $0x1e28] sm:$0xff]  }
 0x43a   : > { %14480 = vmatprep.subr.bf16.mxu1 %v15718_v56 }
 0x43c   : > { %14459 = vmatpush3.bf16.msra.mxu0 %v15719_v57 }
 0x43d   : > { %14460 = vmatprep.subr.bf16.mxu0 %v15721_v59  ;;  %14481 = vmatpush3.bf16.msra.mxu1 %v15720_v58  ;;  %v15757_v58 = vld [vmem:[%s16203_s7 + $0x1ea8] sm:$0xff]   ;;  %v15758_v59 = vld [vmem:[%s16203_s7 + $0x1e70] sm:$0xff]  }
 0x43e   : > { %v14158_v60 = vpop.f32.mrb[88].mxu0  ;;  %14482 = vmatprep.subr.bf16.mxu1 %v15722_v61 }
 0x43f   : > { %v14159_v62 = vpop.f32.mrb[89].mxu0  ;;  %v14180_v0 = vpop.f32.mrb[88].mxu1 }
 0x440   : > { %v14160_v1 = vadd.f32 %v14159_v62, %v14158_v60  ;;  %v14161_v2 = vpop.f32.mrb[90].mxu0  ;;  %v14181_v3 = vpop.f32.mrb[89].mxu1  ;;  %14461 = vmatpush3.bf16.msra.mxu0 %v15723_v63 }
 0x441   : > { %v14162_v5 = vpop.f32.mrb[91].mxu0  ;;  %v14182_v8 = vadd.f32 %v14181_v3, %v14180_v0  ;;  %v14183_v9 = vpop.f32.mrb[90].mxu1  ;;  %14462 = vmatprep.subr.bf16.mxu0 %v15725_v6  ;;  %14483 = vmatpush3.bf16.msra.mxu1 %v15724_v4  ;;  %v15760_v3 = vld [vmem:[%s16203_s7 + $0x1e30] sm:$0xff]   ;;  %v15762_v6 = vld [vmem:[%s16203_s7 + $0x1e78] sm:$0xff]  }
 0x442   : > { %v11152_v7 = vadd.f32 %v14160_v1, %v17297_v22  ;;  %v14184_v11 = vpop.f32.mrb[91].mxu1  ;;  %14484 = vmatprep.subr.bf16.mxu1 %v15726_v10  ;;  %v15732_v22 = vld [vmem:[%s16203_s7 + $0x1db8] sm:$0xff]   ;;  %v15759_v1 = vld [vmem:[%s16203_s7 + $0x1ef0] sm:$0xff]  }
 0x443   : > { %v15761_v5 = vld [vmem:[%s16203_s7 + $0x1eb0] sm:$0xff]  }
 0x444   : > { %v17335_v13 = vadd.f32 %v14182_v8, %v11152_v7  ;;  %14463 = vmatpush3.bf16.msra.mxu0 %v15727_v12  ;;  %v15763_v7 = vld [vmem:[%s16203_s7 + $0x1ef8] sm:$0xff]   ;;  %v331_v9 = vld [vmem:[%s16221_s27 + $0xf0] sm:$0xff]  ;;  %v15767_v12 = vld [vmem:[%s16203_s7 + $0x1f40] sm:$0xff]  }
 0x445   : > { %14464 = vmatprep.subr.bf16.mxu0 %v15729_v14  ;;  %14485 = vmatpush3.bf16.msra.mxu1 %v15728_v15  ;;  %v15764_v8 = vld [vmem:[%s16203_s7 + $0x1e38] sm:$0xff]   ;;  %v882_v10 = vrot.slane %v331_v9, %v16260_v42  ;;  %v875_v11 = vcombine.high %v331_v9, %v331_v9 }
 0x446   : > { %14486 = vmatprep.subr.bf16.mxu1 %v15730_v16  ;;  %v15768_v16 = vld [vmem:[%s16203_s7 + $0x1fc0] sm:$0xff]  }
 0x447   : > { %v890_v14 = vcombine.high %v882_v10, %v882_v10  ;;  %v889_v15 = vrot.slane %v875_v11, %v16260_v42 }
 0x448   : > { %14465 = vmatpush3.bf16.msra.mxu0 %v15731_v17  ;;  %v1157_v17 = vpack.c.bf16 %v882_v10, %v882_v10 }
 0x449   : > { %14494 = vmatprep.subr.bf16.mxu0 %v15734_v21  ;;  %14487 = vmatpush3.bf16.msra.mxu1 %v15732_v22  ;;  %v1158_v18 = vpack.c.bf16 %v890_v14, %v890_v14  ;;  %v891_v19 = vcombine.high %v889_v15, %v889_v15  ;;  %v1159_v21 = vpack.c.bf16 %v889_v15, %v889_v15  ;;  %v15771_v22 = vld [vmem:[%s16203_s7 + $0x1f48] sm:$0xff]  }
 0x44a   : > { %14516 = vmatprep.subr.bf16.mxu1 %v15735_v25  ;;  %v15772_v25 = vld [vmem:[%s16203_s7 + $0x1fc8] sm:$0xff]  }
 0x44b   : > { %11710 = vmatmul.mubr.bf16.vlgmr.msra.gmra.mrb[116].mxu0 %v1153_v26  ;;  %v1160_v23 = vpack.c.bf16 %v891_v19, %v891_v19  ;;  %v15773_v26 = vld [vmem:[%s16203_s7 + $0x1f08] sm:$0xff]  }
 0x44c   : > { %14495 = vmatpush3.bf16.msra.mxu0 %v15736_v27  ;;  %11750 = vmatmul.mubr.bf16.vlgmr.msra.gmra.mrb[116].mxu1 %v1155_v31  ;;  %v15775_v27 = vld [vmem:[%s16203_s7 + $0x1f50] sm:$0xff]   ;;  %v15779_v31 = vld [vmem:[%s16203_s7 + $0x1f58] sm:$0xff]  }
 0x44d   : > { %14496 = vmatprep.subr.bf16.mxu0 %v15738_v32  ;;  %14517 = vmatpush3.bf16.msra.mxu1 %v15737_v30  ;;  %v15777_v30 = vld [vmem:[%s16203_s7 + $0x1f10] sm:$0xff]  }
 0x44e   : > { %14518 = vmatprep.subr.bf16.mxu1 %v15739_v34  ;;  %11789 = vmatprep.mubr.bf16.mxu0 %v1158_v18  ;;  %v15778_v32 = vld [vmem:[%s16203_s7 + $0x1f90] sm:$0xff]   ;;  %v15781_v34 = vld [vmem:[%s16203_s7 + $0x1f18] sm:$0xff]  }
 0x44f   : > { %11829 = vmatprep.mubr.bf16.mxu1 %v1160_v23 }
 0x450   : > { %14497 = vmatpush3.bf16.msra.mxu0 %v15740_v35  ;;  %v15783_v35 = vld [vmem:[%s16203_s7 + $0x1f60] sm:$0xff]  }
 0x451   : > { %14498 = vmatprep.subr.bf16.mxu0 %v15742_v37  ;;  %14519 = vmatpush3.bf16.msra.mxu1 %v15741_v36  ;;  %v15782_v36 = vld [vmem:[%s16203_s7 + $0x1f98] sm:$0xff]   ;;  %v15784_v37 = vld [vmem:[%s16203_s7 + $0x1fe0] sm:$0xff]  }
 0x452   : > { %14520 = vmatprep.subr.bf16.mxu1 %v15743_v38  ;;  %v15785_v38 = vld [vmem:[%s16203_s7 + $0x1f20] sm:$0xff]  }
 0x454   : > { %14499 = vmatpush3.bf16.msra.mxu0 %v15744_v39  ;;  %v15787_v39 = vld [vmem:[%s16203_s7 + $0x1f68] sm:$0xff]  }
 0x455   : > { %14500 = vmatprep.subr.bf16.mxu0 %v15746_v41  ;;  %14521 = vmatpush3.bf16.msra.mxu1 %v15745_v40  ;;  %v15786_v40 = vld [vmem:[%s16203_s7 + $0x1fa0] sm:$0xff]  }
 0x456   : > { %14522 = vmatprep.subr.bf16.mxu1 %v15747_v43 }
 0x458   : > { %14501 = vmatpush3.bf16.msra.mxu0 %v15748_v44  ;;  %v15788_v44 = vld [vmem:[%s16203_s7 + $0x1fe8] sm:$0xff]  }
 0x459   : > { %14502 = vmatprep.subr.bf16.mxu0 %v15750_v46  ;;  %14523 = vmatpush3.bf16.msra.mxu1 %v15749_v45 }
 0x45a   : > { %14524 = vmatprep.subr.bf16.mxu1 %v15751_v47 }
 0x45c   : > { %14503 = vmatpush3.bf16.msra.mxu0 %v15752_v48  ;;  %v15789_v48 = vld [vmem:[%s16203_s7 + $0x1f28] sm:$0xff]  }
 0x45d   : > { %14504 = vmatprep.subr.bf16.mxu0 %v15754_v50  ;;  %14525 = vmatpush3.bf16.msra.mxu1 %v15753_v49  ;;  %v15791_v49 = vld [vmem:[%s16203_s7 + $0x1f70] sm:$0xff]  }
 0x45e   : > { %v14202_v51 = vpop.f32.mrb[92].mxu0  ;;  %14526 = vmatprep.subr.bf16.mxu1 %v15755_v52 }
 0x45f   : > { %v14203_v53 = vpop.f32.mrb[93].mxu0  ;;  %v14224_v55 = vpop.f32.mrb[92].mxu1 }
 0x460   : > { %v14204_v56 = vadd.f32 %v14203_v53, %v14202_v51  ;;  %v14205_v57 = vpop.f32.mrb[94].mxu0  ;;  %v14225_v60 = vpop.f32.mrb[93].mxu1  ;;  %14505 = vmatpush3.bf16.msra.mxu0 %v15756_v54 }
 0x461   : > { %v14206_v61 = vpop.f32.mrb[95].mxu0  ;;  %v14226_v63 = vadd.f32 %v14225_v60, %v14224_v55  ;;  %v14227_v0 = vpop.f32.mrb[94].mxu1  ;;  %14506 = vmatprep.subr.bf16.mxu0 %v15758_v59  ;;  %14527 = vmatpush3.bf16.msra.mxu1 %v15757_v58  ;;  %v15790_v55 = vld [vmem:[%s16203_s7 + $0x1fa8] sm:$0xff]   ;;  %v15792_v57 = vld [vmem:[%s16203_s7 + $0x1ff0] sm:$0xff]   ;;  %v15795_v60 = vld [vmem:[%s16203_s7 + $0x1f78] sm:$0xff]  }
 0x462   : > { %v11232_v62 = vadd.f32 %v14204_v56, %v17335_v13  ;;  %v14228_v2 = vpop.f32.mrb[95].mxu1  ;;  %14528 = vmatprep.subr.bf16.mxu1 %v15759_v1  ;;  %v15765_v13 = vld [vmem:[%s16203_s7 + $0x1eb8] sm:$0xff]   ;;  %v15793_v59 = vld [vmem:[%s16203_s7 + $0x1f30] sm:$0xff]  }
 0x463   : > { %v15794_v61 = vld [vmem:[%s16203_s7 + $0x1fb0] sm:$0xff]   ;;  %v15797_v0 = vld [vmem:[%s16203_s7 + $0x1f38] sm:$0xff]  }
 0x464   : > { %v17373_v4 = vadd.f32 %v14226_v63, %v11232_v62  ;;  %14507 = vmatpush3.bf16.msra.mxu0 %v15760_v3  ;;  %v15796_v62 = vld [vmem:[%s16203_s7 + $0x1ff8] sm:$0xff]  }
 0x465   : > { %14508 = vmatprep.subr.bf16.mxu0 %v15762_v6  ;;  %14529 = vmatpush3.bf16.msra.mxu1 %v15761_v5  ;;  %v332_v63 = vld [vmem:[%s16221_s27 + $0xf8] sm:$0xff] }
 0x466   : > { %14530 = vmatprep.subr.bf16.mxu1 %v15763_v7  ;;  %v899_v1 = vrot.slane %v332_v63, %v16260_v42  ;;  %v892_v2 = vcombine.high %v332_v63, %v332_v63  ;;  %v15798_v3 = vld [vmem:[%s16203_s7 + $0x1fb8] sm:$0xff]  }
 0x468   : > { %14509 = vmatpush3.bf16.msra.mxu0 %v15764_v8  ;;  %v906_v5 = vrot.slane %v892_v2, %v16260_v42  ;;  %v1161_v6 = vpack.c.bf16 %v899_v1, %v899_v1 }
 0x469   : > { %14538 = vmatprep.subr.bf16.mxu0 %v15767_v12  ;;  %14531 = vmatpush3.bf16.msra.mxu1 %v15765_v13 }
 0x46a   : > { %14560 = vmatprep.subr.bf16.mxu1 %v15768_v16  ;;  %v908_v8 = vcombine.high %v906_v5, %v906_v5  ;;  %v1163_v9 = vpack.c.bf16 %v906_v5, %v906_v5 }
 0x46b   : > { %11790 = vmatmul.mubr.bf16.vlgmr.msra.gmra.mrb[120].mxu0 %v1157_v17 }
 0x46c   : > { %14539 = vmatpush3.bf16.msra.mxu0 %v15769_v20  ;;  %11830 = vmatmul.mubr.bf16.vlgmr.msra.gmra.mrb[120].mxu1 %v1159_v21  ;;  %v1164_v10 = vpack.c.bf16 %v908_v8, %v908_v8 }
 0x46d   : > { %14540 = vmatprep.subr.bf16.mxu0 %v15771_v22  ;;  %14561 = vmatpush3.bf16.msra.mxu1 %v15770_v24 }
 0x46e   : > { %14562 = vmatprep.subr.bf16.mxu1 %v15772_v25  ;;  %11909 = vmatprep.mubr.bf16.mxu1 %v1164_v10 }
 0x470   : > { %14541 = vmatpush3.bf16.msra.mxu0 %v15773_v26 }
 0x471   : > { %14542 = vmatprep.subr.bf16.mxu0 %v15775_v27  ;;  %14563 = vmatpush3.bf16.msra.mxu1 %v15774_v28 }
 0x472   : > { %14564 = vmatprep.subr.bf16.mxu1 %v15776_v29 }
 0x474   : > { %14543 = vmatpush3.bf16.msra.mxu0 %v15777_v30 }
 0x475   : > { %14544 = vmatprep.subr.bf16.mxu0 %v15779_v31  ;;  %14565 = vmatpush3.bf16.msra.mxu1 %v15778_v32 }
 0x476   : > { %14566 = vmatprep.subr.bf16.mxu1 %v15780_v33 }
 0x478   : > { %14545 = vmatpush3.bf16.msra.mxu0 %v15781_v34 }
 0x479   : > { %14546 = vmatprep.subr.bf16.mxu0 %v15783_v35  ;;  %14567 = vmatpush3.bf16.msra.mxu1 %v15782_v36 }
 0x47a   : > { %14568 = vmatprep.subr.bf16.mxu1 %v15784_v37 }
 0x47c   : > { %14547 = vmatpush3.bf16.msra.mxu0 %v15785_v38 }
 0x47d   : > { %14548 = vmatprep.subr.bf16.mxu0 %v15787_v39  ;;  %14569 = vmatpush3.bf16.msra.mxu1 %v15786_v40 }
 0x47e   : > { %v14246_v41 = vpop.f32.mrb[96].mxu0  ;;  %14570 = vmatprep.subr.bf16.mxu1 %v15788_v44 }
 0x47f   : > { %v14247_v43 = vpop.f32.mrb[97].mxu0  ;;  %v14268_v45 = vpop.f32.mrb[96].mxu1 }
 0x480   : > { %v14248_v46 = vadd.f32 %v14247_v43, %v14246_v41  ;;  %v14249_v47 = vpop.f32.mrb[98].mxu0  ;;  %v14269_v50 = vpop.f32.mrb[97].mxu1  ;;  %14549 = vmatpush3.bf16.msra.mxu0 %v15789_v48 }
 0x481   : > { %v14250_v51 = vpop.f32.mrb[99].mxu0  ;;  %v14270_v53 = vadd.f32 %v14269_v50, %v14268_v45  ;;  %v14271_v54 = vpop.f32.mrb[98].mxu1  ;;  %14550 = vmatprep.subr.bf16.mxu0 %v15791_v49  ;;  %14571 = vmatpush3.bf16.msra.mxu1 %v15790_v55 }
 0x482   : > { %v11312_v52 = vadd.f32 %v14248_v46, %v17373_v4  ;;  %v14272_v56 = vpop.f32.mrb[99].mxu1  ;;  %14572 = vmatprep.subr.bf16.mxu1 %v15792_v57  ;;  %v907_v4 = vcombine.high %v899_v1, %v899_v1 }
 0x484   : > { %v11352_v58 = vadd.f32 %v14270_v53, %v11312_v52  ;;  %14551 = vmatpush3.bf16.msra.mxu0 %v15793_v59  ;;  %v1162_v7 = vpack.c.bf16 %v907_v4, %v907_v4 }
 0x485   : > { %14552 = vmatprep.subr.bf16.mxu0 %v15795_v60  ;;  %14573 = vmatpush3.bf16.msra.mxu1 %v15794_v61 }
 0x486   : > { %14574 = vmatprep.subr.bf16.mxu1 %v15796_v62  ;;  %11869 = vmatprep.mubr.bf16.mxu0 %v1162_v7 }
 0x488   : > { %14553 = vmatpush3.bf16.msra.mxu0 %v15797_v0 }
 0x489   : > { %14575 = vmatpush3.bf16.msra.mxu1 %v15798_v3 }
 0x48b   : > { %11870 = vmatmul.mubr.bf16.vlgmr.msra.gmra.mrb[124].mxu0 %v1161_v6 }
 0x48c   : > { %11910 = vmatmul.mubr.bf16.vlgmr.msra.gmra.mrb[124].mxu1 %v1163_v9 }
 0x49e   : > { %v14290_v11 = vpop.f32.mrb[100].mxu0 }
 0x49f   : > { %v14291_v12 = vpop.f32.mrb[101].mxu0  ;;  %v14312_v13 = vpop.f32.mrb[100].mxu1 }
 0x4a0   : > { %v14292_v14 = vadd.f32 %v14291_v12, %v14290_v11  ;;  %v14293_v15 = vpop.f32.mrb[102].mxu0  ;;  %v14313_v16 = vpop.f32.mrb[101].mxu1 }
 0x4a1   : > { %v14294_v17 = vpop.f32.mrb[103].mxu0  ;;  %v14314_v18 = vadd.f32 %v14313_v16, %v14312_v13  ;;  %v14315_v19 = vpop.f32.mrb[102].mxu1 }
 0x4a2   : > { %v11392_v42 = vadd.f32 %v14292_v14, %v11352_v58  ;;  %v14316_v20 = vpop.f32.mrb[103].mxu1 }
 0x4a4   : > { %v11432_v21 = vadd.f32 %v14314_v18, %v11392_v42 }
 0x4be   : > { %v14334_v22 = vpop.f32.mrb[104].mxu0 }
 0x4bf   : > { %v14335_v23 = vpop.f32.mrb[105].mxu0  ;;  %v14356_v24 = vpop.f32.mrb[104].mxu1 }
 0x4c0   : > { %v14336_v25 = vadd.f32 %v14335_v23, %v14334_v22  ;;  %v14337_v26 = vpop.f32.mrb[106].mxu0  ;;  %v14357_v27 = vpop.f32.mrb[105].mxu1 }
 0x4c1   : > { %v14338_v28 = vpop.f32.mrb[107].mxu0  ;;  %v14358_v30 = vadd.f32 %v14357_v27, %v14356_v24  ;;  %v14359_v31 = vpop.f32.mrb[106].mxu1 }
 0x4c2   : > { %v11472_v29 = vadd.f32 %v14336_v25, %v11432_v21  ;;  %v14360_v32 = vpop.f32.mrb[107].mxu1  ;;  %v300_v28 = vld [vmem:[#allocation2] sm:$0x3] }
 0x4c3   : > { %v11933_v32 = vld [vmem:[#allocation8] sm:$0xff] (!%p13166_p1) }
 0x4c4   : > { %v11512_v33 = vadd.f32 %v14358_v30, %v11472_v29 }
 0x4de   : > { %v14378_v34 = vpop.f32.mrb[108].mxu0 }
 0x4df   : > { %v14379_v35 = vpop.f32.mrb[109].mxu0  ;;  %v14400_v36 = vpop.f32.mrb[108].mxu1 }
 0x4e0   : > { %v14380_v37 = vadd.f32 %v14379_v35, %v14378_v34  ;;  %v14381_v38 = vpop.f32.mrb[110].mxu0  ;;  %v14401_v39 = vpop.f32.mrb[109].mxu1  ;;  %v11935_v34 = vld [vmem:[#allocation8 + $0x10] sm:$0xff] (!%p13166_p1)  ;;  %v15998_v35 = vmov (!%p13166_p1), 0.0|0.0  }
 0x4e1   : > { %v14382_v40 = vpop.f32.mrb[111].mxu0  ;;  %v14402_v43 = vadd.f32 %v14401_v39, %v14400_v36  ;;  %v14403_v44 = vpop.f32.mrb[110].mxu1  ;;  %14634 = vmatprep.subr.bf16.mxu0 (!%p13166_p1), %v15998_v35  ;;  %v16000_v38 = vmov (!%p13166_p1), 0.0  }
 0x4e2   : > { %v11552_v41 = vadd.f32 %v14380_v37, %v11512_v33  ;;  %v14404_v45 = vpop.f32.mrb[111].mxu1  ;;  %v11934_v33 = vld [vmem:[#allocation8 + $0x8] sm:$0xff] (!%p13166_p1)  ;;  %v11936_v37 = vld [vmem:[#allocation8 + $0x18] sm:$0xff] (!%p13166_p1)  ;;  %14631 = vmatprep.mubr.msk.f32.mxu0 (!%p13166_p1), %vm15999_vm0, %v16000_v38  ;;  %v11937_v40 = vld [vmem:[#allocation8 + $0x20] sm:$0xff] (!%p13166_p1) }
 0x4e3   : > { %v14635_v36 = vpack.c.bf16 (!%p13166_p1), %v11934_v33, %v11933_v32  ;;  %v14638_v39 = vpack.c.bf16 (!%p13166_p1), %v11936_v37, %v11935_v34  ;;  %v11939_v44 = vld [vmem:[#allocation8 + $0x30] sm:$0xff] (!%p13166_p1)  ;;  %v11940_v45 = vld [vmem:[#allocation8 + $0x38] sm:$0xff] (!%p13166_p1) }
 0x4e4   : > { %v11592_v46 = vadd.f32 %v14402_v43, %v11552_v41  ;;  %v11938_v41 = vld [vmem:[#allocation8 + $0x28] sm:$0xff] (!%p13166_p1) }
 0x4e5   : > { %14636 = vmatpush3.bf16.msra.mxu0 (!%p13166_p1), %v14635_v36  ;;  %v14641_v43 = vpack.c.bf16 (!%p13166_p1), %v11938_v41, %v11937_v40 }
 0x4e6   : > { %14637 = vmatprep.subr.bf16.mxu0 (!%p13166_p1), %v15998_v35 }
 0x4e9   : > { %14639 = vmatpush3.bf16.msra.mxu0 (!%p13166_p1), %v14638_v39 }
 0x4ea   : > { %14640 = vmatprep.subr.bf16.mxu0 (!%p13166_p1), %v15998_v35 }
 0x4ed   : > { %14642 = vmatpush3.bf16.msra.mxu0 (!%p13166_p1), %v14641_v43 }
 0x4ee   : > { %14643 = vmatprep.subr.bf16.mxu0 (!%p13166_p1), %v15998_v35 }
 0x4fe   : > { %v14422_v47 = vpop.f32.mrb[112].mxu0 }
 0x4ff   : > { %v14423_v48 = vpop.f32.mrb[113].mxu0  ;;  %v14444_v49 = vpop.f32.mrb[112].mxu1 }
 0x500   : > { %v14424_v50 = vadd.f32 %v14423_v48, %v14422_v47  ;;  %v14425_v51 = vpop.f32.mrb[114].mxu0  ;;  %v14445_v52 = vpop.f32.mrb[113].mxu1  ;;  %v11941_v47 = vld [vmem:[#allocation8 + $0x40] sm:$0xff] (!%p13166_p1)  ;;  %v11942_v48 = vld [vmem:[#allocation8 + $0x48] sm:$0xff] (!%p13166_p1) }
 0x501   : > { %v14426_v53 = vpop.f32.mrb[115].mxu0  ;;  %v14446_v55 = vadd.f32 %v14445_v52, %v14444_v49  ;;  %v14447_v56 = vpop.f32.mrb[114].mxu1  ;;  %v14647_v49 = vpack.c.bf16 (!%p13166_p1), %v11942_v48, %v11941_v47  ;;  %v11944_v51 = vld [vmem:[#allocation8 + $0x58] sm:$0xff] (!%p13166_p1) }
 0x502   : > { %v11632_v54 = vadd.f32 %v14424_v50, %v11592_v46  ;;  %v14448_v57 = vpop.f32.mrb[115].mxu1  ;;  %v14644_v46 = vpack.c.bf16 (!%p13166_p1), %v11940_v45, %v11939_v44  ;;  %v11943_v50 = vld [vmem:[#allocation8 + $0x50] sm:$0xff] (!%p13166_p1)  ;;  %v11945_v53 = vld [vmem:[#allocation8 + $0x60] sm:$0xff] (!%p13166_p1) }
 0x503   : > { %v14650_v52 = vpack.c.bf16 (!%p13166_p1), %v11944_v51, %v11943_v50  ;;  %v13167_v57 = vld [vmem:[#allocation6] ss:$0 sm:$0xff] (!%p13166_p1) }
 0x504   : > { %v11672_v58 = vadd.f32 %v14446_v55, %v11632_v54  ;;  %14645 = vmatpush3.bf16.msra.mxu0 (!%p13166_p1), %v14644_v46  ;;  %v11946_v54 = vld [vmem:[#allocation8 + $0x68] sm:$0xff] (!%p13166_p1) }
 0x505   : > { %14646 = vmatprep.subr.bf16.mxu0 (!%p13166_p1), %v15998_v35  ;;  %v14653_v55 = vpack.c.bf16 (!%p13166_p1), %v11946_v54, %v11945_v53 }
 0x508   : > { %14648 = vmatpush3.bf16.msra.mxu0 (!%p13166_p1), %v14647_v49 }
 0x509   : > { %14649 = vmatprep.subr.bf16.mxu0 (!%p13166_p1), %v15998_v35 }
 0x50c   : > { %14651 = vmatpush3.bf16.msra.mxu0 (!%p13166_p1), %v14650_v52 }
 0x50d   : > { %14652 = vmatprep.subr.bf16.mxu0 (!%p13166_p1), %v15998_v35 }
 0x510   : > { %14654 = vmatpush3.bf16.msra.mxu0 (!%p13166_p1), %v14653_v55 }
 0x511   : > { %14655 = vmatprep.subr.bf16.mxu0 (!%p13166_p1), %v15998_v35 }
 0x51e   : > { %v14466_v59 = vpop.f32.mrb[116].mxu0 }
 0x51f   : > { %v14467_v60 = vpop.f32.mrb[117].mxu0  ;;  %v14488_v61 = vpop.f32.mrb[116].mxu1 }
 0x520   : > { %v14468_v62 = vadd.f32 %v14467_v60, %v14466_v59  ;;  %v14469_v63 = vpop.f32.mrb[118].mxu0  ;;  %v14489_v0 = vpop.f32.mrb[117].mxu1  ;;  %v11948_v59 = vld [vmem:[#allocation8 + $0x78] sm:$0xff] (!%p13166_p1) }
 0x521   : > { %v14470_v1 = vpop.f32.mrb[119].mxu0  ;;  %v14490_v3 = vadd.f32 %v14489_v0, %v14488_v61  ;;  %v14491_v4 = vpop.f32.mrb[118].mxu1  ;;  %v13168_v63 = vld [vmem:[#allocation9] ss:$0 sm:$0xff] (!%p13166_p1) }
 0x522   : > { %v11712_v2 = vadd.f32 %v14468_v62, %v11672_v58  ;;  %v14492_v5 = vpop.f32.mrb[119].mxu1  ;;  %v11947_v58 = vld [vmem:[#allocation8 + $0x70] sm:$0xff] (!%p13166_p1) }
 0x523   : > { %v14656_v61 = vpack.c.bf16 (!%p13166_p1), %v11948_v59, %v11947_v58 }
 0x524   : > { %v11752_v6 = vadd.f32 %v14490_v3, %v11712_v2 }
 0x525   : > { %14657 = vmatpush3.bf16.msra.mxu0 (!%p13166_p1), %v14656_v61 }
 0x53e   : > { %v14510_v7 = vpop.f32.mrb[120].mxu0 }
 0x53f   : > { %v14511_v8 = vpop.f32.mrb[121].mxu0  ;;  %v14532_v9 = vpop.f32.mrb[120].mxu1 }
 0x540   : > { %v14512_v10 = vadd.f32 %v14511_v8, %v14510_v7  ;;  %v14513_v11 = vpop.f32.mrb[122].mxu0  ;;  %v14533_v12 = vpop.f32.mrb[121].mxu1 }
 0x541   : > { %v14514_v13 = vpop.f32.mrb[123].mxu0  ;;  %v14534_v15 = vadd.f32 %v14533_v12, %v14532_v9  ;;  %v14535_v16 = vpop.f32.mrb[122].mxu1 }
 0x542   : > { %v11792_v14 = vadd.f32 %v14512_v10, %v11752_v6  ;;  %v14536_v17 = vpop.f32.mrb[123].mxu1 }
 0x544   : > { %v11832_v42 = vadd.f32 %v14534_v15, %v11792_v14 }
 0x55e   : > { %v14554_v18 = vpop.f32.mrb[124].mxu0 }
 0x55f   : > { %v14555_v19 = vpop.f32.mrb[125].mxu0  ;;  %v14576_v20 = vpop.f32.mrb[124].mxu1 }
 0x560   : > { %v14556_v21 = vadd.f32 %v14555_v19, %v14554_v18  ;;  %v14557_v22 = vpop.f32.mrb[126].mxu0  ;;  %v14577_v23 = vpop.f32.mrb[125].mxu1 }
 0x561   : > { %v14558_v24 = vpop.f32.mrb[127].mxu0  ;;  %v14578_v26 = vadd.f32 %v14577_v23, %v14576_v20  ;;  %v14579_v27 = vpop.f32.mrb[126].mxu1 }
 0x562   : > { %v11872_v25 = vadd.f32 %v14556_v21, %v11832_v42  ;;  %v14580_v29 = vpop.f32.mrb[127].mxu1  ;;  %11922 = sbr.rel (%p13166_p1) target bundleno = 1611 (0x64b), region = 64 }
 0x564   : > { %v11912_v30 = vadd.f32 %v14578_v26, %v11872_v25 }
 0x566   : > { %v11917_v31 = vadd.f32 %v11912_v30, %v300_v28 }
 0x568   : > { %11918 = vst [vmem:[#allocation2] sm:$0x3] %v11917_v31 }
 0x56f   : > { %v11923_v56 = vld [vmem:[#allocation2] sm:$0x3] }
 0x570   : > { %v11931_v60 = vadd.f32 %v13167_v57, %v11923_v56 }
 0x572   : > { %v11932_v62 = vmax.f32 %v11931_v60, 0.0 }
 0x574   : > { %14632 = vmatmul.mubr.f32.vlgmr.msra.gmra.mrb[0].mxu0 %v11932_v62 }
 0x647   : > { %v12022_v0 = vpop.f32.mrb[0].mxu0 }
 0x648   : > { %v12023_v1 = vadd.f32 %v13168_v63, %v12022_v0  ;;  %v14633_v2 = vpop.f32.mrb[1].mxu0 }
 0x64a   : > { %12026 = vst [vmem:[#allocation11] sm:$0x3] %v12023_v1 }
 0x64b PF: > { %p14697_p4 = scmp.eq.s32.totalorder %s16051_s22, 3  ;;  %s16001_s21 = smov [#allocation11]  }
 0x64c   : > { %s12034_s8 = sshll.u32 %s16001_s21, 4  ;;  %s12035_s8 = int_to_ptr.vmem [resolvable:$true] %s12034_s8 }
 0x64d   : > { %s15914_s28 = scalar_lea.vmem %s12035_s8, 32  ;;  %p15921_p2 = scmp.lt.s32.totalorder %s12035_s8, %s12035_s8 }
 0x64e   : > { %p15915_p5 = scmp.ne.s32.totalorder %s12035_s8, %s15914_s28  ;;  %p15922_p6 = scmp.lt.s32.totalorder %s15914_s28, %s15914_s28 }
 0x650   : > { %p15916_p12 = pnand %p15915_p5, %p14697_p4  ;;  %p15923_p13 = por %p15922_p6, %p15921_p2 }
 0x652   : > { %p15917_p0 = pneg %p15916_p12 }
 0x654   : > { %p15924_p3 = pnand %p15923_p13, %p15917_p0 }
 0x656   : > { %15927 = shalt.err (!%p15924_p3)
}
 0x657   : > { %s15928_s26 = scalar_lea.hbm %s17461_s5, 32 }
 0x658   : > { %p15929_p8 = scmp.ne.s32.totalorder %s17461_s5, %s15928_s26  ;;  %p15934_p9 = scmp.lt.u32.totalorder %s15928_s26, %s17461_s5 }
 0x65a   : > { %p15930_p7 = pnand %p15929_p8, %p14697_p4 }
 0x65c   : > { %p15931_p10 = pneg %p15930_p7 }
 0x65e   : > { %p15936_p11 = pnand %p15934_p9, %p15931_p10 }
 0x660   : > { %15939 = shalt.err (!%p15936_p11)
}
 0x661   : > { %14673 = dma.vmem_to_hbm [thread:$0]  (%p14697_p4), %s12035_s8, 32, %s17461_s5, [#allocation5]  }
 0x662   : > { %15969 = dma.done.wait (%p14697_p4), [#allocation5], 32  }
 0x663   : > { %15971 = vsyncadd (%p14697_p4), [#allocation5], 4294967264 }
 0x664 PF: > { %p18_p1 = scmp.ge.s32.totalorder %s16147_s12, 6   ;;  %s17477_s18 = smov %s15978_s19 }
 0x665   : > { %s17478_s19 = smov %s15982_s20  ;;  %s17479_s20 = smov %s16157_s29 }
 0x666   : > { %s17480_s21 = smov %s16147_s12  ;;  %20 = sbr.rel (!%p18_p1) target bundleno = 6 (0x6), region = 100 }
 0x66d   :  { %12047 = vsyncpa [#allocation4], 1 }
 0x66e   :  { %12049 = vsyncpa [#allocation4 + $0x1], 1 }
 0x66f   :  { %12050 = vsyncpa [#allocation7], 1 }
 0x670   :  { %12051 = vsyncpa [#allocation10], 1 }
 0x671   :  { %12052 = vsyncpa [#allocation5], 1 }
 0x672   :  { %12054 = vsyncpa [#allocation5 + $0x1], 1 }

</bundles_post_ra>
